<compile_context>
chip_gen: v7x
topology: tpu7x:2x2x1
jax: 0.10.0
libtpu: 0.0.40
codegen_flags: <defaults>
</compile_context>

<pallas_src>
import functools

import jax
import jax.numpy as jnp
from jax.experimental import pallas as pl
from jax.experimental.pallas import tpu as pltpu


# Channel count at/above which the im2col concatenate (a 9x-inflated bf16 copy of the
# activation) is replaced by 9 per-tap accumulating MXU matmuls (K = C each).
_PER_TAP_MIN_CHANNELS = 64


def _conv_block_kernel(x_ref, w1_ref, b1_ref, w2_ref, b2_ref, o_ref,
                       xpad_ref, h1pad_ref, *, H, W, Cin, Cmid, Cout, use_pn):
    """One batch element: (WSConv3x3 + bias + LeakyReLU + PixelNorm) x 2, fused.

    x_ref:     (1, H, W, Cin)          bf16 input tile (NHWC, unpadded)
    w1_ref:    (9*Cin,  Cmid)          bf16 flattened, pre-scaled conv1 weights
    b1_ref:    (1, Cmid)               f32 bias
    w2_ref:    (9*Cmid, Cout)          bf16 flattened, pre-scaled conv2 weights
    b2_ref:    (1, Cout)               f32 bias
    o_ref:     (1, Cout, H*W)          f32 output tile (channel-major -> NCHW direct;
                                       lane axis = H*W -> lane-dense unmasked stores)
    xpad_ref:  (H+2, W+2, Cin)  bf16   VMEM scratch: zero-padded conv1 input
    h1pad_ref: (H+2, W+2, Cmid) bf16   VMEM scratch: zero-padded conv1 activation
    """
    f32 = jnp.float32
    bf16 = jnp.bfloat16

    def zero_border(pad_ref, c):
        # Only the 1-pixel halo needs zeroing — the interior is fully overwritten
        # right below. Small masked stores instead of a full-tile memset.
        pad_ref[0:1, :, :] = jnp.zeros((1, W + 2, c), bf16)
        pad_ref[H + 1:H + 2, :, :] = jnp.zeros((1, W + 2, c), bf16)
        pad_ref[:, 0:1, :] = jnp.zeros((H + 2, 1, c), bf16)
        pad_ref[:, W + 1:W + 2, :] = jnp.zeros((H + 2, 1, c), bf16)

    zero_border(xpad_ref, Cin)
    zero_border(h1pad_ref, Cmid)

    # In-kernel 1-pixel zero pad: interior <- input tile (already bf16).
    xpad_ref[1:H + 1, 1:W + 1, :] = x_ref[0]

    def conv3x3_act(pad_ref, c_in, w_ref, bias, apply_pn):
        xp = pad_ref[...]                                      # (H+2, W+2, c_in) bf16
        if c_in >= _PER_TAP_MIN_CHANNELS:
            # Production channel counts: 9 accumulating per-tap matmuls. Never builds
            # the 9x-inflated im2col patch (largest transient VMEM consumer); each
            # matmul still runs at full MXU K-width since K = c_in >= 64.
            acc = jnp.zeros((H * W, w_ref.shape[-1]), f32)
            for t in range(9):
                dy, dx = t // 3, t % 3
                tap = xp[dy:dy + H, dx:dx + W, :].reshape(H * W, c_in)
                acc = acc + jnp.dot(tap, w_ref[t * c_in:(t + 1) * c_in, :],
                                    preferred_element_type=f32)
        else:
            # Tiny channel counts: one large-K im2col matmul (K = 9*c_in) beats nine
            # K<64 matmuls on the MXU; the bf16 patch is small at these shapes.
            cols = [xp[dy:dy + H, dx:dx + W, :]
                    for dy in range(3) for dx in range(3)]     # 9 x (H, W, c_in) bf16
            patch = jnp.concatenate(cols, axis=-1).reshape(H * W, 9 * c_in)
            acc = jnp.dot(patch, w_ref[...], preferred_element_type=f32)
        acc = acc + bias                                       # bias add (f32)
        acc = jnp.where(acc >= 0.0, acc, 0.2 * acc)            # LeakyReLU(0.2), f32
        if apply_pn:                                           # PixelNorm over channels
            ms = jnp.mean(acc * acc, axis=-1, keepdims=True)
            acc = acc * jax.lax.rsqrt(ms + 1e-8)               # rsqrt -> EUP slot
        return acc                                             # (H*W, c_out) f32

    # conv1 -> leaky -> (pn); keep in VMEM (bf16) with a zero halo for conv2.
    h1 = conv3x3_act(xpad_ref, Cin, w1_ref, b1_ref[...], use_pn)        # (H*W, Cmid)
    h1pad_ref[1:H + 1, 1:W + 1, :] = h1.reshape(H, W, Cmid).astype(bf16)

    # conv2 -> leaky -> (pn) -> channel-major, lane-dense output (H*W on lanes).
    h2 = conv3x3_act(h1pad_ref, Cmid, w2_ref, b2_ref[...], use_pn)      # (H*W, Cout)
    o_ref[0] = jnp.transpose(h2, (1, 0)).astype(o_ref.dtype)            # (Cout, H*W)


def _vmem_limit_bytes(H, W, Cin, Cmid, Cout):
    """Explicit scoped-VMEM budget: defaults (16/32 MiB) are far below physical."""
    pad = (H + 2) * (W + 2) * (Cin + Cmid) * 2                  # bf16 halo scratches
    io = 2 * (H * W * Cin * 2) + 2 * (Cout * H * W * 4)         # double-buffered blocks
    wts = 2 * ((9 * Cin * Cmid + 9 * Cmid * Cout) * 2 + (Cmid + Cout) * 4)
    kmax = max(Cin, Cmid)
    transient = H * W * 9 * kmax * 2 + 2 * H * W * max(Cmid, Cout) * 4  # patch + f32 accs
    est = pad + io + wts + transient
    try:
        cap = pltpu.get_tpu_info().vmem_capacity_bytes          # per-generation VMEM
    except Exception:
        cap = 64 << 20                                          # conservative (v7x)
    return int(min(max(2 * est, 32 << 20), int(0.75 * cap)))


def _conv_block_pallas(x_nhwc_bf16, w1_flat, b1, w2_flat, b2, *, use_pn):
    """Run the fused ConvBlock kernel. Returns (N, Cout, H*W) float32 (NCHW-flat)."""
    N, H, W, Cin = x_nhwc_bf16.shape
    Cmid = w1_flat.shape[-1]
    Cout = w2_flat.shape[-1]

    kernel = functools.partial(
        _conv_block_kernel, H=H, W=W, Cin=Cin, Cmid=Cmid, Cout=Cout, use_pn=use_pn)

    flops = 2 * N * H * W * 9 * (Cin * Cmid + Cmid * Cout)
    transcendentals = 2 * N * H * W if use_pn else 0
    bytes_accessed = (N * H * W * Cin * 2                       # bf16 input
                      + (9 * Cin * Cmid + 9 * Cmid * Cout) * 2  # bf16 weights
                      + (Cmid + Cout) * 4                       # biases
                      + N * H * W * Cout * 4)                   # f32 output

    return pl.pallas_call(
        kernel,
        out_shape=jax.ShapeDtypeStruct((N, Cout, H * W), jnp.float32),
        grid_spec=pltpu.PrefetchScalarGridSpec(
            num_scalar_prefetch=0,
            grid=(N,),
            in_specs=[
                pl.BlockSpec((1, H, W, Cin), lambda n: (n, 0, 0, 0)),
                pl.BlockSpec((9 * Cin, Cmid), lambda n: (0, 0)),
                pl.BlockSpec((1, Cmid), lambda n: (0, 0)),
                pl.BlockSpec((9 * Cmid, Cout), lambda n: (0, 0)),
                pl.BlockSpec((1, Cout), lambda n: (0, 0)),
            ],
            out_specs=pl.BlockSpec((1, Cout, H * W), lambda n: (n, 0, 0)),
            scratch_shapes=[
                pltpu.VMEM((H + 2, W + 2, Cin), jnp.bfloat16),
                pltpu.VMEM((H + 2, W + 2, Cmid), jnp.bfloat16),
            ],
        ),
        compiler_params=pltpu.CompilerParams(
            dimension_semantics=("parallel",),
            vmem_limit_bytes=_vmem_limit_bytes(H, W, Cin, Cmid, Cout),
        ),
        cost_estimate=pl.CostEstimate(
            flops=int(flops),
            transcendentals=int(transcendentals),
            bytes_accessed=int(bytes_accessed),
        ),
    )(x_nhwc_bf16, w1_flat, b1, w2_flat, b2)


def conv_block_forward(x_nchw, params, *, use_pixelnorm=True):
    """ConvBlock.forward: conv1 -> leaky -> pn -> conv2 -> leaky -> pn.

    x_nchw: (N, Cin, H, W) float32 (PyTorch NCHW convention).
    returns (N, Cout, H, W) float32.
    """
    N, Cin, H, W = x_nchw.shape
    Cmid = params["w1"].shape[-1]
    Cout = params["w2"].shape[-1]

    # WSConv2D scales: fold into the weights (conv is linear -> identical math).
    scale1 = (2.0 / (Cin * 9)) ** 0.5
    scale2 = (2.0 / (Cmid * 9)) ** 0.5
    w1_flat = (params["w1"].astype(jnp.float32) * scale1).reshape(9 * Cin, Cmid)
    w2_flat = (params["w2"].astype(jnp.float32) * scale2).reshape(9 * Cmid, Cout)

    # NCHW -> NHWC for the kernel's channel-minor matmuls; cast to bf16 first so the
    # transpose moves half the bytes. The kernel writes channel-major (N, Cout, H*W),
    # so no output transpose is needed at all.
    x = jnp.transpose(x_nchw.astype(jnp.bfloat16), (0, 2, 3, 1))

    out_flat = _conv_block_pallas(
        x,
        w1_flat.astype(jnp.bfloat16),
        params["b1"].reshape(1, Cmid).astype(jnp.float32),
        w2_flat.astype(jnp.bfloat16),
        params["b2"].reshape(1, Cout).astype(jnp.float32),
        use_pn=use_pixelnorm,
    )                                                   # (N, Cout, H*W) f32
    return out_flat.reshape(N, Cout, H, W)              # NCHW, no transpose


def init_conv_block_params(key, in_channels, out_channels):
    """Matches WSConv2D.__init__: conv.weight ~ N(0,1) (stored as HWIO), bias = 0."""
    k1, k2 = jax.random.split(key)
    w1_oihw = jax.random.normal(k1, (out_channels, in_channels, 3, 3), jnp.float32)
    w2_oihw = jax.random.normal(k2, (out_channels, out_channels, 3, 3), jnp.float32)
    return {
        "w1": jnp.transpose(w1_oihw, (2, 3, 1, 0)),     # (3,3,Cin,Cout)
        "b1": jnp.zeros((out_channels,), jnp.float32),
        "w2": jnp.transpose(w2_oihw, (2, 3, 1, 0)),     # (3,3,Cout,Cout)
        "b2": jnp.zeros((out_channels,), jnp.float32),
    }


def _reference_conv_block(x_nchw, params, use_pixelnorm=True):
    """Pure-JAX f32 reference of the PyTorch ConvBlock (for a sanity check)."""
    x = jnp.transpose(x_nchw, (0, 2, 3, 1)).astype(jnp.float32)

    def layer(x, w_hwio, b, c_in):
        scale = (2.0 / (c_in * 9)) ** 0.5
        y = jax.lax.conv_general_dilated(
            x * scale, w_hwio, window_strides=(1, 1), padding="SAME",
            dimension_numbers=("NHWC", "HWIO", "NHWC"))
        y = y + b.reshape(1, 1, 1, -1)
        y = jnp.where(y >= 0.0, y, 0.2 * y)
        if use_pixelnorm:
            ms = jnp.mean(y * y, axis=-1, keepdims=True)
            y = y / jnp.sqrt(ms + 1e-8)
        return y

    y = layer(x, params["w1"], params["b1"], x.shape[-1])
    y = layer(y, params["w2"], params["b2"], params["w1"].shape[-1])
    return jnp.transpose(y, (0, 3, 1, 2))


if __name__ == "__main__":
    key = jax.random.PRNGKey(0)
    k_x, k_p = jax.random.split(key)

    N, Cin, Cout, H, W = 2, 4, 8, 16, 16
    x = jax.random.normal(k_x, (N, Cin, H, W), jnp.float32)     # NCHW like PyTorch
    params = init_conv_block_params(k_p, Cin, Cout)

    fwd = jax.jit(functools.partial(conv_block_forward, use_pixelnorm=True))
    out = jax.block_until_ready(fwd(x, params))

    assert out.shape == (N, Cout, H, W), out.shape
    assert bool(jnp.all(jnp.isfinite(out)))

    # Relative-error check against the pure-JAX f32 reference (bf16 MXU operands).
    ref = jax.block_until_ready(_reference_conv_block(x, params, use_pixelnorm=True))
    rel_err = float(jnp.max(jnp.abs(out - ref)) / (jnp.max(jnp.abs(ref)) + 1e-6))
    assert rel_err < 5e-2, f"relative error vs f32 reference too large: {rel_err}"

    print("KERNEL_OK")
</pallas_src>

<mosaic_0001>
module attributes {stable_mosaic.version = 11 : i64} {
  func.func @_conv_block_kernel(%arg0: i32, %arg1: memref<1x16x16x4xbf16, #tpu.memory_space<vmem>>, %arg2: memref<36x8xbf16, #tpu.memory_space<vmem>>, %arg3: memref<1x8xf32, #tpu.memory_space<vmem>>, %arg4: memref<72x8xbf16, #tpu.memory_space<vmem>>, %arg5: memref<1x8xf32, #tpu.memory_space<vmem>>, %arg6: memref<1x8x256xf32, #tpu.memory_space<vmem>>, %arg7: memref<18x18x4xbf16, #tpu.memory_space<vmem>>, %arg8: memref<18x18x8xbf16, #tpu.memory_space<vmem>>) attributes {dimension_semantics = [#tpu.dimension_semantics<parallel>], iteration_bounds = array<i64: 2>, scalar_prefetch = 0 : i64, scratch_operands = 2 : i64, tpu.core_type = #tpu.core_type<tc>, window_params = [{transform_indices = @transform_0, window_bounds = array<i64: 1, 16, 16, 4>}, {pipeline_mode = #tpu.pipeline_mode<synchronous>, transform_indices = @transform_1, window_bounds = array<i64: 36, 8>}, {pipeline_mode = #tpu.pipeline_mode<synchronous>, transform_indices = @transform_2, window_bounds = array<i64: 1, 8>}, {pipeline_mode = #tpu.pipeline_mode<synchronous>, transform_indices = @transform_3, window_bounds = array<i64: 72, 8>}, {pipeline_mode = #tpu.pipeline_mode<synchronous>, transform_indices = @transform_4, window_bounds = array<i64: 1, 8>}, {transform_indices = @transform_5, window_bounds = array<i64: 1, 8, 256>}]} {
    %cst = arith.constant 0.000000e+00 : bf16
    %0 = vector.broadcast %cst : bf16 to vector<1x18x4xbf16>
    %c0 = arith.constant 0 : index
    %c0_0 = arith.constant 0 : index
    %c0_1 = arith.constant 0 : index
    %1 = vector.load %arg7[%c0, %c0_0, %c0_1] : memref<18x18x4xbf16, #tpu.memory_space<vmem>>, vector<1x18x4xbf16>
    tpu.vector_store %arg7[%c0, %c0_0, %c0_1], %0 {strides = array<i32>} : memref<18x18x4xbf16, #tpu.memory_space<vmem>>, vector<1x18x4xbf16>,
    %cst_2 = arith.constant 0.000000e+00 : bf16
    %2 = vector.broadcast %cst_2 : bf16 to vector<1x18x4xbf16>
    %c17 = arith.constant 17 : index
    %c0_3 = arith.constant 0 : index
    %c0_4 = arith.constant 0 : index
    %3 = vector.load %arg7[%c17, %c0_3, %c0_4] : memref<18x18x4xbf16, #tpu.memory_space<vmem>>, vector<1x18x4xbf16>
    tpu.vector_store %arg7[%c17, %c0_3, %c0_4], %2 {strides = array<i32>} : memref<18x18x4xbf16, #tpu.memory_space<vmem>>, vector<1x18x4xbf16>,
    %cst_5 = arith.constant 0.000000e+00 : bf16
    %4 = vector.broadcast %cst_5 : bf16 to vector<18x1x4xbf16>
    %c0_6 = arith.constant 0 : index
    %c0_7 = arith.constant 0 : index
    %c0_8 = arith.constant 0 : index
    %5 = vector.load %arg7[%c0_6, %c0_7, %c0_8] : memref<18x18x4xbf16, #tpu.memory_space<vmem>>, vector<18x1x4xbf16>
    tpu.vector_store %arg7[%c0_6, %c0_7, %c0_8], %4 {strides = array<i32>} : memref<18x18x4xbf16, #tpu.memory_space<vmem>>, vector<18x1x4xbf16>,
    %cst_9 = arith.constant 0.000000e+00 : bf16
    %6 = vector.broadcast %cst_9 : bf16 to vector<18x1x4xbf16>
    %c0_10 = arith.constant 0 : index
    %c17_11 = arith.constant 17 : index
    %c0_12 = arith.constant 0 : index
    %7 = vector.load %arg7[%c0_10, %c17_11, %c0_12] : memref<18x18x4xbf16, #tpu.memory_space<vmem>>, vector<18x1x4xbf16>
    tpu.vector_store %arg7[%c0_10, %c17_11, %c0_12], %6 {strides = array<i32>} : memref<18x18x4xbf16, #tpu.memory_space<vmem>>, vector<18x1x4xbf16>,
    %cst_13 = arith.constant 0.000000e+00 : bf16
    %8 = vector.broadcast %cst_13 : bf16 to vector<1x18x8xbf16>
    %c0_14 = arith.constant 0 : index
    %c0_15 = arith.constant 0 : index
    %c0_16 = arith.constant 0 : index
    %9 = vector.load %arg8[%c0_14, %c0_15, %c0_16] : memref<18x18x8xbf16, #tpu.memory_space<vmem>>, vector<1x18x8xbf16>
    tpu.vector_store %arg8[%c0_14, %c0_15, %c0_16], %8 {strides = array<i32>} : memref<18x18x8xbf16, #tpu.memory_space<vmem>>, vector<1x18x8xbf16>,
    %cst_17 = arith.constant 0.000000e+00 : bf16
    %10 = vector.broadcast %cst_17 : bf16 to vector<1x18x8xbf16>
    %c17_18 = arith.constant 17 : index
    %c0_19 = arith.constant 0 : index
    %c0_20 = arith.constant 0 : index
    %11 = vector.load %arg8[%c17_18, %c0_19, %c0_20] : memref<18x18x8xbf16, #tpu.memory_space<vmem>>, vector<1x18x8xbf16>
    tpu.vector_store %arg8[%c17_18, %c0_19, %c0_20], %10 {strides = array<i32>} : memref<18x18x8xbf16, #tpu.memory_space<vmem>>, vector<1x18x8xbf16>,
    %cst_21 = arith.constant 0.000000e+00 : bf16
    %12 = vector.broadcast %cst_21 : bf16 to vector<18x1x8xbf16>
    %c0_22 = arith.constant 0 : index
    %c0_23 = arith.constant 0 : index
    %c0_24 = arith.constant 0 : index
    %13 = vector.load %arg8[%c0_22, %c0_23, %c0_24] : memref<18x18x8xbf16, #tpu.memory_space<vmem>>, vector<18x1x8xbf16>
    tpu.vector_store %arg8[%c0_22, %c0_23, %c0_24], %12 {strides = array<i32>} : memref<18x18x8xbf16, #tpu.memory_space<vmem>>, vector<18x1x8xbf16>,
    %cst_25 = arith.constant 0.000000e+00 : bf16
    %14 = vector.broadcast %cst_25 : bf16 to vector<18x1x8xbf16>
    %c0_26 = arith.constant 0 : index
    %c17_27 = arith.constant 17 : index
    %c0_28 = arith.constant 0 : index
    %15 = vector.load %arg8[%c0_26, %c17_27, %c0_28] : memref<18x18x8xbf16, #tpu.memory_space<vmem>>, vector<18x1x8xbf16>
    tpu.vector_store %arg8[%c0_26, %c17_27, %c0_28], %14 {strides = array<i32>} : memref<18x18x8xbf16, #tpu.memory_space<vmem>>, vector<18x1x8xbf16>,
    %c0_29 = arith.constant 0 : index
    %c0_30 = arith.constant 0 : index
    %c0_31 = arith.constant 0 : index
    %c0_32 = arith.constant 0 : index
    %16 = vector.load %arg1[%c0_29, %c0_30, %c0_31, %c0_32] : memref<1x16x16x4xbf16, #tpu.memory_space<vmem>>, vector<1x16x16x4xbf16>
    %17 = vector.shape_cast %16 : vector<1x16x16x4xbf16> to vector<16x16x4xbf16>
    %c1 = arith.constant 1 : index
    %c1_33 = arith.constant 1 : index
    %c0_34 = arith.constant 0 : index
    %18 = vector.load %arg7[%c1, %c1_33, %c0_34] : memref<18x18x4xbf16, #tpu.memory_space<vmem>>, vector<16x16x4xbf16>
    tpu.vector_store %arg7[%c1, %c1_33, %c0_34], %17 {strides = array<i32>} : memref<18x18x4xbf16, #tpu.memory_space<vmem>>, vector<16x16x4xbf16>,
    %c0_35 = arith.constant 0 : index
    %c0_36 = arith.constant 0 : index
    %19 = vector.load %arg3[%c0_35, %c0_36] : memref<1x8xf32, #tpu.memory_space<vmem>>, vector<1x8xf32>
    %c0_37 = arith.constant 0 : index
    %c0_38 = arith.constant 0 : index
    %c0_39 = arith.constant 0 : index
    %20 = vector.load %arg7[%c0_37, %c0_38, %c0_39] : memref<18x18x4xbf16, #tpu.memory_space<vmem>>, vector<18x18x4xbf16>
    %21 = vector.extract_strided_slice %20 {offsets = [0, 0, 0], sizes = [16, 16, 4], strides = [1, 1, 1]} : vector<18x18x4xbf16> to vector<16x16x4xbf16>
    %22 = vector.extract_strided_slice %20 {offsets = [0, 1, 0], sizes = [16, 16, 4], strides = [1, 1, 1]} : vector<18x18x4xbf16> to vector<16x16x4xbf16>
    %23 = vector.extract_strided_slice %20 {offsets = [0, 2, 0], sizes = [16, 16, 4], strides = [1, 1, 1]} : vector<18x18x4xbf16> to vector<16x16x4xbf16>
    %24 = vector.extract_strided_slice %20 {offsets = [1, 0, 0], sizes = [16, 16, 4], strides = [1, 1, 1]} : vector<18x18x4xbf16> to vector<16x16x4xbf16>
    %25 = vector.extract_strided_slice %20 {offsets = [1, 1, 0], sizes = [16, 16, 4], strides = [1, 1, 1]} : vector<18x18x4xbf16> to vector<16x16x4xbf16>
    %26 = vector.extract_strided_slice %20 {offsets = [1, 2, 0], sizes = [16, 16, 4], strides = [1, 1, 1]} : vector<18x18x4xbf16> to vector<16x16x4xbf16>
    %27 = vector.extract_strided_slice %20 {offsets = [2, 0, 0], sizes = [16, 16, 4], strides = [1, 1, 1]} : vector<18x18x4xbf16> to vector<16x16x4xbf16>
    %28 = vector.extract_strided_slice %20 {offsets = [2, 1, 0], sizes = [16, 16, 4], strides = [1, 1, 1]} : vector<18x18x4xbf16> to vector<16x16x4xbf16>
    %29 = vector.extract_strided_slice %20 {offsets = [2, 2, 0], sizes = [16, 16, 4], strides = [1, 1, 1]} : vector<18x18x4xbf16> to vector<16x16x4xbf16>
    %30 = tpu.concatenate %21, %22, %23, %24, %25, %26, %27, %28, %29 in 2 : vector<16x16x4xbf16>, vector<16x16x4xbf16>, vector<16x16x4xbf16>, vector<16x16x4xbf16>, vector<16x16x4xbf16>, vector<16x16x4xbf16>, vector<16x16x4xbf16>, vector<16x16x4xbf16>, vector<16x16x4xbf16> -> vector<16x16x36xbf16>
    %31 = vector.shape_cast %30 : vector<16x16x36xbf16> to vector<256x36xbf16>
    %c0_40 = arith.constant 0 : index
    %c0_41 = arith.constant 0 : index
    %32 = vector.load %arg2[%c0_40, %c0_41] : memref<36x8xbf16, #tpu.memory_space<vmem>>, vector<36x8xbf16>
    %cst_42 = arith.constant dense<0.000000e+00> : vector<256x8xf32>
    %33 = tpu.matmul %31, %32, %cst_42 {dimension_numbers = #tpu.dot_dimension_numbers<[1], [0], [0], [1], [0, 0, 1, 1], [], []>} : vector<256x36xbf16>, vector<36x8xbf16>, vector<256x8xf32> -> vector<256x8xf32>
    %34 = vector.broadcast %19 : vector<1x8xf32> to vector<256x8xf32>
    %35 = arith.addf %33, %34 : vector<256x8xf32>
    %cst_43 = arith.constant 0.000000e+00 : f32
    %36 = vector.broadcast %cst_43 : f32 to vector<256x8xf32>
    %37 = arith.cmpf oge, %35, %36 : vector<256x8xf32>
    %cst_44 = arith.constant 2.000000e-01 : f32
    %38 = vector.broadcast %cst_44 : f32 to vector<256x8xf32>
    %39 = arith.mulf %38, %35 : vector<256x8xf32>
    %40 = arith.select %37, %35, %39 : vector<256x8xi1>, vector<256x8xf32>
    %41 = arith.mulf %40, %40 : vector<256x8xf32>
    %cst_45 = arith.constant dense<0.000000e+00> : vector<256xf32>
    %42 = vector.multi_reduction <add>, %41, %cst_45 [1] : vector<256x8xf32> to vector<256xf32>
    %43 = vector.shape_cast %42 : vector<256xf32> to vector<256x1xf32>
    %cst_46 = arith.constant 8.000000e+00 : f32
    %44 = vector.broadcast %cst_46 : f32 to vector<256x1xf32>
    %45 = arith.divf %43, %44 : vector<256x1xf32>
    %cst_47 = arith.constant 9.99999993E-9 : f32
    %46 = vector.broadcast %cst_47 : f32 to vector<256x1xf32>
    %47 = arith.addf %45, %46 : vector<256x1xf32>
    %48 = math.rsqrt %47 : vector<256x1xf32>
    %49 = vector.broadcast %48 : vector<256x1xf32> to vector<256x8xf32>
    %50 = arith.mulf %40, %49 : vector<256x8xf32>
    %51 = vector.shape_cast %50 : vector<256x8xf32> to vector<16x16x8xf32>
    %52 = arith.truncf %51 : vector<16x16x8xf32> to vector<16x16x8xbf16>
    %c1_48 = arith.constant 1 : index
    %c1_49 = arith.constant 1 : index
    %c0_50 = arith.constant 0 : index
    %53 = vector.load %arg8[%c1_48, %c1_49, %c0_50] : memref<18x18x8xbf16, #tpu.memory_space<vmem>>, vector<16x16x8xbf16>
    tpu.vector_store %arg8[%c1_48, %c1_49, %c0_50], %52 {strides = array<i32>} : memref<18x18x8xbf16, #tpu.memory_space<vmem>>, vector<16x16x8xbf16>,
    %c0_51 = arith.constant 0 : index
    %c0_52 = arith.constant 0 : index
    %54 = vector.load %arg5[%c0_51, %c0_52] : memref<1x8xf32, #tpu.memory_space<vmem>>, vector<1x8xf32>
    %c0_53 = arith.constant 0 : index
    %c0_54 = arith.constant 0 : index
    %c0_55 = arith.constant 0 : index
    %55 = vector.load %arg8[%c0_53, %c0_54, %c0_55] : memref<18x18x8xbf16, #tpu.memory_space<vmem>>, vector<18x18x8xbf16>
    %56 = vector.extract_strided_slice %55 {offsets = [0, 0, 0], sizes = [16, 16, 8], strides = [1, 1, 1]} : vector<18x18x8xbf16> to vector<16x16x8xbf16>
    %57 = vector.extract_strided_slice %55 {offsets = [0, 1, 0], sizes = [16, 16, 8], strides = [1, 1, 1]} : vector<18x18x8xbf16> to vector<16x16x8xbf16>
    %58 = vector.extract_strided_slice %55 {offsets = [0, 2, 0], sizes = [16, 16, 8], strides = [1, 1, 1]} : vector<18x18x8xbf16> to vector<16x16x8xbf16>
    %59 = vector.extract_strided_slice %55 {offsets = [1, 0, 0], sizes = [16, 16, 8], strides = [1, 1, 1]} : vector<18x18x8xbf16> to vector<16x16x8xbf16>
    %60 = vector.extract_strided_slice %55 {offsets = [1, 1, 0], sizes = [16, 16, 8], strides = [1, 1, 1]} : vector<18x18x8xbf16> to vector<16x16x8xbf16>
    %61 = vector.extract_strided_slice %55 {offsets = [1, 2, 0], sizes = [16, 16, 8], strides = [1, 1, 1]} : vector<18x18x8xbf16> to vector<16x16x8xbf16>
    %62 = vector.extract_strided_slice %55 {offsets = [2, 0, 0], sizes = [16, 16, 8], strides = [1, 1, 1]} : vector<18x18x8xbf16> to vector<16x16x8xbf16>
    %63 = vector.extract_strided_slice %55 {offsets = [2, 1, 0], sizes = [16, 16, 8], strides = [1, 1, 1]} : vector<18x18x8xbf16> to vector<16x16x8xbf16>
    %64 = vector.extract_strided_slice %55 {offsets = [2, 2, 0], sizes = [16, 16, 8], strides = [1, 1, 1]} : vector<18x18x8xbf16> to vector<16x16x8xbf16>
    %65 = tpu.concatenate %56, %57, %58, %59, %60, %61, %62, %63, %64 in 2 : vector<16x16x8xbf16>, vector<16x16x8xbf16>, vector<16x16x8xbf16>, vector<16x16x8xbf16>, vector<16x16x8xbf16>, vector<16x16x8xbf16>, vector<16x16x8xbf16>, vector<16x16x8xbf16>, vector<16x16x8xbf16> -> vector<16x16x72xbf16>
    %66 = vector.shape_cast %65 : vector<16x16x72xbf16> to vector<256x72xbf16>
    %c0_56 = arith.constant 0 : index
    %c0_57 = arith.constant 0 : index
    %67 = vector.load %arg4[%c0_56, %c0_57] : memref<72x8xbf16, #tpu.memory_space<vmem>>, vector<72x8xbf16>
    %cst_58 = arith.constant dense<0.000000e+00> : vector<256x8xf32>
    %68 = tpu.matmul %66, %67, %cst_58 {dimension_numbers = #tpu.dot_dimension_numbers<[1], [0], [0], [1], [0, 0, 1, 1], [], []>} : vector<256x72xbf16>, vector<72x8xbf16>, vector<256x8xf32> -> vector<256x8xf32>
    %69 = vector.broadcast %54 : vector<1x8xf32> to vector<256x8xf32>
    %70 = arith.addf %68, %69 : vector<256x8xf32>
    %cst_59 = arith.constant 0.000000e+00 : f32
    %71 = vector.broadcast %cst_59 : f32 to vector<256x8xf32>
    %72 = arith.cmpf oge, %70, %71 : vector<256x8xf32>
    %cst_60 = arith.constant 2.000000e-01 : f32
    %73 = vector.broadcast %cst_60 : f32 to vector<256x8xf32>
    %74 = arith.mulf %73, %70 : vector<256x8xf32>
    %75 = arith.select %72, %70, %74 : vector<256x8xi1>, vector<256x8xf32>
    %76 = arith.mulf %75, %75 : vector<256x8xf32>
    %cst_61 = arith.constant dense<0.000000e+00> : vector<256xf32>
    %77 = vector.multi_reduction <add>, %76, %cst_61 [1] : vector<256x8xf32> to vector<256xf32>
    %78 = vector.shape_cast %77 : vector<256xf32> to vector<256x1xf32>
    %cst_62 = arith.constant 8.000000e+00 : f32
    %79 = vector.broadcast %cst_62 : f32 to vector<256x1xf32>
    %80 = arith.divf %78, %79 : vector<256x1xf32>
    %cst_63 = arith.constant 9.99999993E-9 : f32
    %81 = vector.broadcast %cst_63 : f32 to vector<256x1xf32>
    %82 = arith.addf %80, %81 : vector<256x1xf32>
    %83 = math.rsqrt %82 : vector<256x1xf32>
    %84 = vector.broadcast %83 : vector<256x1xf32> to vector<256x8xf32>
    %85 = arith.mulf %75, %84 : vector<256x8xf32>
    %86 = tpu.transpose %85, [1, 0] : vector<256x8xf32> -> vector<8x256xf32>
    %c0_64 = arith.constant 0 : index
    %c0_65 = arith.constant 0 : index
    %c0_66 = arith.constant 0 : index
    %87 = vector.load %arg6[%c0_64, %c0_65, %c0_66] : memref<1x8x256xf32, #tpu.memory_space<vmem>>, vector<1x8x256xf32>
    %88 = vector.shape_cast %87 : vector<1x8x256xf32> to vector<8x256xf32>
    %89 = vector.shape_cast %86 : vector<8x256xf32> to vector<1x8x256xf32>
    tpu.vector_store %arg6[%c0_64, %c0_65, %c0_66], %89 {strides = array<i32>} : memref<1x8x256xf32, #tpu.memory_space<vmem>>, vector<1x8x256xf32>,
    return
  }
  func.func @transform_0(%arg0: i32) -> (i32, i32, i32, i32) {
    %c0_i32 = arith.constant 0 : i32
    %c0_i32_0 = arith.constant 0 : i32
    %c0_i32_1 = arith.constant 0 : i32
    %c0_i32_2 = arith.constant 0 : i32
    return %arg0, %c0_i32, %c0_i32_0, %c0_i32_1 : i32, i32, i32, i32
  }
  func.func @transform_1(%arg0: i32) -> (i32, i32) {
    %c0_i32 = arith.constant 0 : i32
    %c0_i32_0 = arith.constant 0 : i32
    %c0_i32_1 = arith.constant 0 : i32
    return %c0_i32, %c0_i32_0 : i32, i32
  }
  func.func @transform_2(%arg0: i32) -> (i32, i32) {
    %c0_i32 = arith.constant 0 : i32
    %c0_i32_0 = arith.constant 0 : i32
    %c0_i32_1 = arith.constant 0 : i32
    return %c0_i32, %c0_i32_0 : i32, i32
  }
  func.func @transform_3(%arg0: i32) -> (i32, i32) {
    %c0_i32 = arith.constant 0 : i32
    %c0_i32_0 = arith.constant 0 : i32
    %c0_i32_1 = arith.constant 0 : i32
    return %c0_i32, %c0_i32_0 : i32, i32
  }
  func.func @transform_4(%arg0: i32) -> (i32, i32) {
    %c0_i32 = arith.constant 0 : i32
    %c0_i32_0 = arith.constant 0 : i32
    %c0_i32_1 = arith.constant 0 : i32
    return %c0_i32, %c0_i32_0 : i32, i32
  }
  func.func @transform_5(%arg0: i32) -> (i32, i32, i32) {
    %c0_i32 = arith.constant 0 : i32
    %c0_i32_0 = arith.constant 0 : i32
    %c0_i32_1 = arith.constant 0 : i32
    return %arg0, %c0_i32, %c0_i32_0 : i32, i32, i32
  }
}

</mosaic_0001>

<bundles_post_ra>
// kernel: conv_block_forward.1
= control target key start
LH: loop header
LB: loop body
LE: loop exit
PB: predicated region body
PF: predicated region fallthrough
CT: control target
= control target key end

     0   :  { %s5344_s18 = smov 0   ;;  %s7522_s0 = inlined_call_operand.vmem [shape: bf16[2,16,16,4], index: 0, kind: input, shape index: {}]   ;;  %s7523_s1 = inlined_call_operand.vmem [shape: bf16[36,8], index: 1, kind: input, shape index: {}]   ;;  %s7524_s2 = inlined_call_operand.vmem [shape: f32[1,8], index: 2, kind: input, shape index: {}]   ;;  %s7525_s3 = inlined_call_operand.vmem [shape: bf16[72,8], index: 3, kind: input, shape index: {}]   ;;  %s7526_s4 = inlined_call_operand.vmem [shape: f32[1,8], index: 4, kind: input, shape index: {}]   ;;  %s7527_s5 = inlined_call_operand.vmem [shape: f32[2,8,256], index: 5, kind: output, shape index: {}]  }
   0x1 LB: > { %s4734_s19 = sadd.s32 4294967295, %s5299_s18   ;;  %p4738_p0 = scmp.ge.s32.totalorder %s5299_s18, 1  ;;  %s5299_s18 = sphi %s5344_s18, %s15_s18  }
   0x2   : > { %p187_p1 = scmp.lt.s32.totalorder %s5299_s18, 3 }
   0x4   : > { %p188_p2 = pnand %p4738_p0, %p187_p1 }
   0x5   : > { %vm226_vm0 = vcmask (!%p188_p2), 27648   ;;  %vm229_vm1 = vcmask (!%p188_p2), 24576   ;;  %vm236_vm2 = vsmask.f32 (!%p188_p2), 256  ;;  %v5301_v0 = vmov (!%p188_p2), 0   ;;  %p215_p3 = scmp.lt.s32.totalorder (!%p188_p2), %s4734_s19, 1 }
   0x6   : > { %191 = sbr.rel (%p188_p2) target bundleno = 1495 (0x5d7), region = 40  ;;  %227 = vst.msk [vmem:[#allocation2] sm:$0xf] (!%p188_p2), %vm226_vm0, %v5301_v0  ;;  %228 = vst.msk [vmem:[#allocation2 + $0x4] sm:$0xf] (!%p188_p2), %vm226_vm0, %v5301_v0  ;;  %vm7528_vm4 = vcmask (!%p188_p2), 60416  }
   0x7   : > { %230 = vst.msk [vmem:[#allocation2 + $0x8] sm:$0x1] (!%p188_p2), %vm229_vm1, %v5301_v0  ;;  %vm5360_vm3 = vmand (!%p188_p2), %vm229_vm1, %vm236_vm2  ;;  %vm292_vm5 = vsmask.f32 (!%p188_p2), 7938  ;;  %v241_v2 = vld [vmem:[#allocation2 + $0xc] sm:$0x1] (!%p188_p2) }
   0x8   : > { %232 = vst.msk [vmem:[#allocation2 + $0xcc] sm:$0xf] (!%p188_p2), %vm226_vm0, %v5301_v0  ;;  %233 = vst.msk [vmem:[#allocation2 + $0xd0] sm:$0xf] (!%p188_p2), %vm226_vm0, %v5301_v0  ;;  %v244_v3 = vld [vmem:[#allocation2 + $0x18] sm:$0x1] (!%p188_p2) }
   0x9   : > { %234 = vst.msk [vmem:[#allocation2 + $0xd4] sm:$0x1] (!%p188_p2), %vm229_vm1, %v5301_v0  ;;  %v242_v4 = vsel (!%p188_p2), %vm5360_vm3, 0, %v241_v2  ;;  %v245_v5 = vsel (!%p188_p2), %vm5360_vm3, 0, %v244_v3  ;;  %v247_v6 = vld [vmem:[#allocation2 + $0x24] sm:$0x1] (!%p188_p2)  ;;  %vm5388_vm6 = vmand (!%p188_p2), %vm229_vm1, %vm292_vm5 }
   0xa   : > { %349 = vst.msk [vmem:[#allocation3] sm:$0xf] (!%p188_p2), %vm7528_vm4, %v5301_v0  ;;  %350 = vst.msk [vmem:[#allocation3 + $0x4] sm:$0xf] (!%p188_p2), %vm7528_vm4, %v5301_v0  ;;  %v248_v7 = vsel (!%p188_p2), %vm5360_vm3, 0, %v247_v6  ;;  %vm1345_vm10 = vcmask (!%p188_p2), 1046528  }
   0xb   : > { %354 = vst.msk [vmem:[#allocation3 + $0xcc] sm:$0xf] (!%p188_p2), %vm7528_vm4, %v5301_v0  ;;  %355 = vst.msk [vmem:[#allocation3 + $0xd0] sm:$0xf] (!%p188_p2), %vm7528_vm4, %v5301_v0  ;;  %v297_v9 = vld [vmem:[#allocation2 + $0x14] sm:$0x1] (!%p188_p2) }
   0xc   : > { %243 = vst [vmem:[#allocation2 + $0xc] sm:$0x1] (!%p188_p2), %v242_v4  ;;  %246 = vst [vmem:[#allocation2 + $0x18] sm:$0x1] (!%p188_p2), %v245_v5  ;;  %v300_v10 = vld [vmem:[#allocation2 + $0x20] sm:$0x1] (!%p188_p2) }
   0xd   : > { %s7567_s19 = smov (!%p215_p3, %s4734_s19), 1  ;;  %249 = vst [vmem:[#allocation2 + $0x24] sm:$0x1] %v248_v7  ;;  %vm500_vm7 = vsmask.f32 4368  ;;  %v298_v11 = vsel %vm5388_vm6, 0, %v297_v9  ;;  %vm5413_vm8 = vmand %vm226_vm0, %vm292_vm5 }
   0xe   : > { %s4891_s20 = sshll.u32 %s7567_s19, 7  ;;  %v301_v12 = vsel %vm5388_vm6, 0, %v300_v10  ;;  %299 = vst [vmem:[#allocation2 + $0x14] sm:$0x1] %v298_v11  ;;  %v238_v16 = vld [vmem:[#allocation2] sm:$0x1]  ;;  %vm5420_vm9 = vmor %vm236_vm2, %vm500_vm7 }
   0xf   : > { %s5396_s23 = scalar_lea.vmem %s7522_s0, %s4891_s20  ;;  %302 = vst [vmem:[#allocation2 + $0x20] sm:$0x1] %v301_v12  ;;  %v294_v17 = vld [vmem:[#allocation2 + $0x8] sm:$0x1]  ;;  %v239_v18 = vsel %vm5360_vm3, 0, %v238_v16  ;;  %s5302_s24 = smov 8  }
  0x10   : > { %v468_v13 = vld [vmem:[%s5396_s23] sm:$0xf]  ;;  %v469_v14 = vld [vmem:[%s5396_s23 + $0x4] sm:$0xf]  ;;  %v470_v15 = vld [vmem:[%s5396_s23 + $0x8] sm:$0xf] }
  0x11   : > { %v295_v19 = vsel %vm5388_vm6, 0, %v294_v17  ;;  %v503_v20 = vshrl.u32 %v468_v13, 16  ;;  %v506_v21 = vshll.u32 %v468_v13, 16  ;;  %v471_v22 = vld [vmem:[%s5396_s23 + $0xc] sm:$0xf]  ;;  %v511_v23 = vshrl.u32 %v469_v14, 16 }
  0x12   : > { %240 = vst [vmem:[#allocation2] sm:$0x1] %v239_v18  ;;  %296 = vst [vmem:[#allocation2 + $0x8] sm:$0x1] %v295_v19  ;;  %v514_v24 = vshll.u32 %v469_v14, 16  ;;  %v520_v25 = vshrl.u32 %v470_v15, 16 }
  0x13   : > { %v523_v26 = vshll.u32 %v470_v15, 16  ;;  %v472_v27 = vld [vmem:[%s5396_s23 + $0x10] sm:$0xf]  ;;  %v505_v28 = vrot.slane %v503_v20, 7  ;;  %v528_v29 = vshrl.u32 %v471_v22, 16  ;;  %v531_v30 = vshll.u32 %v471_v22, 16 }
  0x14   : > { %v537_v31 = vshrl.u32 %v472_v27, 16  ;;  %v513_v33 = vrot.slane %v511_v23, 7  ;;  %v825_v34 = vld [vmem:[#allocation2 + $0xc] sm:$0xf]  ;;  %v522_v35 = vrot.slane %v520_v25, 7  ;;  %v540_v46 = vshll.u32 %v472_v27, 16 }
  0x15   : > { %v473_v36 = vld [vmem:[%s5396_s23 + $0x14] sm:$0xf]  ;;  %v508_v38 = vor.u32 %v506_v21, %v505_v28  ;;  %v509_v39 = vrot.slane %v505_v28, 4  ;;  %v530_v40 = vrot.slane %v528_v29, 7  ;;  %v832_v41 = vld [vmem:[#allocation2 + $0x18] sm:$0xf] }
  0x16   : > { %v539_v42 = vrot.slane %v537_v31, 7  ;;  %v516_v43 = vor.u32 %v514_v24, %v513_v33  ;;  %v525_v44 = vor.u32 %v523_v26, %v522_v35  ;;  %v526_v45 = vrot.slane %v522_v35, 4  ;;  %v303_v47 = vld [vmem:[#allocation2 + $0x2c] sm:$0x1]  ;;  %v839_v52 = vld [vmem:[#allocation2 + $0x24] sm:$0xf] }
  0x17   : > { %v826_v48 = vsel %vm5413_vm8, %v508_v38, %v825_v34  ;;  %v533_v49 = vor.u32 %v531_v30, %v530_v40  ;;  %v545_v51 = vshrl.u32 %v473_v36, 16  ;;  %v829_v53 = vld [vmem:[#allocation2 + $0x14] sm:$0x1]  ;;  %v548_v57 = vshll.u32 %v473_v36, 16  ;;  %v836_v58 = vld [vmem:[#allocation2 + $0x20] sm:$0x1] }
  0x18   : > { %v543_v50 = vrot.slane %v539_v42, 4  ;;  %v517_v54 = vsel %vm5420_vm9, %v509_v39, %v516_v43  ;;  %827 = vst [vmem:[#allocation2 + $0xc] sm:$0xf] %v826_v48  ;;  %v833_v55 = vsel %vm5413_vm8, %v525_v44, %v832_v41  ;;  %v542_v56 = vor.u32 %v540_v46, %v539_v42  ;;  %v250_v59 = vld [vmem:[#allocation2 + $0x30] sm:$0x1]  ;;  %s5303_s25 = smov 12  }
  0x19   : > { %v5068_v60 = vld [vmem:[#allocation2] sm:$0xff]   ;;  %828 = vst.msk [vmem:[#allocation2 + $0x10] sm:$0xf] %vm226_vm0, %v517_v54  ;;  %v534_v61 = vsel %vm5420_vm9, %v526_v45, %v533_v49  ;;  %834 = vst [vmem:[#allocation2 + $0x18] sm:$0xf] %v833_v55  ;;  %v547_v62 = vrot.slane %v545_v51, 7 }
  0x1a   : > { %v5069_v63 = vld [vmem:[#allocation2 + $0x8] ss:$0 sps:$4 sm:$0x11]   ;;  %835 = vst.msk [vmem:[#allocation2 + $0x1c] sm:$0xf] %vm226_vm0, %v534_v61  ;;  %v840_v2 = vsel %vm5413_vm8, %v542_v56, %v839_v52  ;;  %v518_v3 = vrot.slane %v513_v33, 4 }
  0x1b   : > { %v535_v4 = vrot.slane %v530_v40, 4  ;;  %v304_v5 = vsel %vm5388_vm6, 0, %v303_v47  ;;  %v1346_v6 = vrot.slane %v5068_v60, 1  ;;  %v550_v7 = vor.u32 %v548_v57, %v547_v62  ;;  %841 = vst [vmem:[#allocation2 + $0x24] sm:$0xf] %v840_v2  ;;  %s5304_s26 = smov 24  }
  0x1c   : > { %v1124_v9 = vshll.u32 %v5068_v60, 16  ;;  %305 = vst [vmem:[#allocation2 + $0x2c] sm:$0x1] %v304_v5  ;;  %v474_v10 = vld [vmem:[%s5396_s23 + $0x18] sm:$0xf]  ;;  %v1347_v11 = vrot.slane %v5069_v63, 1  ;;  %v830_v13 = vsel %vm5360_vm3, %v518_v3, %v829_v53 }
  0x1d   : > { %v1129_v12 = vshll.u32 %v5069_v63, 16  ;;  %v837_v14 = vsel %vm5360_vm3, %v535_v4, %v836_v58  ;;  %v475_v15 = vld [vmem:[%s5396_s23 + $0x1c] sm:$0xf]  ;;  %v306_v16 = vld [vmem:[#allocation2 + $0x38] sm:$0x1]  ;;  %v551_v17 = vsel %vm5420_vm9, %v543_v50, %v550_v7  ;;  %v1122_v18 = vshrl.u32 %v5068_v60, 16 }
  0x1e   : > { %v1126_v19 = vrot.slane %v1124_v9, 1  ;;  %831 = vst [vmem:[#allocation2 + $0x14] sm:$0x1] %v830_v13  ;;  %838 = vst [vmem:[#allocation2 + $0x20] sm:$0x1] %v837_v14  ;;  %v251_v20 = vsel %vm5360_vm3, 0, %v250_v59  ;;  %v1348_v21 = vsel %vm1345_vm10, %v1346_v6, %v1347_v11 }
  0x1f   : > { %842 = vst.msk [vmem:[#allocation2 + $0x28] sm:$0xf] %vm226_vm0, %v551_v17  ;;  %vm1120_vm11 = vsmask.f32 7424  ;;  %v552_v22 = vrot.slane %v547_v62, 4  ;;  %v554_v23 = vshrl.u32 %v474_v10, 16  ;;  %1394 = vrot.lane.b32.xlu1 %v1348_v21, %s5302_s24 }
  0x20   : > { %252 = vst [vmem:[#allocation2 + $0x30] sm:$0x1] %v251_v20  ;;  %v253_v24 = vld [vmem:[#allocation2 + $0x3c] sm:$0x1]  ;;  %v1131_v25 = vrot.slane %v1129_v12, 1  ;;  %v562_v26 = vshrl.u32 %v475_v15, 16  ;;  %v1127_v33 = vor.u32 %v1126_v19, %v1122_v18 }
  0x21   : > { %v565_v27 = vshll.u32 %v475_v15, 16  ;;  %v307_v28 = vsel %vm5388_vm6, 0, %v306_v16  ;;  %v5070_v29 = vld [vmem:[#allocation2 + $0xc] sm:$0xff]   ;;  %v556_v30 = vrot.slane %v554_v23, 7  ;;  %v5453_v31 = vld [vmem:[#allocation2 + $0x18] sm:$0xff]   ;;  %v557_v34 = vshll.u32 %v474_v10, 16 }
  0x22   : > { %308 = vst [vmem:[#allocation2 + $0x38] sm:$0x1] %v307_v28  ;;  %v564_v35 = vrot.slane %v562_v26, 7  ;;  %v254_v36 = vsel %vm5360_vm3, 0, %v253_v24  ;;  %1431 = vrot.lane.b32.xlu0 %v5070_v29, %s5303_s25  ;;  %v1136_v38 = vshll.u32 %v5070_v29, 16  ;;  %v1148_v40 = vshll.u32 %v5453_v31, 16 }
  0x23   : > { %255 = vst [vmem:[#allocation2 + $0x3c] sm:$0x1] %v254_v36  ;;  %v476_v39 = vld [vmem:[%s5396_s23 + $0x20] sm:$0xf]  ;;  %1433 = vrot.lane.b32.xlu1 %v5453_v31, %s5303_s25  ;;  %v843_v41 = vld [vmem:[#allocation2 + $0x2c] sm:$0x1]  ;;  %v1132_v48 = vsel %vm1120_vm11, %v1127_v33, %v1131_v25  ;;  %v559_v49 = vor.u32 %v557_v34, %v556_v30 }
  0x24   : > { %v560_v42 = vrot.slane %v556_v30, 4  ;;  %v1349_v44 = vrot.slane %v5070_v29, 1  ;;  %v844_v45 = vsel %vm5360_vm3, %v552_v22, %v843_v41  ;;  %v567_v46 = vor.u32 %v565_v27, %v564_v35  ;;  %v477_v56 = vld [vmem:[%s5396_s23 + $0x24] sm:$0xf]  ;;  %s5305_s29 = smov 4   ;;  %s5306_s30 = smov 20  }
  0x25   : > { %v5462_v43 = vld [vmem:[#allocation2 + $0x14] ss:$0 sps:$4 sm:$0x11]   ;;  %845 = vst [vmem:[#allocation2 + $0x2c] sm:$0x1] %v844_v45  ;;  %v571_v50 = vshrl.u32 %v476_v39, 16 }
  0x26   : > { %v5466_v47 = vld [vmem:[#allocation2 + $0x24] sm:$0xff]   ;;  %1550 = vrot.lane.b32.xlu0 %v5453_v31, %s5304_s26  ;;  %v1350_v51 = vrot.slane %v5462_v43, 1  ;;  %v5074_v52 = vld [vmem:[#allocation2 + $0x20] ss:$0 sps:$4 sm:$0x11]   ;;  %v1134_v53 = vshrl.u32 %v5070_v29, 16  ;;  %v568_v55 = vsel %vm5420_vm9, %v560_v42, %v567_v46 }
  0x27   : > { %v1138_v54 = vrot.slane %v1136_v38, 1  ;;  %1552 = vrot.lane.b32.xlu1 %v5466_v47, %s5304_s26  ;;  %v1352_v57 = vrot.slane %v5453_v31, 1  ;;  %v1146_v58 = vshrl.u32 %v5453_v31, 16  ;;  %v1150_v59 = vrot.slane %v1148_v40, 1  ;;  %v846_v61 = vld [vmem:[#allocation2 + $0x30] sm:$0xf] }
  0x28   : > { %v1160_v60 = vshll.u32 %v5466_v47, 16  ;;  %849 = vst.msk [vmem:[#allocation2 + $0x34] sm:$0xf] %vm226_vm0, %v568_v55  ;;  %v1351_v62 = vsel %vm1345_vm10, %v1349_v44, %v1350_v51  ;;  %v1353_v63 = vrot.slane %v5074_v52, 1  ;;  %v1153_v2 = vshll.u32 %v5074_v52, 16  ;;  %v5089_v6 = vld [vmem:[%s7523_s1] sm:$0xff]  }
  0x29   : > { %v1141_v3 = vshll.u32 %v5462_v43, 16  ;;  %v850_v4 = vld [vmem:[#allocation2 + $0x38] sm:$0x1]  ;;  %v309_v5 = vld [vmem:[#allocation2 + $0x44] sm:$0x1]  ;;  %v1158_v7 = vshrl.u32 %v5466_v47, 16  ;;  %v847_v9 = vsel %vm5413_vm8, %v559_v49, %v846_v61  ;;  %v1139_v13 = vor.u32 %v1138_v54, %v1134_v53  ;;  %4965 = vmatprep.subr.bf16.mxu0 %v5089_v6 }
  0x2a   : > { %v569_v10 = vrot.slane %v564_v35, 4  ;;  %v573_v11 = vrot.slane %v571_v50, 7  ;;  %v853_v12 = vld [vmem:[#allocation2 + $0x3c] sm:$0xf]  ;;  %1313 = vrot.lane.b32.xlu0 %v1132_v48, %s5305_s29  ;;  %v1162_v14 = vrot.slane %v1160_v60, 1  ;;  %v574_v15 = vshll.u32 %v476_v39, 16  ;;  %4966 = vmatpush3.bf16.msra.mxu0 %v5089_v6 }
  0x2b   : > { %848 = vst [vmem:[#allocation2 + $0x30] sm:$0xf] %v847_v9  ;;  %v256_v16 = vld [vmem:[#allocation2 + $0x48] sm:$0x1]  ;;  %1396 = vrot.lane.b32.xlu1 %v1351_v62, %s5302_s24  ;;  %v1155_v18 = vrot.slane %v1153_v2, 1  ;;  %v579_v21 = vshrl.u32 %v477_v56, 16  ;;  %v5496_v23 = vsel %vm1345_vm10, %v1352_v57, %v1353_v63  ;;  %v1151_v24 = vor.u32 %v1150_v59, %v1146_v58 }
  0x2c   : > { %v478_v17 = vld [vmem:[%s5396_s23 + $0x28] sm:$0xf]  ;;  %v851_v19 = vsel %vm5360_vm3, %v569_v10, %v850_v4  ;;  %v577_v20 = vrot.slane %v573_v11, 4  ;;  %v479_v22 = vld [vmem:[%s5396_s23 + $0x2c] sm:$0xf]  ;;  %v576_v26 = vor.u32 %v574_v15, %v573_v11  ;;  %v582_v27 = vshll.u32 %v477_v56, 16 }
  0x2d   : > { %v5498_v25 = vld [vmem:[#allocation2 + $0x2c] ss:$0 sps:$4 sm:$0x11]   ;;  %852 = vst [vmem:[#allocation2 + $0x38] sm:$0x1] %v851_v19  ;;  %v581_v28 = vrot.slane %v579_v21, 7  ;;  %v1163_v40 = vor.u32 %v1162_v14, %v1158_v7  ;;  %v5515_v46 = vsel %vm1120_vm11, %v1151_v24, %v1155_v18 }
  0x2e   : > { %v310_v29 = vsel %vm5388_vm6, 0, %v309_v5  ;;  %v257_v30 = vsel %vm5360_vm3, 0, %v256_v16  ;;  %v588_v31 = vshrl.u32 %v478_v17, 16  ;;  %v312_v33 = vld [vmem:[#allocation2 + $0x50] sm:$0x1]  ;;  %1513 = vrot.lane.b32.xlu0 %v1351_v62, %s5306_s30  ;;  %v1143_v34 = vrot.slane %v1141_v3, 1 }
  0x2f   : > { %v1165_v35 = vshll.u32 %v5498_v25, 16  ;;  %v854_v36 = vsel %vm5413_vm8, %v576_v26, %v853_v12  ;;  %311 = vst [vmem:[#allocation2 + $0x44] sm:$0x1] %v310_v29  ;;  %258 = vst [vmem:[#allocation2 + $0x48] sm:$0x1] %v257_v30  ;;  %v591_v38 = vshll.u32 %v478_v17, 16  ;;  %1515 = vrot.lane.b32.xlu1 %v5496_v23, %s5306_s30  ;;  %v584_v41 = vor.u32 %v582_v27, %v581_v28 }
  0x30   : > { %v5091_v39 = vld [vmem:[%s7523_s1 + $0x8] sm:$0xff]   ;;  %855 = vst [vmem:[#allocation2 + $0x3c] sm:$0xf] %v854_v36  ;;  %v590_v42 = vrot.slane %v588_v31, 7  ;;  %v596_v43 = vshrl.u32 %v479_v22, 16  ;;  %v599_v49 = vshll.u32 %v479_v22, 16  ;;  %v1144_v58 = vsel %vm1120_vm11, %v1139_v13, %v1143_v34 }
  0x31   : > { %v259_v44 = vld [vmem:[#allocation2 + $0x54] sm:$0x1]  ;;  %v480_v45 = vld [vmem:[%s5396_s23 + $0x30] sm:$0xf]  ;;  %v1167_v48 = vrot.slane %v1165_v35, 1  ;;  %v313_v50 = vsel %vm5388_vm6, 0, %v312_v33  ;;  %4967 = vmatprep.subr.bf16.mxu0 %v5091_v39  ;;  %v585_v51 = vsel %vm5420_vm9, %v577_v20, %v584_v41 }
  0x32   : > { %v594_v52 = vrot.slane %v590_v42, 4  ;;  %v598_v53 = vrot.slane %v596_v43, 7  ;;  %314 = vst [vmem:[#allocation2 + $0x50] sm:$0x1] %v313_v50  ;;  %4968 = vmatpush3.bf16.msra.mxu0 %v5091_v39  ;;  %s5307_s8 = smov 32   ;;  %v586_v54 = vrot.slane %v581_v28, 4  ;;  %v593_v55 = vor.u32 %v591_v38, %v590_v42 }
  0x33   : > { %1632 = vrot.lane.b32.xlu0 %v5496_v23, %s5307_s8  ;;  %856 = vst.msk [vmem:[#allocation2 + $0x40] sm:$0xf] %vm226_vm0, %v585_v51  ;;  %v260_v56 = vsel %vm5360_vm3, 0, %v259_v44  ;;  %v605_v57 = vshrl.u32 %v480_v45, 16  ;;  %s5308_s9 = smov 16   ;;  %v5531_v61 = vsel %vm1120_vm11, %v1163_v40, %v1167_v48  ;;  %v608_v2 = vshll.u32 %v480_v45, 16 }
  0x34   : > { %1480 = vrot.lane.b32.xlu1 %v5515_v46, %s5308_s9  ;;  %v601_v59 = vor.u32 %v599_v49, %v598_v53  ;;  %261 = vst [vmem:[#allocation2 + $0x54] sm:$0x1] %v260_v56  ;;  %v481_v60 = vld [vmem:[%s5396_s23 + $0x34] sm:$0xf]  ;;  %v603_v62 = vrot.slane %v598_v53, 4  ;;  %s5309_s10 = smov 28  }
  0x35   : > { %v607_v63 = vrot.slane %v605_v57, 7  ;;  %v315_v3 = vld [vmem:[#allocation2 + $0x5c] sm:$0x1]  ;;  %v262_v7 = vld [vmem:[#allocation2 + $0x60] sm:$0x1]  ;;  %v1355_v12 = vrot.slane %v5466_v47, 1 }
  0x36   : > { %v857_v4 = vld [vmem:[#allocation2 + $0x44] sm:$0x1]  ;;  %v602_v5 = vsel %vm5420_vm9, %v594_v52, %v601_v59  ;;  %v860_v6 = vld [vmem:[#allocation2 + $0x48] sm:$0xf]  ;;  %v482_v11 = vld [vmem:[%s5396_s23 + $0x38] sm:$0xf] }
  0x37   : > { %1315 = vrot.lane.b32.xlu0 %v1144_v58, %s5305_s29  ;;  %v858_v9 = vsel %vm5360_vm3, %v586_v54, %v857_v4  ;;  %v861_v10 = vsel %vm5413_vm8, %v593_v55, %v860_v6  ;;  %863 = vst.msk [vmem:[#allocation2 + $0x4c] sm:$0xf] %vm226_vm0, %v602_v5  ;;  %v5545_v13 = vld [vmem:[#allocation2 + $0x30] sm:$0xff]   ;;  %v613_v14 = vshrl.u32 %v481_v60, 16  ;;  %v483_v15 = vld [vmem:[%s5396_s23 + $0x3c] sm:$0xf]  ;;  %v610_v18 = vor.u32 %v608_v2, %v607_v63 }
  0x38   : > { %1599 = vrot.lane.b32.xlu1 %v5531_v61, %s5309_s10  ;;  %859 = vst [vmem:[#allocation2 + $0x44] sm:$0x1] %v858_v9  ;;  %862 = vst [vmem:[#allocation2 + $0x48] sm:$0xf] %v861_v10  ;;  %v616_v19 = vshll.u32 %v481_v60, 16  ;;  %v316_v20 = vsel %vm5388_vm6, 0, %v315_v3 }
  0x39   : > { %v5548_v16 = vld [vmem:[#allocation2 + $0x38] ss:$0 sps:$4 sm:$0x11]   ;;  %v864_v17 = vld [vmem:[#allocation2 + $0x50] sm:$0x1]  ;;  %v263_v21 = vsel %vm5360_vm3, 0, %v262_v7 }
  0x3a   : > { %v865_v22 = vsel %vm5360_vm3, %v603_v62, %v864_v17  ;;  %v611_v24 = vrot.slane %v607_v63, 4  ;;  %v615_v26 = vrot.slane %v613_v14, 7  ;;  %317 = vst [vmem:[#allocation2 + $0x5c] sm:$0x1] %v316_v20  ;;  %264 = vst [vmem:[#allocation2 + $0x60] sm:$0x1] %v263_v21 }
  0x3b   : > { %v622_v27 = vshrl.u32 %v482_v11, 16  ;;  %1478 = vrot.lane.b32.xlu0 %v1144_v58, %s5308_s9  ;;  %866 = vst [vmem:[#allocation2 + $0x50] sm:$0x1] %v865_v22  ;;  %v867_v28 = vld [vmem:[#allocation2 + $0x54] sm:$0xf]  ;;  %v630_v29 = vshrl.u32 %v483_v15, 16 }
  0x3c   : > { %v633_v30 = vshll.u32 %v483_v15, 16  ;;  %v318_v31 = vld [vmem:[#allocation2 + $0x68] sm:$0x1]  ;;  %1317 = vrot.lane.b32.xlu1 %v5515_v46, %s5305_s29  ;;  %v1356_v33 = vrot.slane %v5498_v25, 1  ;;  %v1172_v34 = vshll.u32 %v5545_v13, 16  ;;  %v618_v35 = vor.u32 %v616_v19, %v615_v26  ;;  %v5590_v2 = vld [vmem:[#allocation2 + $0x3c] sm:$0xff]  }
  0x3d   : > { %v625_v36 = vshll.u32 %v482_v11, 16  ;;  %v265_v38 = vld [vmem:[#allocation2 + $0x6c] sm:$0x1]  ;;  %v868_v39 = vsel %vm5413_vm8, %v610_v18, %v867_v28  ;;  %v624_v40 = vrot.slane %v622_v27, 7  ;;  %v632_v41 = vrot.slane %v630_v29, 7  ;;  %s5310_s13 = smov 48  }
  0x3e   : > { %v619_v42 = vsel %vm5420_vm9, %v611_v24, %v618_v35  ;;  %869 = vst [vmem:[#allocation2 + $0x54] sm:$0xf] %v868_v39  ;;  %v620_v43 = vrot.slane %v615_v26, 4  ;;  %v319_v44 = vsel %vm5388_vm6, 0, %v318_v31  ;;  %v266_v25 = vsel %vm5360_vm3, 0, %v265_v38  ;;  %s5311_s16 = smov 40  }
  0x3f   : > { %1597 = vrot.lane.b32.xlu0 %v5515_v46, %s5309_s10  ;;  %v1170_v45 = vshrl.u32 %v5545_v13, 16  ;;  %v1177_v48 = vshll.u32 %v5548_v16, 16  ;;  %870 = vst.msk [vmem:[#allocation2 + $0x58] sm:$0xf] %vm226_vm0, %v619_v42  ;;  %v635_v49 = vor.u32 %v633_v30, %v632_v41  ;;  %320 = vst [vmem:[#allocation2 + $0x68] sm:$0x1] %v319_v44  ;;  %v5577_v50 = vsel %vm1345_vm10, %v1355_v12, %v1356_v33 }
  0x40   : > { %267 = vst [vmem:[#allocation2 + $0x6c] sm:$0x1] %v266_v25  ;;  %1319 = vrot.lane.b32.xlu1 %v5531_v61, %s5305_s29  ;;  %v1174_v51 = vrot.slane %v1172_v34, 1  ;;  %v627_v52 = vor.u32 %v625_v36, %v624_v40  ;;  %v628_v53 = vrot.slane %v624_v40, 4  ;;  %v484_v46 = vld [vmem:[%s5396_s23 + $0x40] sm:$0xf] }
  0x41   : > { %v871_v54 = vld [vmem:[#allocation2 + $0x5c] sm:$0x1]  ;;  %v485_v57 = vld [vmem:[%s5396_s23 + $0x44] sm:$0xf]  ;;  %v874_v58 = vld [vmem:[#allocation2 + $0x60] sm:$0xf] }
  0x42   : > { %v872_v55 = vsel %vm5360_vm3, %v620_v43, %v871_v54  ;;  %v636_v56 = vsel %vm5420_vm9, %v628_v53, %v635_v49  ;;  %v637_v59 = vrot.slane %v632_v41, 4  ;;  %v639_v60 = vshrl.u32 %v484_v46, 16  ;;  %v321_v10 = vld [vmem:[#allocation2 + $0x74] sm:$0x1]  ;;  %v486_v26 = vld [vmem:[%s5396_s23 + $0x48] sm:$0xf] }
  0x43   : > { %1634 = vrot.lane.b32.xlu0 %v5577_v50, %s5307_s8  ;;  %873 = vst [vmem:[#allocation2 + $0x5c] sm:$0x1] %v872_v55  ;;  %877 = vst.msk [vmem:[#allocation2 + $0x64] sm:$0xf] %vm226_vm0, %v636_v56  ;;  %v1175_v62 = vor.u32 %v1174_v51, %v1170_v45  ;;  %v1179_v63 = vrot.slane %v1177_v48, 1  ;;  %v875_v3 = vsel %vm5413_vm8, %v627_v52, %v874_v58  ;;  %v642_v4 = vshll.u32 %v484_v46, 16 }
  0x44   : > { %1400 = vrot.lane.b32.xlu1 %v5577_v50, %s5302_s24  ;;  %v1358_v5 = vrot.slane %v5545_v13, 1  ;;  %876 = vst [vmem:[#allocation2 + $0x60] sm:$0xf] %v875_v3  ;;  %v641_v6 = vrot.slane %v639_v60, 7  ;;  %v647_v7 = vshrl.u32 %v485_v57, 16  ;;  %v1359_v11 = vrot.slane %v5548_v16, 1 }
  0x45   : > { %v5603_v18 = vsel %vm1120_vm11, %v1175_v62, %v1179_v63  ;;  %v5605_v19 = vld [vmem:[#allocation2 + $0x44] ss:$0 sps:$4 sm:$0x11]   ;;  %v268_v16 = vld [vmem:[#allocation2 + $0x78] sm:$0x1]  ;;  %v650_v21 = vshll.u32 %v485_v57, 16 }
  0x46   : > { %v878_v9 = vld [vmem:[#allocation2 + $0x68] sm:$0x1]  ;;  %v644_v14 = vor.u32 %v642_v4, %v641_v6  ;;  %v649_v15 = vrot.slane %v647_v7, 7  ;;  %v645_v20 = vrot.slane %v641_v6, 4  ;;  %v322_v24 = vsel %vm5388_vm6, 0, %v321_v10  ;;  %s5312_s17 = smov 64  }
  0x47   : > { %1398 = vrot.lane.b32.xlu0 %v5496_v23, %s5302_s24  ;;  %v879_v12 = vsel %vm5360_vm3, %v637_v59, %v878_v9  ;;  %v881_v17 = vld [vmem:[#allocation2 + $0x6c] sm:$0xf]  ;;  %v1184_v23 = vshll.u32 %v5590_v2, 16  ;;  %323 = vst [vmem:[#allocation2 + $0x74] sm:$0x1] %v322_v24  ;;  %v5619_v29 = vsel %vm1345_vm10, %v1358_v5, %v1359_v11  ;;  %v1182_v30 = vshrl.u32 %v5590_v2, 16 }
  0x48   : > { %1437 = vrot.lane.b32.xlu1 %v5545_v13, %s5303_s25  ;;  %880 = vst [vmem:[#allocation2 + $0x68] sm:$0x1] %v879_v12  ;;  %v882_v22 = vsel %vm5413_vm8, %v644_v14, %v881_v17  ;;  %v487_v27 = vld [vmem:[%s5396_s23 + $0x4c] sm:$0xf]  ;;  %v652_v28 = vor.u32 %v650_v21, %v649_v15  ;;  %v269_v33 = vsel %vm5360_vm3, 0, %v268_v16  ;;  %v1189_v34 = vshll.u32 %v5605_v19, 16 }
  0x49   : > { %883 = vst [vmem:[#allocation2 + $0x6c] sm:$0xf] %v882_v22  ;;  %v1186_v31 = vrot.slane %v1184_v23, 1  ;;  %270 = vst [vmem:[#allocation2 + $0x78] sm:$0x1] %v269_v33  ;;  %v664_v36 = vshrl.u32 %v487_v27, 16 }
  0x4a   : > { %v653_v35 = vsel %vm5420_vm9, %v645_v20, %v652_v28  ;;  %v654_v38 = vrot.slane %v649_v15, 4  ;;  %v659_v39 = vshll.u32 %v486_v26, 16  ;;  %v324_v41 = vld [vmem:[#allocation2 + $0x80] sm:$0x1]  ;;  %v1191_v43 = vrot.slane %v1189_v34, 1  ;;  %v5659_v5 = vld [vmem:[#allocation2 + $0x48] sm:$0xff]  }
  0x4b   : > { %1435 = vrot.lane.b32.xlu0 %v5466_v47, %s5303_s25  ;;  %v656_v47 = vshrl.u32 %v486_v26, 16  ;;  %884 = vst.msk [vmem:[#allocation2 + $0x70] sm:$0xf] %vm226_vm0, %v653_v35  ;;  %v1187_v42 = vor.u32 %v1186_v31, %v1182_v30  ;;  %v666_v25 = vrot.slane %v664_v36, 7  ;;  %v325_v53 = vsel %vm5388_vm6, 0, %v324_v41  ;;  %s5313_s20 = smov 56  }
  0x4c   : > { %1484 = vrot.lane.b32.xlu1 %v5603_v18, %s5308_s9  ;;  %v5092_v51 = vld [vmem:[%s7523_s1 + $0x10] ss:$0 sps:$4 sm:$0x33]   ;;  %326 = vst [vmem:[#allocation2 + $0x80] sm:$0x1] %v325_v53  ;;  %vm1987_vm12 = vcmask 1041408  }
  0x4d   : > { %v658_v40 = vrot.slane %v656_v47, 7  ;;  %v5644_v46 = vsel %vm1120_vm11, %v1187_v42, %v1191_v43  ;;  %v271_v55 = vld [vmem:[#allocation2 + $0x84] sm:$0x1]  ;;  %v488_v57 = vld [vmem:[%s5396_s23 + $0x50] sm:$0xf]  ;;  %5045 = vmatprep.subr.msk.bf16.mxu0 %vm1987_vm12, %v5092_v51  ;;  %v1989_v60 = vsel %vm1987_vm12, %v5092_v51, 0 }
  0x4e   : > { %v885_v44 = vld [vmem:[#allocation2 + $0x74] sm:$0x1]  ;;  %v272_v56 = vsel %vm5360_vm3, 0, %v271_v55  ;;  %v673_v62 = vshrl.u32 %v488_v57, 16  ;;  %v676_v63 = vshll.u32 %v488_v57, 16  ;;  %4970 = vmatpush3.bf16.msra.mxu0 %v1989_v60  ;;  %v1361_v10 = vrot.slane %v5590_v2, 1 }
  0x4f   : > { %1482 = vrot.lane.b32.xlu0 %v5531_v61, %s5308_s9  ;;  %v886_v45 = vsel %vm5360_vm3, %v654_v38, %v885_v44  ;;  %v661_v48 = vor.u32 %v659_v39, %v658_v40  ;;  %v662_v49 = vrot.slane %v658_v40, 4  ;;  %v667_v61 = vshll.u32 %v487_v27, 16  ;;  %273 = vst [vmem:[#allocation2 + $0x84] sm:$0x1] %v272_v56  ;;  %v489_v59 = vld [vmem:[%s5396_s23 + $0x54] sm:$0xf] }
  0x50   : > { %1519 = vrot.lane.b32.xlu1 %v5619_v29, %s5306_s30  ;;  %887 = vst [vmem:[#allocation2 + $0x74] sm:$0x1] %v886_v45  ;;  %v888_v52 = vld [vmem:[#allocation2 + $0x78] sm:$0xf]  ;;  %v681_v3 = vshrl.u32 %v489_v59, 16  ;;  %v684_v6 = vshll.u32 %v489_v59, 16 }
  0x51   : > { %v889_v54 = vsel %vm5413_vm8, %v661_v48, %v888_v52  ;;  %v327_v4 = vld [vmem:[#allocation2 + $0x8c] sm:$0x1]  ;;  %v274_v9 = vld [vmem:[#allocation2 + $0x90] sm:$0x1]  ;;  %v1362_v11 = vrot.slane %v5605_v19, 1  ;;  %v675_v12 = vrot.slane %v673_v62, 7 }
  0x52   : > { %890 = vst [vmem:[#allocation2 + $0x78] sm:$0xf] %v889_v54  ;;  %v328_v7 = vsel %vm5388_vm6, 0, %v327_v4  ;;  %v683_v14 = vrot.slane %v681_v3, 7  ;;  %v275_v15 = vsel %vm5360_vm3, 0, %v274_v9  ;;  %v1196_v19 = vshll.u32 %v5659_v5, 16 }
  0x53   : > { %1517 = vrot.lane.b32.xlu0 %v5577_v50, %s5306_s30  ;;  %v669_v50 = vor.u32 %v667_v61, %v666_v25  ;;  %329 = vst [vmem:[#allocation2 + $0x8c] sm:$0x1] %v328_v7  ;;  %v490_v17 = vld [vmem:[%s5396_s23 + $0x58] sm:$0xf]  ;;  %v491_v23 = vld [vmem:[%s5396_s23 + $0x5c] sm:$0xf]  ;;  %v678_v21 = vor.u32 %v676_v63, %v675_v12  ;;  %v5687_v38 = vsel %vm1345_vm10, %v1361_v10, %v1362_v11 }
  0x54   : > { %1556 = vrot.lane.b32.xlu1 %v5590_v2, %s5304_s26  ;;  %v5673_v16 = vld [vmem:[#allocation2 + $0x50] ss:$0 sps:$4 sm:$0x11]   ;;  %v892_v20 = vld [vmem:[#allocation2 + $0x80] sm:$0x1]  ;;  %v679_v22 = vrot.slane %v675_v12, 4  ;;  %v686_v26 = vor.u32 %v684_v6, %v683_v14 }
  0x55   : > { %v670_v58 = vsel %vm5420_vm9, %v662_v49, %v669_v50  ;;  %276 = vst [vmem:[#allocation2 + $0x90] sm:$0x1] %v275_v15  ;;  %v690_v27 = vshrl.u32 %v490_v17, 16  ;;  %v330_v28 = vld [vmem:[#allocation2 + $0x98] sm:$0x1]  ;;  %v688_v31 = vrot.slane %v683_v14, 4 }
  0x56   : > { %891 = vst.msk [vmem:[#allocation2 + $0x7c] sm:$0xf] %vm226_vm0, %v670_v58  ;;  %v895_v30 = vld [vmem:[#allocation2 + $0x84] sm:$0xf]  ;;  %v693_v33 = vshll.u32 %v490_v17, 16  ;;  %v687_v34 = vsel %vm5420_vm9, %v679_v22, %v686_v26  ;;  %v701_v36 = vshll.u32 %v491_v23, 16 }
  0x57   : > { %1554 = vrot.lane.b32.xlu0 %v5545_v13, %s5304_s26  ;;  %v671_v13 = vrot.slane %v666_v25, 4  ;;  %v896_v35 = vsel %vm5413_vm8, %v678_v21, %v895_v30  ;;  %v692_v47 = vrot.slane %v690_v27, 7  ;;  %898 = vst.msk [vmem:[#allocation2 + $0x88] sm:$0xf] %vm226_vm0, %v687_v34  ;;  %v331_v40 = vsel %vm5388_vm6, 0, %v330_v28  ;;  %v5812_v32 = vld [vmem:[#allocation2 + $0x6c] sm:$0xff]  }
  0x58   : > { %1603 = vrot.lane.b32.xlu1 %v5644_v46, %s5309_s10  ;;  %897 = vst [vmem:[#allocation2 + $0x84] sm:$0xf] %v896_v35  ;;  %v277_v41 = vld [vmem:[#allocation2 + $0x9c] sm:$0x1]  ;;  %v492_v42 = vld [vmem:[%s5396_s23 + $0x60] sm:$0xf] }
  0x59   : > { %v893_v24 = vsel %vm5360_vm3, %v671_v13, %v892_v20  ;;  %v1194_v43 = vshrl.u32 %v5659_v5, 16  ;;  %v1198_v44 = vrot.slane %v1196_v19, 1  ;;  %v1201_v25 = vshll.u32 %v5673_v16, 16  ;;  %332 = vst [vmem:[#allocation2 + $0x98] sm:$0x1] %v331_v40  ;;  %v5709_v13 = vld [vmem:[#allocation2 + $0x54] sm:$0xff]  }
  0x5a   : > { %894 = vst [vmem:[#allocation2 + $0x80] sm:$0x1] %v893_v24  ;;  %v899_v45 = vld [vmem:[#allocation2 + $0x8c] sm:$0x1]  ;;  %v695_v48 = vor.u32 %v693_v33, %v692_v47  ;;  %v696_v61 = vrot.slane %v692_v47, 4  ;;  %v278_v54 = vsel %vm5360_vm3, 0, %v277_v41 }
  0x5b   : > { %1601 = vrot.lane.b32.xlu0 %v5603_v18, %s5309_s10  ;;  %v900_v49 = vsel %vm5360_vm3, %v688_v31, %v899_v45  ;;  %v493_v52 = vld [vmem:[%s5396_s23 + $0x64] sm:$0xf]  ;;  %v707_v55 = vshrl.u32 %v492_v42, 16  ;;  %v710_v56 = vshll.u32 %v492_v42, 16  ;;  %279 = vst [vmem:[#allocation2 + $0x9c] sm:$0x1] %v278_v54  ;;  %v1199_v3 = vor.u32 %v1198_v44, %v1194_v43 }
  0x5c   : > { %1321 = vrot.lane.b32.xlu1 %v5603_v18, %s5305_s29  ;;  %v698_v18 = vshrl.u32 %v491_v23, 16  ;;  %v333_v53 = vld [vmem:[#allocation2 + $0xa4] sm:$0x1]  ;;  %901 = vst [vmem:[#allocation2 + $0x8c] sm:$0x1] %v900_v49  ;;  %v715_v59 = vshrl.u32 %v493_v52, 16 }
  0x5d   : > { %v902_v50 = vld [vmem:[#allocation2 + $0x90] sm:$0xf]  ;;  %v718_v60 = vshll.u32 %v493_v52, 16  ;;  %v280_v62 = vld [vmem:[#allocation2 + $0xa8] sm:$0x1]  ;;  %v1203_v4 = vrot.slane %v1201_v25, 1 }
  0x5e   : > { %v700_v39 = vrot.slane %v698_v18, 7  ;;  %v903_v58 = vsel %vm5413_vm8, %v695_v48, %v902_v50  ;;  %v494_v63 = vld [vmem:[%s5396_s23 + $0x68] sm:$0xf]  ;;  %v709_v7 = vrot.slane %v707_v55, 7  ;;  %v717_v9 = vrot.slane %v715_v59, 7 }
  0x5f   : > { %1636 = vrot.lane.b32.xlu0 %v5619_v29, %s5307_s8  ;;  %904 = vst [vmem:[#allocation2 + $0x90] sm:$0xf] %v903_v58  ;;  %v334_v10 = vsel %vm5388_vm6, 0, %v333_v53  ;;  %v281_v11 = vsel %vm5360_vm3, 0, %v280_v62  ;;  %v724_v12 = vshrl.u32 %v494_v63, 16  ;;  %v1364_v14 = vrot.slane %v5659_v5, 1 }
  0x60   : > { %1323 = vrot.lane.b32.xlu1 %v5644_v46, %s5305_s29  ;;  %v703_v51 = vor.u32 %v701_v36, %v700_v39  ;;  %v705_v6 = vrot.slane %v700_v39, 4  ;;  %v1365_v15 = vrot.slane %v5673_v16, 1  ;;  %335 = vst [vmem:[#allocation2 + $0xa4] sm:$0x1] %v334_v10  ;;  %282 = vst [vmem:[#allocation2 + $0xa8] sm:$0x1] %v281_v11  ;;  %v712_v23 = vor.u32 %v710_v56, %v709_v7 }
  0x61   : > { %v906_v17 = vld [vmem:[#allocation2 + $0x98] sm:$0x1]  ;;  %v713_v20 = vrot.slane %v709_v7, 4  ;;  %v720_v21 = vor.u32 %v718_v60, %v717_v9  ;;  %v726_v22 = vrot.slane %v724_v12, 7  ;;  %v5723_v19 = vsel %vm1120_vm11, %v1199_v3, %v1203_v4  ;;  %v495_v28 = vld [vmem:[%s5396_s23 + $0x6c] sm:$0xf] }
  0x62   : > { %v704_v57 = vsel %vm5420_vm9, %v696_v61, %v703_v51  ;;  %v5725_v24 = vld [vmem:[#allocation2 + $0x5c] ss:$0 sps:$4 sm:$0x11]   ;;  %v907_v16 = vsel %vm5360_vm3, %v705_v6, %v906_v17  ;;  %v727_v26 = vshll.u32 %v494_v63, 16  ;;  %v336_v31 = vld [vmem:[#allocation2 + $0xb0] sm:$0x1]  ;;  %v5739_v33 = vsel %vm1345_vm10, %v1364_v14, %v1365_v15 }
  0x63   : > { %1638 = vrot.lane.b32.xlu0 %v5687_v38, %s5307_s8  ;;  %905 = vst.msk [vmem:[#allocation2 + $0x94] sm:$0xf] %vm226_vm0, %v704_v57  ;;  %908 = vst [vmem:[#allocation2 + $0x98] sm:$0x1] %v907_v16  ;;  %v721_v27 = vsel %vm5420_vm9, %v713_v20, %v720_v21  ;;  %v909_v30 = vld [vmem:[#allocation2 + $0x9c] sm:$0xf] }
  0x64   : > { %1404 = vrot.lane.b32.xlu1 %v5687_v38, %s5302_s24  ;;  %912 = vst.msk [vmem:[#allocation2 + $0xa0] sm:$0xf] %vm226_vm0, %v721_v27  ;;  %v910_v18 = vsel %vm5413_vm8, %v712_v23, %v909_v30  ;;  %v722_v34 = vrot.slane %v717_v9, 4  ;;  %v729_v35 = vor.u32 %v727_v26, %v726_v22  ;;  %v1206_v47 = vshrl.u32 %v5709_v13, 16  ;;  %v283_v40 = vld [vmem:[#allocation2 + $0xb4] sm:$0x1] }
  0x65   : > { %911 = vst [vmem:[#allocation2 + $0x9c] sm:$0xf] %v910_v18  ;;  %v732_v39 = vshrl.u32 %v495_v28, 16  ;;  %v735_v42 = vshll.u32 %v495_v28, 16  ;;  %v337_v44 = vsel %vm5388_vm6, 0, %v336_v31  ;;  %v730_v25 = vrot.slane %v726_v22, 4 }
  0x66   : > { %338 = vst [vmem:[#allocation2 + $0xb0] sm:$0x1] %v337_v44  ;;  %v496_v45 = vld [vmem:[%s5396_s23 + $0x70] sm:$0xf]  ;;  %v284_v51 = vsel %vm5360_vm3, 0, %v283_v40  ;;  %v5773_v7 = vld [vmem:[#allocation2 + $0x60] sm:$0xff]  }
  0x67   : > { %1402 = vrot.lane.b32.xlu0 %v5619_v29, %s5302_s24  ;;  %v1208_v29 = vshll.u32 %v5709_v13, 16  ;;  %v913_v41 = vld [vmem:[#allocation2 + $0xa4] sm:$0x1]  ;;  %v916_v43 = vld [vmem:[#allocation2 + $0xa8] sm:$0xf]  ;;  %v734_v49 = vrot.slane %v732_v39, 7 }
  0x68   : > { %1441 = vrot.lane.b32.xlu1 %v5659_v5, %s5303_s25  ;;  %v914_v48 = vsel %vm5360_vm3, %v722_v34, %v913_v41  ;;  %v917_v61 = vsel %vm5413_vm8, %v729_v35, %v916_v43  ;;  %v497_v52 = vld [vmem:[%s5396_s23 + $0x74] sm:$0xf]  ;;  %285 = vst [vmem:[#allocation2 + $0xb4] sm:$0x1] %v284_v51  ;;  %v741_v55 = vshrl.u32 %v496_v45, 16  ;;  %v744_v56 = vshll.u32 %v496_v45, 16 }
  0x69   : > { %v1210_v36 = vrot.slane %v1208_v29, 1  ;;  %915 = vst [vmem:[#allocation2 + $0xa4] sm:$0x1] %v914_v48  ;;  %918 = vst [vmem:[#allocation2 + $0xa8] sm:$0xf] %v917_v61  ;;  %v737_v54 = vor.u32 %v735_v42, %v734_v49  ;;  %v739_v57 = vrot.slane %v734_v49, 4 }
  0x6a   : > { %v749_v58 = vshrl.u32 %v497_v52, 16  ;;  %v286_v59 = vld [vmem:[#allocation2 + $0xc0] sm:$0x1]  ;;  %v743_v62 = vrot.slane %v741_v55, 7  ;;  %v752_v63 = vshll.u32 %v497_v52, 16  ;;  %v1367_v17 = vrot.slane %v5709_v13, 1 }
  0x6b   : > { %1439 = vrot.lane.b32.xlu0 %v5590_v2, %s5303_s25  ;;  %v1213_v2 = vshll.u32 %v5725_v24, 16  ;;  %v1211_v53 = vor.u32 %v1210_v36, %v1206_v47  ;;  %v738_v60 = vsel %vm5420_vm9, %v730_v25, %v737_v54  ;;  %v287_v6 = vsel %vm5360_vm3, 0, %v286_v59  ;;  %v498_v15 = vld [vmem:[%s5396_s23 + $0x78] sm:$0xf]  ;;  %v499_v23 = vld [vmem:[%s5396_s23 + $0x7c] sm:$0xf] }
  0x6c   : > { %1488 = vrot.lane.b32.xlu1 %v5723_v19, %s5308_s9  ;;  %919 = vst.msk [vmem:[#allocation2 + $0xac] sm:$0xf] %vm226_vm0, %v738_v60  ;;  %v746_v10 = vor.u32 %v744_v56, %v743_v62  ;;  %288 = vst [vmem:[#allocation2 + $0xc0] sm:$0x1] %v287_v6  ;;  %v747_v12 = vrot.slane %v743_v62, 4  ;;  %v758_v29 = vshrl.u32 %v498_v15, 16 }
  0x6d   : > { %v1215_v50 = vrot.slane %v1213_v2, 1  ;;  %v920_v9 = vld [vmem:[#allocation2 + $0xb0] sm:$0x1]  ;;  %v1220_v16 = vshll.u32 %v5773_v7, 16  ;;  %v761_v30 = vshll.u32 %v498_v15, 16  ;;  %v766_v31 = vshrl.u32 %v499_v23, 16 }
  0x6e   : > { %v921_v11 = vsel %vm5360_vm3, %v739_v57, %v920_v9  ;;  %v5085_v27 = vld [vmem:[#allocation2 + $0x68] ss:$0 sps:$4 sm:$0x11]   ;;  %v760_v28 = vrot.slane %v758_v29, 7  ;;  %v769_v18 = vshll.u32 %v499_v23, 16  ;;  %v1218_v43 = vshrl.u32 %v5773_v7, 16 }
  0x6f   : > { %1486 = vrot.lane.b32.xlu0 %v5644_v46, %s5308_s9  ;;  %v339_v46 = vld [vmem:[#allocation2 + $0xbc] sm:$0x1]  ;;  %v5768_v4 = vsel %vm1120_vm11, %v1211_v53, %v1215_v50  ;;  %922 = vst [vmem:[#allocation2 + $0xb0] sm:$0x1] %v921_v11  ;;  %v923_v21 = vld [vmem:[#allocation2 + $0xb4] sm:$0xf] }
  0x70   : > { %1523 = vrot.lane.b32.xlu1 %v5739_v33, %s5306_s30  ;;  %v340_v3 = vsel %vm5388_vm6, 0, %v339_v46  ;;  %v924_v26 = vsel %vm5413_vm8, %v746_v10, %v923_v21  ;;  %v342_v34 = vld [vmem:[#allocation2 + $0xc8] sm:$0x1]  ;;  %v763_v47 = vor.u32 %v761_v30, %v760_v28  ;;  %v764_v36 = vrot.slane %v760_v28, 4  ;;  %v289_v54 = vld [vmem:[#allocation2 + $0xcc] sm:$0x1] }
  0x71   : > { %341 = vst [vmem:[#allocation2 + $0xbc] sm:$0x1] %v340_v3  ;;  %925 = vst [vmem:[#allocation2 + $0xb4] sm:$0xf] %v924_v26  ;;  %v768_v2 = vrot.slane %v766_v31, 7  ;;  %v1222_v44 = vrot.slane %v1220_v16, 1 }
  0x72   : > { %v1225_v25 = vshll.u32 %v5085_v27, 16  ;;  %v1370_v52 = vrot.slane %v5773_v7, 1  ;;  %v1371_v53 = vrot.slane %v5085_v27, 1  ;;  %v1232_v50 = vshll.u32 %v5812_v32, 16  ;;  %v345_v57 = vld [vmem:[#allocation2 + $0xd4] sm:$0x1] }
  0x73   : > { %1521 = vrot.lane.b32.xlu0 %v5687_v38, %s5306_s30  ;;  %v751_v38 = vrot.slane %v749_v58, 7  ;;  %v930_v39 = vld [vmem:[#allocation2 + $0xc0] sm:$0xf]  ;;  %v771_v40 = vor.u32 %v769_v18, %v768_v2  ;;  %v773_v48 = vrot.slane %v768_v2, 4  ;;  %v1223_v49 = vor.u32 %v1222_v44, %v1218_v43  ;;  %v5847_v10 = vld [vmem:[#allocation2 + $0x78] sm:$0xff]   ;;  %v5862_v31 = vld [vmem:[#allocation2 + $0x84] sm:$0xff]  }
  0x74   : > { %1560 = vrot.lane.b32.xlu1 %v5709_v13, %s5304_s26  ;;  %v931_v41 = vsel %vm5413_vm8, %v763_v47, %v930_v39  ;;  %v1227_v61 = vrot.slane %v1225_v25, 1  ;;  %v5087_v56 = vld [vmem:[#allocation2 + $0x74] ss:$0 sps:$4 sm:$0x11]   ;;  %v346_v58 = vsel %vm5388_vm6, 0, %v345_v57  ;;  %v1372_v59 = vsel %vm1345_vm10, %v1370_v52, %v1371_v53 }
  0x75   : > { %v754_v14 = vor.u32 %v752_v63, %v751_v38  ;;  %v756_v22 = vrot.slane %v751_v38, 4  ;;  %932 = vst [vmem:[#allocation2 + $0xc0] sm:$0xf] %v931_v41  ;;  %v772_v45 = vsel %vm5420_vm9, %v764_v36, %v771_v40  ;;  %347 = vst [vmem:[#allocation2 + $0xd4] sm:$0x1] %v346_v58  ;;  %v1230_v60 = vshrl.u32 %v5812_v32, 16 }
  0x76   : > { %933 = vst.msk [vmem:[#allocation2 + $0xc4] sm:$0xf] %vm226_vm0, %v772_v45  ;;  %v1228_v55 = vsel %vm1120_vm11, %v1223_v49, %v1227_v61  ;;  %v1234_v62 = vrot.slane %v1232_v50, 1  ;;  %v1237_v63 = vshll.u32 %v5087_v56, 16  ;;  %v1244_v23 = vshll.u32 %v5847_v10, 16 }
  0x77   : > { %1558 = vrot.lane.b32.xlu0 %v5659_v5, %s5304_s26  ;;  %v755_v20 = vsel %vm5420_vm9, %v747_v12, %v754_v14  ;;  %v1368_v5 = vrot.slane %v5725_v24, 1  ;;  %v1373_v12 = vrot.slane %v5812_v32, 1  ;;  %v1374_v14 = vrot.slane %v5087_v56, 1  ;;  %v5870_v39 = vld [vmem:[#allocation2 + $0x8c] ss:$0 sps:$4 sm:$0x11]  }
  0x78   : > { %1607 = vrot.lane.b32.xlu1 %v5768_v4, %s5309_s10  ;;  %926 = vst.msk [vmem:[#allocation2 + $0xb8] sm:$0xf] %vm226_vm0, %v755_v20  ;;  %v927_v24 = vld [vmem:[#allocation2 + $0xbc] sm:$0x1]  ;;  %v1235_v1 = vor.u32 %v1234_v62, %v1230_v60  ;;  %v1239_v3 = vrot.slane %v1237_v63, 1  ;;  %v1242_v29 = vshrl.u32 %v5847_v10, 16 }
  0x79   : > { %v928_v35 = vsel %vm5360_vm3, %v756_v22, %v927_v24  ;;  %v1369_v42 = vsel %vm1345_vm10, %v1367_v17, %v1368_v5  ;;  %v5090_v17 = vld [vmem:[#allocation2 + $0x80] ss:$0 sps:$4 sm:$0x11]   ;;  %v1375_v21 = vsel %vm1345_vm10, %v1373_v12, %v1374_v14  ;;  %v1246_v5 = vrot.slane %v1244_v23, 1 }
  0x7a   : > { %929 = vst [vmem:[#allocation2 + $0xbc] sm:$0x1] %v928_v35  ;;  %v5839_v6 = vsel %vm1120_vm11, %v1235_v1, %v1239_v3  ;;  %v1249_v16 = vshll.u32 %v5090_v17, 16  ;;  %vm1664_vm13 = vcmask 31744   ;;  %vm1697_vm14 = vcmask 64512   ;;  %v5276_v24 = vld [vmem:[#allocation2] sm:$0xff]  }
  0x7b   : > { %1605 = vrot.lane.b32.xlu0 %v5723_v19, %s5309_s10  ;;  %v1247_v28 = vor.u32 %v1246_v5, %v1242_v29  ;;  %v1376_v35 = vrot.slane %v5847_v10, 1  ;;  %v1377_v47 = vrot.slane %v5090_v17, 1  ;;  %v1256_v40 = vshll.u32 %v5862_v31, 16  ;;  %v5096_v17 = vld [vmem:[#allocation2 + $0x98] ss:$0 sps:$4 sm:$0x11]  }
  0x7c   : > { %1325 = vrot.lane.b32.xlu1 %v5723_v19, %s5305_s29  ;;  %v343_v19 = vsel %vm5388_vm6, 0, %v342_v34  ;;  %v1251_v30 = vrot.slane %v1249_v16, 1  ;;  %vm1730_vm15 = vcmask 97280   ;;  %vm1763_vm0 = vcmask 130048  }
  0x7d   : > { %344 = vst [vmem:[#allocation2 + $0xc8] sm:$0x1] %v343_v19  ;;  %v5277_v19 = vld [vmem:[#allocation2 + $0xc] sm:$0xff]   ;;  %vm1796_vm1 = vcmask 162816   ;;  %v1378_v45 = vsel %vm1345_vm10, %v1376_v35, %v1377_v47  ;;  %v1258_v52 = vrot.slane %v1256_v40, 1  ;;  %v1261_v53 = vshll.u32 %v5870_v39, 16 }
  0x7e   : > { %v1252_v2 = vsel %vm1120_vm11, %v1247_v28, %v1251_v30  ;;  %vm1895_vm6 = vcmask 261120   ;;  %vm1862_vm7 = vcmask 228352   ;;  %vm7529_vm8 = vcmask 293888  }
  0x7f   : > { %1640 = vrot.lane.b32.xlu0 %v5739_v33, %s5307_s8  ;;  %v1263_v58 = vrot.slane %v1261_v53, 1  ;;  %v1379_v12 = vrot.slane %v5862_v31, 1  ;;  %v1380_v14 = vrot.slane %v5870_v39, 1  ;;  %v1273_v16 = vshll.u32 %v5096_v17, 16 }
  0x80   : > { %1327 = vrot.lane.b32.xlu1 %v5768_v4, %s5305_s29  ;;  %v1383_v35 = vrot.slane %v5096_v17, 1  ;;  %vm351_vm12 = vcmask 57344  }
  0x81   : > { %v1275_v30 = vrot.slane %v1273_v16, 1  ;;  %352 = vst.msk [vmem:[#allocation3 + $0x8] sm:$0x1] %vm351_vm12, %v5301_v0  ;;  %356 = vst.msk [vmem:[#allocation3 + $0xd4] sm:$0x1] %vm351_vm12, %v5301_v0 }
  0x82   : > { %vm5985_vm4 = vmand %vm351_vm12, %vm236_vm2  ;;  %v5100_v16 = vld [vmem:[#allocation2 + $0xb0] ss:$0 sps:$4 sm:$0x11]   ;;  %vm7542_vm2 = vcmask 293888  }
  0x83   : > { %1642 = vrot.lane.b32.xlu0 %v1369_v42, %s5307_s8 }
  0x84   : > { %1408 = vrot.lane.b32.xlu1 %v1369_v42, %s5302_s24  ;;  %v934_v51 = vld [vmem:[#allocation2 + $0xc8] sm:$0x1] }
  0x85   : > { %v935_v46 = vsel %vm5360_vm3, %v773_v48, %v934_v51  ;;  %v1254_v48 = vshrl.u32 %v5862_v31, 16 }
  0x86   : > { %936 = vst [vmem:[#allocation2 + $0xc8] sm:$0x1] %v935_v46 }
  0x87   : > { %1406 = vrot.lane.b32.xlu0 %v5739_v33, %s5302_s24  ;;  %v290_v33 = vsel %vm5360_vm3, 0, %v289_v54  ;;  %vm1829_vm3 = vcmask 195584   ;;  %v1259_v57 = vor.u32 %v1258_v52, %v1254_v48 }
  0x88   : > { %1445 = vrot.lane.b32.xlu1 %v5773_v7, %s5303_s25  ;;  %291 = vst [vmem:[#allocation2 + $0xcc] sm:$0x1] %v290_v33 }
  0x8b   : > { %1443 = vrot.lane.b32.xlu0 %v5709_v13, %s5303_s25 }
  0x8c   : > { %1492 = vrot.lane.b32.xlu1 %v1228_v55, %s5308_s9 }
  0x8f   : > { %1490 = vrot.lane.b32.xlu0 %v5768_v4, %s5308_s9 }
  0x90   : > { %1527 = vrot.lane.b32.xlu1 %v1372_v59, %s5306_s30 }
  0x91   : > { %v1395_v38 = vpop.permute.xlu1 %1394 }
  0x93   : > { %1525 = vrot.lane.b32.xlu0 %v1369_v42, %s5306_s30 }
  0x94   : > { %1564 = vrot.lane.b32.xlu1 %v5812_v32, %s5304_s26  ;;  %v1432_v8 = vpop.permute.xlu0 %1431 }
  0x95   : > { %v1434_v9 = vpop.permute.xlu1 %1433 }
  0x97   : > { %1562 = vrot.lane.b32.xlu0 %v5773_v7, %s5304_s26 }
  0x98   : > { %1611 = vrot.lane.b32.xlu1 %v5839_v6, %s5309_s10  ;;  %v5845_v4 = vpop.permute.xlu0 %1550 }
  0x99   : > { %v5849_v11 = vpop.permute.xlu1 %1552 }
  0x9b   : > { %1609 = vrot.lane.b32.xlu0 %v1228_v55, %s5309_s10 }
  0x9c   : > { %1329 = vrot.lane.b32.xlu1 %v1228_v55, %s5305_s29  ;;  %v1314_v15 = vpop.permute.xlu0 %1313 }
  0x9d   : > { %v1397_v20 = vpop.permute.xlu1 %1396  ;;  %v1666_v34 = vsel %vm1664_vm13, %v5276_v24, %v1314_v15 }
  0x9e   : > { %v1699_v41 = vsel %vm1697_vm14, %v1666_v34, %v1395_v38  ;;  %v1264_v38 = vsel %vm1120_vm11, %v1259_v57, %v1263_v58 }
  0x9f   : > { %1644 = vrot.lane.b32.xlu0 %v1372_v59, %s5307_s8  ;;  %v1732_v61 = vsel %vm1730_vm15, %v1699_v41, %v1432_v8  ;;  %v5278_v41 = vld [vmem:[#allocation2 + $0x18] sm:$0xff]  }
  0xa0   : > { %1331 = vrot.lane.b32.xlu1 %v5839_v6, %s5305_s29  ;;  %v1514_v22 = vpop.permute.xlu0 %1513 }
  0xa1   : > { %v1516_v26 = vpop.permute.xlu1 %1515 }
  0xa3   : > { %1646 = vrot.lane.b32.xlu0 %v1375_v21, %s5307_s8 }
  0xa4   : > { %1412 = vrot.lane.b32.xlu1 %v1375_v21, %s5302_s24 }
  0xa5   : > { %v1633_v27 = vpop.permute.xlu0 %1632 }
  0xa6   : > { %v1481_v18 = vpop.permute.xlu1 %1480 }
  0xa7   : > { %1410 = vrot.lane.b32.xlu0 %v1372_v59, %s5302_s24 }
  0xa8   : > { %1449 = vrot.lane.b32.xlu1 %v5847_v10, %s5303_s25 }
  0xa9   : > { %v1316_v36 = vpop.permute.xlu0 %1315 }
  0xaa   : > { %v1668_v42 = vsel %vm1664_vm13, %v5277_v19, %v1316_v36  ;;  %v1600_v43 = vpop.permute.xlu1 %1599 }
  0xab   : > { %v1701_v44 = vsel %vm1697_vm14, %v1668_v42, %v1397_v20  ;;  %1447 = vrot.lane.b32.xlu0 %v5812_v32, %s5303_s25 }
  0xac   : > { %v1734_v25 = vsel %vm1730_vm15, %v1701_v44, %v1434_v9  ;;  %1496 = vrot.lane.b32.xlu1 %v1252_v2, %s5308_s9 }
  0xad   : > { %v1767_v49 = vsel %vm1763_vm0, %v1734_v25, %v1481_v18  ;;  %v1479_v51 = vpop.permute.xlu0 %1478  ;;  %v5923_v18 = vld [vmem:[#allocation2 + $0x9c] sm:$0xff]   ;;  %v5279_v25 = vld [vmem:[#allocation2 + $0x24] sm:$0xff]  }
  0xae   : > { %v1765_v50 = vsel %vm1763_vm0, %v1732_v61, %v1479_v51  ;;  %v5886_v46 = vpop.permute.xlu1 %1317  ;;  %v1800_v54 = vsel %vm1796_vm1, %v1767_v49, %v1516_v26  ;;  %v1280_v39 = vshll.u32 %v5923_v18, 16  ;;  %v1278_v44 = vshrl.u32 %v5923_v18, 16 }
  0xaf   : > { %v1798_v55 = vsel %vm1796_vm1, %v1765_v50, %v1514_v22  ;;  %1494 = vrot.lane.b32.xlu0 %v5839_v6, %s5308_s9  ;;  %v1833_v59 = vsel %vm1829_vm3, %v1800_v54, %v5849_v11  ;;  %v1670_v19 = vsel %vm1664_vm13, %v5278_v41, %v5886_v46 }
  0xb0   : > { %v1831_v56 = vsel %vm1829_vm3, %v1798_v55, %v5845_v4  ;;  %1531 = vrot.lane.b32.xlu1 %v1378_v45, %s5306_s30  ;;  %v1866_v1 = vsel %vm1862_vm7, %v1833_v59, %v1600_v43  ;;  %v5910_v4 = vld [vmem:[#allocation2 + $0x90] sm:$0xff]   ;;  %v1282_v61 = vrot.slane %v1280_v39, 1 }
  0xb1   : > { %v1598_v33 = vpop.permute.xlu0 %1597  ;;  %v1268_v23 = vshll.u32 %v5910_v4, 16  ;;  %v1266_v29 = vshrl.u32 %v5910_v4, 16  ;;  %v1382_v34 = vrot.slane %v5910_v4, 1 }
  0xb2   : > { %v1864_v60 = vsel %vm1862_vm7, %v1831_v56, %v1598_v33  ;;  %v1320_v62 = vpop.permute.xlu1 %1319  ;;  %v1283_v57 = vor.u32 %v1282_v61, %v1278_v44  ;;  %v1389_v44 = vrot.slane %v5100_v16, 1 }
  0xb3   : > { %1529 = vrot.lane.b32.xlu0 %v1375_v21, %s5306_s30  ;;  %v1897_v63 = vsel %vm1895_vm6, %v1864_v60, %v1633_v27  ;;  %v1381_v21 = vsel %vm1345_vm10, %v1379_v12, %v1380_v14  ;;  %v1270_v5 = vrot.slane %v1268_v23, 1  ;;  %v5940_v43 = vsel %vm1345_vm10, %v1382_v34, %v1383_v35  ;;  %v5989_v14 = vld [vmem:[#allocation2 + $0xa8] sm:$0xff]  }
  0xb4   : > { %4971 = vmatprep.mubr.msk.bf16.mxu0 %vm7529_vm8, %v1897_v63  ;;  %1568 = vrot.lane.b32.xlu1 %v5862_v31, %s5304_s26  ;;  %v1297_v35 = vshll.u32 %v5100_v16, 16 }
  0xb5   : > { %v1635_v3 = vpop.permute.xlu0 %1634  ;;  %v1271_v28 = vor.u32 %v1270_v5, %v1266_v29 }
  0xb6   : > { %v1899_v8 = vsel %vm1895_vm6, %v1866_v1, %v1635_v3  ;;  %v1401_v6 = vpop.permute.xlu1 %1400  ;;  %v1299_v39 = vrot.slane %v1297_v35, 1  ;;  %v5104_v35 = vld [vmem:[#allocation2 + $0xc8] ss:$0 sps:$4 sm:$0x11]  }
  0xb7   : > { %1566 = vrot.lane.b32.xlu0 %v5847_v10, %s5304_s26  ;;  %4972 = vmatmul.mubr.msk.bf16.vlgmr.msra.gmra.mrb[0].mxu0 %vm7529_vm8, %v1899_v8  ;;  %v1276_v36 = vsel %vm1120_vm11, %v1271_v28, %v1275_v30 }
  0xb8   : > { %1615 = vrot.lane.b32.xlu1 %v1264_v38, %s5309_s10 }
  0xb9   : > { %v1399_v9 = vpop.permute.xlu0 %1398 }
  0xba   : > { %v1438_v11 = vpop.permute.xlu1 %1437  ;;  %v1703_v42 = vsel %vm1697_vm14, %v1670_v19, %v1399_v9  ;;  %v410_v19 = vld [vmem:[#allocation3 + $0xcc] sm:$0x1] }
  0xbb   : > { %1613 = vrot.lane.b32.xlu0 %v1252_v2, %s5309_s10 }
  0xbc   : > { %1333 = vrot.lane.b32.xlu1 %v1252_v2, %s5305_s29  ;;  %v5930_v2 = vld [vmem:[#allocation2 + $0xa4] ss:$0 sps:$4 sm:$0x11]  }
  0xbd   : > { %v1436_v15 = vpop.permute.xlu0 %1435  ;;  %v1285_v51 = vshll.u32 %v5930_v2, 16  ;;  %v1386_v29 = vrot.slane %v5930_v2, 1 }
  0xbe   : > { %v1485_v20 = vpop.permute.xlu1 %1484  ;;  %v1736_v48 = vsel %vm1730_vm15, %v1703_v42, %v1436_v15  ;;  %v1388_v42 = vrot.slane %v5989_v14, 1 }
  0xbf   : > { %1648 = vrot.lane.b32.xlu0 %v1378_v45, %s5307_s8  ;;  %v1287_v58 = vrot.slane %v1285_v51, 1 }
  0xc0   : > { %1335 = vrot.lane.b32.xlu1 %v1264_v38, %s5305_s29 }
  0xc1   : > { %v1483_v22 = vpop.permute.xlu0 %1482  ;;  %v5973_v8 = vsel %vm1120_vm11, %v1283_v57, %v1287_v58 }
  0xc2   : > { %v1520_v26 = vpop.permute.xlu1 %1519  ;;  %v1769_v52 = vsel %vm1763_vm0, %v1736_v48, %v1483_v22  ;;  %v1385_v22 = vrot.slane %v5923_v18, 1 }
  0xc3   : > { %1650 = vrot.lane.b32.xlu0 %v1381_v21, %s5307_s8 }
  0xc4   : > { %1416 = vrot.lane.b32.xlu1 %v1381_v21, %s5302_s24  ;;  %v1387_v28 = vsel %vm1345_vm10, %v1385_v22, %v1386_v29 }
  0xc5   : > { %v1518_v27 = vpop.permute.xlu0 %1517 }
  0xc6   : > { %v1557_v24 = vpop.permute.xlu1 %1556  ;;  %v1802_v50 = vsel %vm1796_vm1, %v1769_v52, %v1518_v27  ;;  %v5280_v52 = vld [vmem:[#allocation2 + $0x30] sm:$0xff]  }
  0xc7   : > { %1414 = vrot.lane.b32.xlu0 %v1378_v45, %s5302_s24  ;;  %v1672_v45 = vsel %vm1664_vm13, %v5279_v25, %v1320_v62  ;;  %v411_v25 = vsel %vm5985_vm4, 0, %v410_v19 }
  0xc8   : > { %1453 = vrot.lane.b32.xlu1 %v5910_v4, %s5303_s25  ;;  %v1705_v46 = vsel %vm1697_vm14, %v1672_v45, %v1401_v6  ;;  %412 = vst [vmem:[#allocation3 + $0xcc] sm:$0x1] %v411_v25  ;;  %v6075_v25 = vld [vmem:[#allocation2 + $0xcc] sm:$0xff]  }
  0xc9   : > { %v1555_v47 = vpop.permute.xlu0 %1554  ;;  %v1738_v55 = vsel %vm1730_vm15, %v1705_v46, %v1438_v11  ;;  %v359_v11 = vld [vmem:[#allocation3] sm:$0x1]  ;;  %v1390_v46 = vsel %vm1345_vm10, %v1388_v42, %v1389_v44  ;;  %v1474_v42 = vshll.u32 %v5104_v35, 16 }
  0xca   : > { %v1604_v40 = vpop.permute.xlu1 %1603  ;;  %v1835_v54 = vsel %vm1829_vm3, %v1802_v50, %v1555_v47  ;;  %v1771_v59 = vsel %vm1763_vm0, %v1738_v55, %v1485_v20  ;;  %v360_v15 = vsel %vm5985_vm4, 0, %v359_v11  ;;  %v414_v20 = vld [vmem:[#allocation3 + $0x8] sm:$0x1] }
  0xcb   : > { %1451 = vrot.lane.b32.xlu0 %v5862_v31, %s5303_s25  ;;  %v1804_v63 = vsel %vm1796_vm1, %v1771_v59, %v1520_v26  ;;  %361 = vst [vmem:[#allocation3] sm:$0x1] %v360_v15  ;;  %v1292_v26 = vshll.u32 %v5989_v14, 16  ;;  %v5281_v55 = vld [vmem:[#allocation2 + $0x3c] sm:$0xff]  }
  0xcc   : > { %1500 = vrot.lane.b32.xlu1 %v1276_v36, %s5308_s9  ;;  %v1837_v1 = vsel %vm1829_vm3, %v1804_v63, %v1557_v24  ;;  %v1290_v24 = vshrl.u32 %v5989_v14, 16 }
  0xcd   : > { %v1602_v49 = vpop.permute.xlu0 %1601  ;;  %v1870_v3 = vsel %vm1862_vm7, %v1837_v1, %v1604_v40  ;;  %v1294_v34 = vrot.slane %v1292_v26, 1  ;;  %v6014_v40 = vld [vmem:[#allocation2 + $0xb4] sm:$0xff]  }
  0xce   : > { %v5947_v53 = vpop.permute.xlu1 %1321  ;;  %v1868_v56 = vsel %vm1862_vm7, %v1835_v54, %v1602_v49  ;;  %v5102_v49 = vld [vmem:[#allocation2 + $0xbc] ss:$0 sps:$4 sm:$0x11]   ;;  %v1304_v61 = vshll.u32 %v6014_v40, 16  ;;  %v1302_v54 = vshrl.u32 %v6014_v40, 16 }
  0xcf   : > { %1498 = vrot.lane.b32.xlu0 %v1264_v38, %s5308_s9  ;;  %v1295_v2 = vor.u32 %v1294_v34, %v1290_v24  ;;  %v1392_v24 = vrot.slane %v5102_v49, 1 }
  0xd0   : > { %1535 = vrot.lane.b32.xlu1 %v5940_v43, %s5306_s30  ;;  %v1306_v58 = vrot.slane %v1304_v61, 1 }
  0xd1   : > { %v1637_v33 = vpop.permute.xlu0 %1636  ;;  %v1300_v48 = vsel %vm1120_vm11, %v1295_v2, %v1299_v39 }
  0xd2   : > { %v1901_v60 = vsel %vm1895_vm6, %v1868_v56, %v1637_v33  ;;  %v5959_v62 = vpop.permute.xlu1 %1323  ;;  %v1307_v11 = vor.u32 %v1306_v58, %v1302_v54  ;;  %v1586_v58 = vshrl.u32 %v6075_v25, 16 }
  0xd3   : > { %1533 = vrot.lane.b32.xlu0 %v1381_v21, %s5306_s30  ;;  %4975 = vmatprep.mubr.msk.bf16.mxu0 %vm7529_vm8, %v1901_v60  ;;  %v1676_v56 = vsel %vm1664_vm13, %v5281_v55, %v5959_v62  ;;  %v1511_v55 = vrot.slane %v5104_v35, 1 }
  0xd4   : > { %1572 = vrot.lane.b32.xlu1 %v5923_v18, %s5304_s26 }
  0xd5   : > { %v1639_v38 = vpop.permute.xlu0 %1638 }
  0xd6   : > { %v1903_v6 = vsel %vm1895_vm6, %v1870_v3, %v1639_v38  ;;  %v5976_v9 = vpop.permute.xlu1 %1404 }
  0xd7   : > { %1570 = vrot.lane.b32.xlu0 %v5910_v4, %s5304_s26  ;;  %4976 = vmatmul.mubr.msk.bf16.gmra.mrb[4].mxu0 %vm7529_vm8, %v1903_v6  ;;  %vm5995_vm8 = vmand %vm351_vm12, %vm292_vm5  ;;  %v1709_v1 = vsel %vm1697_vm14, %v1676_v56, %v5976_v9 }
  0xd8   : > { %1619 = vrot.lane.b32.xlu1 %v5973_v8, %s5309_s10  ;;  %v415_v21 = vsel %vm5995_vm8, 0, %v414_v20  ;;  %vm7543_vm12 = vmmov %vm7542_vm2 }
  0xd9   : > { %v1403_v12 = vpop.permute.xlu0 %1402  ;;  %416 = vst [vmem:[#allocation3 + $0x8] sm:$0x1] %v415_v21 }
  0xda   : > { %v1442_v17 = vpop.permute.xlu1 %1441 }
  0xdb   : > { %1617 = vrot.lane.b32.xlu0 %v1276_v36, %s5309_s10  ;;  %v1742_v62 = vsel %vm1730_vm15, %v1709_v1, %v1442_v17 }
  0xdc   : > { %1337 = vrot.lane.b32.xlu1 %v1276_v36, %s5305_s29 }
  0xdd   : > { %v1440_v5 = vpop.permute.xlu0 %1439 }
  0xde   : > { %v1489_v27 = vpop.permute.xlu1 %1488 }
  0xdf   : > { %1652 = vrot.lane.b32.xlu0 %v5940_v43, %s5307_s8  ;;  %v1775_v15 = vsel %vm1763_vm0, %v1742_v62, %v1489_v27  ;;  %v6063_v27 = vld [vmem:[#allocation2 + $0xc0] sm:$0xff]  }
  0xe0   : > { %1339 = vrot.lane.b32.xlu1 %v5973_v8, %s5305_s29  ;;  %v1510_v54 = vrot.slane %v6063_v27, 1 }
  0xe1   : > { %v1487_v30 = vpop.permute.xlu0 %1486 }
  0xe2   : > { %v1524_v47 = vpop.permute.xlu1 %1523  ;;  %v1512_v62 = vsel %vm1345_vm10, %v1510_v54, %v1511_v55 }
  0xe3   : > { %1654 = vrot.lane.b32.xlu0 %v1387_v28, %s5307_s8 }
  0xe4   : > { %1420 = vrot.lane.b32.xlu1 %v1387_v28, %s5302_s24 }
  0xe5   : > { %v1522_v36 = vpop.permute.xlu0 %1521 }
  0xe6   : > { %v1561_v41 = vpop.permute.xlu1 %1560 }
  0xe7   : > { %1418 = vrot.lane.b32.xlu0 %v5940_v43, %s5302_s24  ;;  %v1674_v43 = vsel %vm1664_vm13, %v5280_v52, %v5947_v53  ;;  %v1309_v53 = vshll.u32 %v5102_v49, 16  ;;  %v1476_v49 = vrot.slane %v1474_v42, 1  ;;  %v1588_v52 = vshll.u32 %v6075_v25, 16 }
  0xe8   : > { %1457 = vrot.lane.b32.xlu1 %v5989_v14, %s5303_s25  ;;  %v1707_v50 = vsel %vm1697_vm14, %v1674_v43, %v1403_v12 }
  0xe9   : > { %v1559_v45 = vpop.permute.xlu0 %1558  ;;  %v1740_v33 = vsel %vm1730_vm15, %v1707_v50, %v1440_v5  ;;  %v1311_v12 = vrot.slane %v1309_v53, 1  ;;  %v1590_v53 = vrot.slane %v1588_v52, 1 }
  0xea   : > { %v1608_v51 = vpop.permute.xlu1 %1607  ;;  %v1773_v59 = vsel %vm1763_vm0, %v1740_v33, %v1487_v30  ;;  %v1391_v30 = vrot.slane %v6014_v40, 1  ;;  %v5282_v33 = vld [vmem:[#allocation2 + $0x48] sm:$0xff]  }
  0xeb   : > { %1455 = vrot.lane.b32.xlu0 %v5923_v18, %s5303_s25  ;;  %v1806_v63 = vsel %vm1796_vm1, %v1773_v59, %v1522_v36  ;;  %v1312_v29 = vsel %vm1120_vm11, %v1307_v11, %v1311_v12 }
  0xec   : > { %1504 = vrot.lane.b32.xlu1 %v1300_v48, %s5308_s9  ;;  %v1839_v3 = vsel %vm1829_vm3, %v1806_v63, %v1559_v45  ;;  %v1393_v2 = vsel %vm1345_vm10, %v1391_v30, %v1392_v24  ;;  %v1629_v24 = vrot.slane %v6075_v25, 1 }
  0xed   : > { %v1606_v57 = vpop.permute.xlu0 %1605 }
  0xee   : > { %v6037_v60 = vpop.permute.xlu1 %1325  ;;  %v1872_v38 = vsel %vm1862_vm7, %v1839_v3, %v1606_v57 }
  0xef   : > { %1502 = vrot.lane.b32.xlu0 %v5973_v8, %s5308_s9  ;;  %v1808_v8 = vsel %vm1796_vm1, %v1775_v15, %v1524_v47  ;;  %v1469_v47 = vshll.u32 %v6063_v27, 16  ;;  %v1678_v57 = vsel %vm1664_vm13, %v5282_v33, %v6037_v60  ;;  %v5107_v60 = vld [vmem:[#allocation3] sm:$0xff]  }
  0xf0   : > { %1539 = vrot.lane.b32.xlu1 %v1390_v46, %s5306_s30  ;;  %v1841_v9 = vsel %vm1829_vm3, %v1808_v8, %v1561_v41  ;;  %v1467_v41 = vshrl.u32 %v6063_v27, 16 }
  0xf1   : > { %v1641_v6 = vpop.permute.xlu0 %1640  ;;  %v1874_v17 = vsel %vm1862_vm7, %v1841_v9, %v1608_v51  ;;  %v1471_v19 = vrot.slane %v1469_v47, 1  ;;  %v5106_v51 = vld [vmem:[#allocation2 + $0xd4] ss:$0 sps:$4 sm:$0x11]  }
  0xf2   : > { %v1905_v20 = vsel %vm1895_vm6, %v1872_v38, %v1641_v6  ;;  %v1328_v21 = vpop.permute.xlu1 %1327  ;;  %v1593_v59 = vshll.u32 %v5106_v51, 16 }
  0xf3   : > { %1537 = vrot.lane.b32.xlu0 %v1387_v28, %s5306_s30  ;;  %4979 = vmatprep.mubr.msk.bf16.mxu0 %vm7542_vm2, %v1905_v20  ;;  %v1680_v63 = vsel %vm1664_vm13, %v5709_v13, %v1328_v21  ;;  %v1591_v13 = vor.u32 %v1590_v53, %v1586_v58 }
  0xf4   : > { %1576 = vrot.lane.b32.xlu1 %v6014_v40, %s5304_s26  ;;  %v1595_v20 = vrot.slane %v1593_v59, 1 }
  0xf5   : > { %v1643_v22 = vpop.permute.xlu0 %1642 }
  0xf6   : > { %v1907_v5 = vsel %vm1895_vm6, %v1874_v17, %v1643_v22  ;;  %v1409_v16 = vpop.permute.xlu1 %1408  ;;  %v5108_v17 = vld [vmem:[#allocation3 + $0x8] ss:$0 sps:$4 sm:$0x11]   ;;  %v3222_v22 = vshll.u32 %v5107_v60, 16 }
  0xf7   : > { %1574 = vrot.lane.b32.xlu0 %v5989_v14, %s5304_s26  ;;  %4980 = vmatmul.mubr.msk.bf16.gmra.mrb[8].mxu0 %vm7543_vm12, %v1907_v5  ;;  %v1713_v12 = vsel %vm1697_vm14, %v1680_v63, %v1409_v16  ;;  %vm7544_vm12 = vmmov %vm7542_vm2  ;;  %v3444_v52 = vrot.slane %v5108_v17, 1 }
  0xf8   : > { %1623 = vrot.lane.b32.xlu1 %v1312_v29, %s5309_s10 }
  0xf9   : > { %v1407_v26 = vpop.permute.xlu0 %1406 }
  0xfa   : > { %v1446_v28 = vpop.permute.xlu1 %1445 }
  0xfb   : > { %1621 = vrot.lane.b32.xlu0 %v1300_v48, %s5309_s10  ;;  %v1746_v21 = vsel %vm1730_vm15, %v1713_v12, %v1446_v28  ;;  %v1596_v28 = vsel %vm1120_vm11, %v1591_v13, %v1595_v20 }
  0xfc   : > { %1341 = vrot.lane.b32.xlu1 %v1300_v48, %s5305_s29  ;;  %v1472_v48 = vor.u32 %v1471_v19, %v1467_v41  ;;  %v3227_v41 = vshll.u32 %v5108_v17, 16 }
  0xfd   : > { %v1444_v34 = vpop.permute.xlu0 %1443 }
  0xfe   : > { %v1493_v36 = vpop.permute.xlu1 %1492  ;;  %v1477_v50 = vsel %vm1120_vm11, %v1472_v48, %v1476_v49 }
  0xff   : > { %1656 = vrot.lane.b32.xlu0 %v1390_v46, %s5307_s8  ;;  %v1779_v5 = vsel %vm1763_vm0, %v1746_v21, %v1493_v36  ;;  %v3220_v36 = vshrl.u32 %v5107_v60, 16 }
 0x100   : > { %1343 = vrot.lane.b32.xlu1 %v1312_v29, %s5305_s29 }
 0x101   : > { %v1491_v39 = vpop.permute.xlu0 %1490 }
 0x102   : > { %v1528_v44 = vpop.permute.xlu1 %1527 }
 0x103   : > { %1658 = vrot.lane.b32.xlu0 %v1393_v2, %s5307_s8  ;;  %v1812_v16 = vsel %vm1796_vm1, %v1779_v5, %v1528_v44 }
 0x104   : > { %1424 = vrot.lane.b32.xlu1 %v1393_v2, %s5302_s24 }
 0x105   : > { %v1526_v45 = vpop.permute.xlu0 %1525 }
 0x106   : > { %v1565_v61 = vpop.permute.xlu1 %1564 }
 0x107   : > { %1422 = vrot.lane.b32.xlu0 %v1390_v46, %s5302_s24  ;;  %v1711_v46 = vsel %vm1697_vm14, %v1678_v57, %v1407_v26  ;;  %v1845_v30 = vsel %vm1829_vm3, %v1812_v16, %v1565_v61 }
 0x108   : > { %1461 = vrot.lane.b32.xlu1 %v6063_v27, %s5303_s25  ;;  %v1744_v1 = vsel %vm1730_vm15, %v1711_v46, %v1444_v34  ;;  %v1630_v34 = vrot.slane %v5106_v51, 1  ;;  %v3443_v51 = vrot.slane %v5107_v60, 1 }
 0x109   : > { %v1563_v43 = vpop.permute.xlu0 %1562  ;;  %v1777_v38 = vsel %vm1763_vm0, %v1744_v1, %v1491_v39  ;;  %v3224_v39 = vrot.slane %v3222_v22, 1 }
 0x10a   : > { %v1612_v56 = vpop.permute.xlu1 %1611  ;;  %v1810_v11 = vsel %vm1796_vm1, %v1777_v38, %v1526_v45  ;;  %v1631_v44 = vsel %vm1345_vm10, %v1629_v24, %v1630_v34  ;;  %v3229_v45 = vrot.slane %v3227_v41, 1  ;;  %v3445_v54 = vsel %vm1345_vm10, %v3443_v51, %v3444_v52 }
 0x10b   : > { %1459 = vrot.lane.b32.xlu0 %v6014_v40, %s5303_s25  ;;  %v1843_v15 = vsel %vm1829_vm3, %v1810_v11, %v1563_v43  ;;  %v1878_v35 = vsel %vm1862_vm7, %v1845_v30, %v1612_v56  ;;  %v5109_v56 = vld [vmem:[#allocation3 + $0xcc] sm:$0xff]  }
 0x10c   : > { %1508 = vrot.lane.b32.xlu1 %v1477_v50, %s5308_s9 }
 0x10d   : > { %v1610_v3 = vpop.permute.xlu0 %1609 }
 0x10e   : > { %v1330_v6 = vpop.permute.xlu1 %1329  ;;  %v1876_v8 = vsel %vm1862_vm7, %v1843_v15, %v1610_v3 }
 0x10f   : > { %1506 = vrot.lane.b32.xlu0 %v1312_v29, %s5308_s9  ;;  %v1682_v58 = vsel %vm1664_vm13, %v5773_v7, %v1330_v6 }
 0x110   : > { %1543 = vrot.lane.b32.xlu1 %v1512_v62, %s5306_s30 }
 0x111   : > { %v1645_v9 = vpop.permute.xlu0 %1644 }
 0x112   : > { %v1909_v26 = vsel %vm1895_vm6, %v1876_v8, %v1645_v9  ;;  %v1332_v29 = vpop.permute.xlu1 %1331 }
 0x113   : > { %1541 = vrot.lane.b32.xlu0 %v1393_v2, %s5306_s30  ;;  %4983 = vmatprep.mubr.msk.bf16.mxu0 %vm7542_vm2, %v1909_v26  ;;  %v1684_v59 = vsel %vm1664_vm13, %v5812_v32, %v1332_v29 }
 0x114   : > { %1580 = vrot.lane.b32.xlu1 %v6075_v25, %s5304_s26  ;;  %v3225_v25 = vor.u32 %v3224_v39, %v3220_v36 }
 0x115   : > { %v1647_v47 = vpop.permute.xlu0 %1646 }
 0x116   : > { %v1911_v2 = vsel %vm1895_vm6, %v1878_v35, %v1647_v47  ;;  %v1413_v19 = vpop.permute.xlu1 %1412  ;;  %v3230_v61 = vsel %vm1120_vm11, %v3225_v25, %v3229_v45 }
 0x117   : > { %1578 = vrot.lane.b32.xlu0 %v6063_v27, %s5304_s26  ;;  %4984 = vmatmul.mubr.msk.bf16.gmra.mrb[12].mxu0 %vm7544_vm12, %v1911_v2  ;;  %v1717_v38 = vsel %vm1697_vm14, %v1684_v59, %v1413_v19  ;;  %vm7545_vm12 = vmmov %vm7542_vm2 }
 0x118   : > { %1627 = vrot.lane.b32.xlu1 %v1596_v28, %s5309_s10 }
 0x119   : > { %v1411_v42 = vpop.permute.xlu0 %1410 }
 0x11a   : > { %v1450_v48 = vpop.permute.xlu1 %1449  ;;  %v1715_v53 = vsel %vm1697_vm14, %v1682_v58, %v1411_v42 }
 0x11b   : > { %1625 = vrot.lane.b32.xlu0 %v1477_v50, %s5309_s10  ;;  %v1750_v12 = vsel %vm1730_vm15, %v1717_v38, %v1450_v48 }
 0x11c   : > { %1662 = vrot.lane.b32.xlu1 %v1631_v44, %s5307_s8 }
 0x11d   : > { %v1448_v49 = vpop.permute.xlu0 %1447 }
 0x11e   : > { %v1497_v27 = vpop.permute.xlu1 %1496  ;;  %v1748_v63 = vsel %vm1730_vm15, %v1715_v53, %v1448_v49 }
 0x11f   : > { %1660 = vrot.lane.b32.xlu0 %v1512_v62, %s5307_s8  ;;  %v1783_v15 = vsel %vm1763_vm0, %v1750_v12, %v1497_v27 }
 0x120   : > { %3411 = vrot.lane.b32.xlu1 %v3230_v61, %s5302_s24 }
 0x121   : > { %v1495_v43 = vpop.permute.xlu0 %1494 }
 0x122   : > { %v1532_v55 = vpop.permute.xlu1 %1531  ;;  %v1781_v3 = vsel %vm1763_vm0, %v1748_v63, %v1495_v43 }
 0x123   : > { %v1816_v20 = vsel %vm1796_vm1, %v1783_v15, %v1532_v55 }
 0x124   : > { %3491 = vrot.lane.b32.xlu1 %v3445_v54, %s5308_s9 }
 0x125   : > { %v1530_v50 = vpop.permute.xlu0 %1529 }
 0x126   : > { %v1569_v33 = vpop.permute.xlu1 %1568  ;;  %v1814_v60 = vsel %vm1796_vm1, %v1781_v3, %v1530_v50 }
 0x127   : > { %v1849_v21 = vsel %vm1829_vm3, %v1816_v20, %v1569_v33 }
 0x128   : > { %3677 = vrot.lane.b32.xlu1 %v5109_v56, %s5310_s13 }
 0x129   : > { %v1567_v57 = vpop.permute.xlu0 %1566 }
 0x12a   : > { %v1616_v46 = vpop.permute.xlu1 %1615  ;;  %v1847_v11 = vsel %vm1829_vm3, %v1814_v60, %v1567_v57 }
 0x12b   : > { %v1882_v8 = vsel %vm1862_vm7, %v1849_v21, %v1616_v46 }
 0x12d   : > { %v1614_v1 = vpop.permute.xlu0 %1613 }
 0x12e   : > { %v1334_v62 = vpop.permute.xlu1 %1333  ;;  %v1880_v7 = vsel %vm1862_vm7, %v1847_v11, %v1614_v1 }
 0x12f   : > { %v1686_v36 = vsel %vm1664_vm13, %v5847_v10, %v1334_v62 }
 0x131   : > { %v1649_v6 = vpop.permute.xlu0 %1648 }
 0x132   : > { %v1913_v32 = vsel %vm1895_vm6, %v1880_v7, %v1649_v6  ;;  %v1336_v13 = vpop.permute.xlu1 %1335 }
 0x133   : > { %4987 = vmatprep.mubr.msk.bf16.mxu0 %vm7542_vm2, %v1913_v32  ;;  %v1688_v41 = vsel %vm1664_vm13, %v5862_v31, %v1336_v13 }
 0x135   : > { %v1651_v9 = vpop.permute.xlu0 %1650 }
 0x136   : > { %v1915_v17 = vsel %vm1895_vm6, %v1882_v8, %v1651_v9  ;;  %v1417_v22 = vpop.permute.xlu1 %1416 }
 0x137   : > { %4988 = vmatmul.mubr.msk.bf16.gmra.mrb[16].mxu0 %vm7545_vm12, %v1915_v17  ;;  %v1721_v45 = vsel %vm1697_vm14, %v1688_v41, %v1417_v22  ;;  %vm7546_vm12 = vmmov %vm7542_vm2 }
 0x139   : > { %v1415_v5 = vpop.permute.xlu0 %1414 }
 0x13a   : > { %v1454_v26 = vpop.permute.xlu1 %1453  ;;  %v1719_v39 = vsel %vm1697_vm14, %v1686_v36, %v1415_v5 }
 0x13b   : > { %v1754_v49 = vsel %vm1730_vm15, %v1721_v45, %v1454_v26 }
 0x13d   : > { %v1452_v29 = vpop.permute.xlu0 %1451 }
 0x13e   : > { %v1501_v16 = vpop.permute.xlu1 %1500  ;;  %v1752_v2 = vsel %vm1730_vm15, %v1719_v39, %v1452_v29 }
 0x13f   : > { %v1787_v51 = vsel %vm1763_vm0, %v1754_v49, %v1501_v16 }
 0x141   : > { %v1499_v30 = vpop.permute.xlu0 %1498 }
 0x142   : > { %v1536_v28 = vpop.permute.xlu1 %1535  ;;  %v1785_v42 = vsel %vm1763_vm0, %v1752_v2, %v1499_v30 }
 0x143   : > { %v1820_v27 = vsel %vm1796_vm1, %v1787_v51, %v1536_v28 }
 0x145   : > { %v1534_v24 = vpop.permute.xlu0 %1533 }
 0x146   : > { %v1573_v34 = vpop.permute.xlu1 %1572  ;;  %v1818_v25 = vsel %vm1796_vm1, %v1785_v42, %v1534_v24 }
 0x147   : > { %v1853_v43 = vsel %vm1829_vm3, %v1820_v27, %v1573_v34 }
 0x149   : > { %v1571_v35 = vpop.permute.xlu0 %1570 }
 0x14a   : > { %v1620_v47 = vpop.permute.xlu1 %1619  ;;  %v1851_v48 = vsel %vm1829_vm3, %v1818_v25, %v1571_v35 }
 0x14b   : > { %v1886_v54 = vsel %vm1862_vm7, %v1853_v43, %v1620_v47 }
 0x14d   : > { %v1618_v19 = vpop.permute.xlu0 %1617 }
 0x14e   : > { %v1338_v44 = vpop.permute.xlu1 %1337  ;;  %v1884_v10 = vsel %vm1862_vm7, %v1851_v48, %v1618_v19  ;;  %v6192_v19 = vld [vmem:[%s7524_s2] ss:$0 sm:$0xff] }
 0x14f   : > { %v1690_v60 = vsel %vm1664_vm13, %v5910_v4, %v1338_v44 }
 0x151   : > { %v1653_v61 = vpop.permute.xlu0 %1652 }
 0x152   : > { %v1917_v31 = vsel %vm1895_vm6, %v1884_v10, %v1653_v61  ;;  %v1340_v52 = vpop.permute.xlu1 %1339 }
 0x153   : > { %4991 = vmatprep.mubr.msk.bf16.mxu0 %vm7542_vm2, %v1917_v31  ;;  %v1692_v11 = vsel %vm1664_vm13, %v5923_v18, %v1340_v52 }
 0x155   : > { %v1655_v55 = vpop.permute.xlu0 %1654 }
 0x156   : > { %v1919_v56 = vsel %vm1895_vm6, %v1886_v54, %v1655_v55  ;;  %v1421_v50 = vpop.permute.xlu1 %1420 }
 0x157   : > { %4992 = vmatmul.mubr.msk.bf16.gmra.mrb[20].mxu0 %vm7546_vm12, %v1919_v56  ;;  %v1725_v13 = vsel %vm1697_vm14, %v1692_v11, %v1421_v50  ;;  %vm7547_vm12 = vmmov %vm7542_vm2 }
 0x159   : > { %v1419_v33 = vpop.permute.xlu0 %1418 }
 0x15a   : > { %v1458_v57 = vpop.permute.xlu1 %1457  ;;  %v1723_v38 = vsel %vm1697_vm14, %v1690_v60, %v1419_v33 }
 0x15b   : > { %v1758_v21 = vsel %vm1730_vm15, %v1725_v13, %v1458_v57 }
 0x15d   : > { %v1456_v46 = vpop.permute.xlu0 %1455 }
 0x15e   : > { %v1505_v58 = vpop.permute.xlu1 %1504  ;;  %v1756_v12 = vsel %vm1730_vm15, %v1723_v38, %v1456_v46 }
 0x15f   : > { %v1791_v9 = vsel %vm1763_vm0, %v1758_v21, %v1505_v58 }
 0x161   : > { %v1503_v53 = vpop.permute.xlu0 %1502 }
 0x162   : > { %v1540_v59 = vpop.permute.xlu1 %1539  ;;  %v1789_v6 = vsel %vm1763_vm0, %v1756_v12, %v1503_v53 }
 0x163   : > { %v1824_v22 = vsel %vm1796_vm1, %v1791_v9, %v1540_v59 }
 0x165   : > { %v1538_v63 = vpop.permute.xlu0 %1537 }
 0x166   : > { %v1577_v1 = vpop.permute.xlu1 %1576  ;;  %v1822_v32 = vsel %vm1796_vm1, %v1789_v6, %v1538_v63 }
 0x167   : > { %v1857_v5 = vsel %vm1829_vm3, %v1824_v22, %v1577_v1 }
 0x169   : > { %v1575_v3 = vpop.permute.xlu0 %1574 }
 0x16a   : > { %v1624_v62 = vpop.permute.xlu1 %1623  ;;  %v1855_v20 = vsel %vm1829_vm3, %v1822_v32, %v1575_v3 }
 0x16b   : > { %v1890_v26 = vsel %vm1862_vm7, %v1857_v5, %v1624_v62 }
 0x16d   : > { %v1622_v7 = vpop.permute.xlu0 %1621 }
 0x16e   : > { %v1342_v15 = vpop.permute.xlu1 %1341  ;;  %v1888_v4 = vsel %vm1862_vm7, %v1855_v20, %v1622_v7 }
 0x16f   : > { %v1694_v42 = vsel %vm1664_vm13, %v5989_v14, %v1342_v15 }
 0x171   : > { %v1657_v8 = vpop.permute.xlu0 %1656 }
 0x172   : > { %v1921_v18 = vsel %vm1895_vm6, %v1888_v4, %v1657_v8  ;;  %v1344_v17 = vpop.permute.xlu1 %1343 }
 0x173   : > { %4995 = vmatprep.mubr.msk.bf16.mxu0 %vm7542_vm2, %v1921_v18  ;;  %v1696_v41 = vsel %vm1664_vm13, %v6014_v40, %v1344_v17  ;;  %v365_v18 = vld [vmem:[#allocation3 + $0x18] sm:$0x1] }
 0x174   : > { %v366_v22 = vsel %vm5985_vm4, 0, %v365_v18 }
 0x175   : > { %v1659_v29 = vpop.permute.xlu0 %1658  ;;  %367 = vst [vmem:[#allocation3 + $0x18] sm:$0x1] %v366_v22 }
 0x176   : > { %v1923_v16 = vsel %vm1895_vm6, %v1890_v26, %v1659_v29  ;;  %v1425_v30 = vpop.permute.xlu1 %1424 }
 0x177   : > { %4996 = vmatmul.mubr.msk.bf16.gmra.mrb[24].mxu0 %vm7547_vm12, %v1923_v16  ;;  %v1729_v44 = vsel %vm1697_vm14, %v1696_v41, %v1425_v30 }
 0x179   : > { %v1423_v28 = vpop.permute.xlu0 %1422 }
 0x17a   : > { %v1462_v24 = vpop.permute.xlu1 %1461  ;;  %v1727_v45 = vsel %vm1697_vm14, %v1694_v42, %v1423_v28 }
 0x17b   : > { %v1762_v48 = vsel %vm1730_vm15, %v1729_v44, %v1462_v24 }
 0x17d   : > { %v1460_v34 = vpop.permute.xlu0 %1459 }
 0x17e   : > { %v1509_v35 = vpop.permute.xlu1 %1508  ;;  %v1760_v40 = vsel %vm1730_vm15, %v1727_v45, %v1460_v34 }
 0x17f   : > { %v1795_v61 = vsel %vm1763_vm0, %v1762_v48, %v1509_v35 }
 0x181   : > { %v1507_v47 = vpop.permute.xlu0 %1506 }
 0x182   : > { %v1544_v36 = vpop.permute.xlu1 %1543  ;;  %v1793_v52 = vsel %vm1763_vm0, %v1760_v40, %v1507_v47 }
 0x183   : > { %v1828_v14 = vsel %vm1796_vm1, %v1795_v61, %v1544_v36 }
 0x185   : > { %v1542_v39 = vpop.permute.xlu0 %1541 }
 0x186   : > { %v1581_v2 = vpop.permute.xlu1 %1580  ;;  %v1826_v54 = vsel %vm1796_vm1, %v1793_v52, %v1542_v39  ;;  %vm7548_vm1 = vcmask 293888  }
 0x187   : > { %v1861_v57 = vsel %vm1829_vm3, %v1828_v14, %v1581_v2 }
 0x189   : > { %v1579_v25 = vpop.permute.xlu0 %1578 }
 0x18a   : > { %v4973_v49 = vpop.f32.mrb[0].mxu0  ;;  %v1628_v10 = vpop.permute.xlu1 %1627  ;;  %v1859_v53 = vsel %vm1829_vm3, %v1826_v54, %v1579_v25 }
 0x18b   : > { %v2034_v51 = vadd.f32 %v4973_v49, %v6192_v19  ;;  %v2025_v31 = vpop.f32.mrb[1].mxu0  ;;  %v1894_v38 = vsel %vm1862_vm7, %v1861_v57, %v1628_v10  ;;  %v417_v10 = vld [vmem:[#allocation3 + $0x14] sm:$0x1] }
 0x18c   : > { %v2026_v27 = vadd.f32 %v6192_v19, %v2025_v31  ;;  %v4974_v43 = vpop.f32.mrb[2].mxu0  ;;  %v362_v31 = vld [vmem:[#allocation3 + $0xc] sm:$0x1] }
 0x18d   : > { %vm2154_vm13 = vcmp.ge.f32.partialorder %v2034_v51, 0.0  ;;  %v2186_v55 = vmul.f32 0.2, %v2034_v51  ;;  %v2037_v56 = vadd.f32 %v4974_v43, %v6192_v19  ;;  %v2028_v50 = vpop.f32.mrb[3].mxu0  ;;  %v1626_v33 = vpop.permute.xlu0 %1625  ;;  %v363_v52 = vsel %vm5985_vm4, 0, %v362_v31 }
 0x18e   : > { %vm2152_vm15 = vcmp.ge.f32.partialorder %v2026_v27, 0.0  ;;  %v2184_v46 = vmul.f32 0.2, %v2026_v27  ;;  %v2029_v58 = vadd.f32 %v6192_v19, %v2028_v50  ;;  %v1663_v3 = vpop.permute.xlu1 %1662  ;;  %v1892_v11 = vsel %vm1862_vm7, %v1859_v53, %v1626_v33  ;;  %vm7549_vm7 = vmmov %vm7548_vm1  ;;  %364 = vst [vmem:[#allocation3 + $0xc] sm:$0x1] %v363_v52 }
 0x18f   : > { %vm2155_vm2 = vcmp.ge.f32.partialorder %v2037_v56, 0.0  ;;  %v2187_v59 = vmul.f32 0.2, %v2037_v56  ;;  %v6210_v63 = vsel %vm2154_vm13, %v2034_v51, %v2186_v55  ;;  %v1927_v13 = vsel %vm1895_vm6, %v1894_v38, %v1663_v3  ;;  %v420_v43 = vld [vmem:[#allocation3 + $0x20] sm:$0x1] }
 0x190   : > { %vm2153_vm12 = vcmp.ge.f32.partialorder %v2029_v58, 0.0  ;;  %v2185_v1 = vmul.f32 0.2, %v2029_v58  ;;  %v2250_v62 = vmul.f32 %v6210_v63, %v6210_v63  ;;  %v6214_v60 = vsel %vm2152_vm15, %v2026_v27, %v2184_v46  ;;  %v371_v55 = vld [vmem:[#allocation3 + $0x30] sm:$0x1] }
 0x191   : > { %v1661_v12 = vpop.permute.xlu0 %1660  ;;  %v2248_v32 = vmul.f32 %v6214_v60, %v6214_v60  ;;  %v6229_v21 = vsel %vm2155_vm2, %v2037_v56, %v2187_v59  ;;  %v418_v51 = vsel %vm5995_vm8, 0, %v417_v10  ;;  %v421_v54 = vsel %vm5995_vm8, 0, %v420_v43 }
 0x192   : > { %v1925_v7 = vsel %vm1895_vm6, %v1892_v11, %v1661_v12  ;;  %v2286_v6 = vsel %vm1697_vm14, %v2250_v62, 0.0  ;;  %v6220_v15 = vsel %vm2153_vm12, %v2029_v58, %v2185_v1  ;;  %v2251_v9 = vmul.f32 %v6229_v21, %v6229_v21  ;;  %419 = vst [vmem:[#allocation3 + $0x14] sm:$0x1] %v418_v51  ;;  %422 = vst [vmem:[#allocation3 + $0x20] sm:$0x1] %v421_v54 }
 0x193   : > { %2287 = vadd.xlane.f32.xlu0 %v2286_v6  ;;  %4999 = vmatprep.mubr.msk.bf16.mxu0 %vm7548_vm1, %v1925_v7  ;;  %v2249_v20 = vmul.f32 %v6220_v15, %v6220_v15  ;;  %v2280_v8 = vsel %vm1697_vm14, %v2248_v32, 0.0  ;;  %v372_v56 = vsel %vm5985_vm4, 0, %v371_v55 }
 0x194   : > { %5000 = vmatmul.mubr.msk.bf16.gmra.mrb[28].mxu0 %vm7549_vm7, %v1927_v13  ;;  %v2289_v17 = vsel %vm1697_vm14, %v2251_v9, 0.0  ;;  %373 = vst [vmem:[#allocation3 + $0x30] sm:$0x1] %v372_v56 }
 0x195   : > { %v2283_v4 = vsel %vm1697_vm14, %v2249_v20, 0.0 }
 0x196   : > { %2284 = vadd.xlane.f32.xlu1 %v2283_v4 }
 0x197   : > { %2281 = vadd.xlane.f32.xlu0 %v2280_v8 }
 0x19b   : > { %2290 = vadd.xlane.f32.xlu0 %v2289_v17  ;;  %v426_v17 = vld [vmem:[#allocation3 + $0x38] sm:$0x1] }
 0x19c   : > { %v427_v22 = vsel %vm5995_vm8, 0, %v426_v17 }
 0x19d   : > { %428 = vst [vmem:[#allocation3 + $0x38] sm:$0x1] %v427_v22 }
 0x1aa   : > { %v4977_v5 = vpop.f32.mrb[4].mxu0 }
 0x1ab   : > { %v2050_v26 = vadd.f32 %v4977_v5, %v6192_v19  ;;  %v2041_v29 = vpop.f32.mrb[5].mxu0 }
 0x1ac   : > { %v2042_v16 = vadd.f32 %v6192_v19, %v2041_v29  ;;  %v4978_v30 = vpop.f32.mrb[6].mxu0 }
 0x1ad   : > { %vm2158_vm13 = vcmp.ge.f32.partialorder %v2050_v26, 0.0  ;;  %v2190_v28 = vmul.f32 0.2, %v2050_v26  ;;  %v2053_v24 = vadd.f32 %v4978_v30, %v6192_v19  ;;  %v2044_v34 = vpop.f32.mrb[7].mxu0  ;;  %v423_v30 = vld [vmem:[#allocation3 + $0x2c] sm:$0x1] }
 0x1ae   : > { %vm2156_vm15 = vcmp.ge.f32.partialorder %v2042_v16, 0.0  ;;  %v2188_v35 = vmul.f32 0.2, %v2042_v16  ;;  %v2045_v47 = vadd.f32 %v6192_v19, %v2044_v34 }
 0x1af   : > { %vm2159_vm2 = vcmp.ge.f32.partialorder %v2053_v24, 0.0  ;;  %v2191_v36 = vmul.f32 0.2, %v2053_v24  ;;  %v6243_v39 = vsel %vm2158_vm13, %v2050_v26, %v2190_v28  ;;  %v368_v26 = vld [vmem:[#allocation3 + $0x24] sm:$0x1]  ;;  %v424_v28 = vsel %vm5995_vm8, 0, %v423_v30 }
 0x1b0   : > { %vm2157_vm12 = vcmp.ge.f32.partialorder %v2045_v47, 0.0  ;;  %v2189_v41 = vmul.f32 0.2, %v2045_v47  ;;  %v2254_v2 = vmul.f32 %v6243_v39, %v6243_v39  ;;  %v6247_v42 = vsel %vm2156_vm15, %v2042_v16, %v2188_v35  ;;  %425 = vst [vmem:[#allocation3 + $0x2c] sm:$0x1] %v424_v28 }
 0x1b1   : > { %v6249_v44 = vsel %vm2159_vm2, %v2053_v24, %v2191_v36  ;;  %v2252_v48 = vmul.f32 %v6247_v42, %v6247_v42  ;;  %v369_v29 = vsel %vm5985_vm4, 0, %v368_v26  ;;  %v377_v24 = vld [vmem:[#allocation3 + $0x48] sm:$0x1] }
 0x1b2   : > { %v2298_v25 = vsel %vm1697_vm14, %v2254_v2, 0.0  ;;  %v2255_v45 = vmul.f32 %v6249_v44, %v6249_v44  ;;  %v6256_v49 = vsel %vm2157_vm12, %v2045_v47, %v2189_v41  ;;  %370 = vst [vmem:[#allocation3 + $0x24] sm:$0x1] %v369_v29  ;;  %v378_v34 = vsel %vm5985_vm4, 0, %v377_v24 }
 0x1b3   : > { %2299 = vadd.xlane.f32.xlu1 %v2298_v25  ;;  %v2253_v61 = vmul.f32 %v6256_v49, %v6256_v49  ;;  %v2292_v14 = vsel %vm1697_vm14, %v2252_v48, 0.0  ;;  %379 = vst [vmem:[#allocation3 + $0x48] sm:$0x1] %v378_v34 }
 0x1b4   : > { %v2301_v40 = vsel %vm1697_vm14, %v2255_v45, 0.0 }
 0x1b5   : > { %2302 = vadd.xlane.f32.xlu0 %v2301_v40  ;;  %v2295_v27 = vsel %vm1697_vm14, %v2253_v61, 0.0 }
 0x1b7   : > { %2293 = vadd.xlane.f32.xlu1 %v2292_v14 }
 0x1b9   : > { %2296 = vadd.xlane.f32.xlu0 %v2295_v27 }
 0x1ca   : > { %v4981_v50 = vpop.f32.mrb[8].mxu0 }
 0x1cb   : > { %v2066_v33 = vadd.f32 %v4981_v50, %v6192_v19  ;;  %v2057_v57 = vpop.f32.mrb[9].mxu0 }
 0x1cc   : > { %v2058_v46 = vadd.f32 %v6192_v19, %v2057_v57  ;;  %v4982_v58 = vpop.f32.mrb[10].mxu0  ;;  %v432_v57 = vld [vmem:[#allocation3 + $0x50] sm:$0x1] }
 0x1cd   : > { %vm2162_vm1 = vcmp.ge.f32.partialorder %v2066_v33, 0.0  ;;  %v2194_v53 = vmul.f32 0.2, %v2066_v33  ;;  %v2069_v59 = vadd.f32 %v4982_v58, %v6192_v19  ;;  %v2060_v1 = vpop.f32.mrb[11].mxu0 }
 0x1ce   : > { %vm2160_vm7 = vcmp.ge.f32.partialorder %v2058_v46, 0.0  ;;  %v2192_v3 = vmul.f32 0.2, %v2058_v46  ;;  %v2061_v62 = vadd.f32 %v6192_v19, %v2060_v1 }
 0x1cf   : > { %vm2163_vm13 = vcmp.ge.f32.partialorder %v2069_v59, 0.0  ;;  %v2195_v38 = vmul.f32 0.2, %v2069_v59  ;;  %v6275_v11 = vsel %vm2162_vm1, %v2066_v33, %v2194_v53  ;;  %v374_v53 = vld [vmem:[#allocation3 + $0x3c] sm:$0x1] }
 0x1d0   : > { %vm2161_vm15 = vcmp.ge.f32.partialorder %v2061_v62, 0.0  ;;  %v2193_v12 = vmul.f32 0.2, %v2061_v62  ;;  %v2258_v7 = vmul.f32 %v6275_v11, %v6275_v11  ;;  %v6279_v6 = vsel %vm2160_vm7, %v2058_v46, %v2192_v3  ;;  %v429_v3 = vld [vmem:[#allocation3 + $0x44] sm:$0x1] }
 0x1d1   : > { %v6281_v32 = vsel %vm2163_vm13, %v2069_v59, %v2195_v38  ;;  %v2256_v4 = vmul.f32 %v6279_v6, %v6279_v6  ;;  %v433_v46 = vsel %vm5995_vm8, 0, %v432_v57  ;;  %v375_v59 = vsel %vm5985_vm4, 0, %v374_v53  ;;  %v383_v38 = vld [vmem:[#allocation3 + $0x60] sm:$0x1] }
 0x1d2   : > { %v2310_v13 = vsel %vm1697_vm14, %v2258_v7, 0.0  ;;  %v2259_v20 = vmul.f32 %v6281_v32, %v6281_v32  ;;  %v6288_v8 = vsel %vm2161_vm15, %v2061_v62, %v2193_v12  ;;  %434 = vst [vmem:[#allocation3 + $0x50] sm:$0x1] %v433_v46  ;;  %376 = vst [vmem:[#allocation3 + $0x3c] sm:$0x1] %v375_v59  ;;  %v430_v62 = vsel %vm5995_vm8, 0, %v429_v3 }
 0x1d3   : > { %2311 = vadd.xlane.f32.xlu1 %v2310_v13  ;;  %v2257_v18 = vmul.f32 %v6288_v8, %v6288_v8  ;;  %v2304_v5 = vsel %vm1697_vm14, %v2256_v4, 0.0  ;;  %431 = vst [vmem:[#allocation3 + $0x44] sm:$0x1] %v430_v62  ;;  %v384_v12 = vsel %vm5985_vm4, 0, %v383_v38  ;;  %v389_v46 = vld [vmem:[#allocation3 + $0x78] sm:$0x1] }
 0x1d4   : > { %v2313_v9 = vsel %vm1697_vm14, %v2259_v20, 0.0  ;;  %385 = vst [vmem:[#allocation3 + $0x60] sm:$0x1] %v384_v12  ;;  %v390_v59 = vsel %vm5985_vm4, 0, %v389_v46 }
 0x1d5   : > { %2314 = vadd.xlane.f32.xlu0 %v2313_v9  ;;  %v2307_v16 = vsel %vm1697_vm14, %v2257_v18, 0.0  ;;  %391 = vst [vmem:[#allocation3 + $0x78] sm:$0x1] %v390_v59 }
 0x1d7   : > { %2305 = vadd.xlane.f32.xlu1 %v2304_v5 }
 0x1d9   : > { %2308 = vadd.xlane.f32.xlu0 %v2307_v16 }
 0x1ea   : > { %v4985_v35 = vpop.f32.mrb[12].mxu0 }
 0x1eb   : > { %v2082_v47 = vadd.f32 %v4985_v35, %v6192_v19  ;;  %v2073_v36 = vpop.f32.mrb[13].mxu0  ;;  %v6347_v35 = vpop.permute.xlu1 %3411 }
 0x1ec   : > { %v2074_v41 = vadd.f32 %v6192_v19, %v2073_v36  ;;  %v4986_v2 = vpop.f32.mrb[14].mxu0 }
 0x1ed   : > { %vm2166_vm2 = vcmp.ge.f32.partialorder %v2082_v47, 0.0  ;;  %v2198_v25 = vmul.f32 0.2, %v2082_v47  ;;  %v2085_v45 = vadd.f32 %v4986_v2, %v6192_v19  ;;  %v2076_v48 = vpop.f32.mrb[15].mxu0 }
 0x1ee   : > { %vm2164_vm12 = vcmp.ge.f32.partialorder %v2074_v41, 0.0  ;;  %v2196_v10 = vmul.f32 0.2, %v2074_v41  ;;  %v2077_v40 = vadd.f32 %v6192_v19, %v2076_v48  ;;  %v438_v48 = vld [vmem:[#allocation3 + $0x68] sm:$0x1] }
 0x1ef   : > { %vm2167_vm1 = vcmp.ge.f32.partialorder %v2085_v45, 0.0  ;;  %v2199_v61 = vmul.f32 0.2, %v2085_v45  ;;  %v6307_v51 = vsel %vm2166_vm2, %v2082_v47, %v2198_v25 }
 0x1f0   : > { %vm2165_vm7 = vcmp.ge.f32.partialorder %v2077_v40, 0.0  ;;  %v2197_v31 = vmul.f32 0.2, %v2077_v40  ;;  %v2262_v52 = vmul.f32 %v6307_v51, %v6307_v51  ;;  %v6311_v14 = vsel %vm2164_vm12, %v2074_v41, %v2196_v10 }
 0x1f1   : > { %v6313_v27 = vsel %vm2167_vm1, %v2085_v45, %v2199_v61  ;;  %v2260_v55 = vmul.f32 %v6311_v14, %v6311_v14  ;;  %v439_v10 = vsel %vm5995_vm8, 0, %v438_v48  ;;  %v380_v61 = vld [vmem:[#allocation3 + $0x54] sm:$0x1] }
 0x1f2   : > { %v2322_v43 = vsel %vm1697_vm14, %v2262_v52, 0.0  ;;  %v2263_v54 = vmul.f32 %v6313_v27, %v6313_v27  ;;  %v6320_v56 = vsel %vm2165_vm7, %v2077_v40, %v2197_v31  ;;  %440 = vst [vmem:[#allocation3 + $0x68] sm:$0x1] %v439_v10  ;;  %v6362_v31 = vpop.permute.xlu1 %3491  ;;  %v381_v52 = vsel %vm5985_vm4, 0, %v380_v61 }
 0x1f3   : > { %2323 = vadd.xlane.f32.xlu1 %v2322_v43  ;;  %v2261_v33 = vmul.f32 %v6320_v56, %v6320_v56  ;;  %v2316_v58 = vsel %vm1697_vm14, %v2260_v55, 0.0  ;;  %382 = vst [vmem:[#allocation3 + $0x54] sm:$0x1] %v381_v52 }
 0x1f4   : > { %v2325_v50 = vsel %vm1697_vm14, %v2263_v54, 0.0  ;;  %v435_v54 = vld [vmem:[#allocation3 + $0x5c] sm:$0x1] }
 0x1f5   : > { %2326 = vadd.xlane.f32.xlu0 %v2325_v50  ;;  %v2319_v1 = vsel %vm1697_vm14, %v2261_v33, 0.0  ;;  %v436_v55 = vsel %vm5995_vm8, 0, %v435_v54 }
 0x1f6   : > { %437 = vst [vmem:[#allocation3 + $0x5c] sm:$0x1] %v436_v55  ;;  %v6369_v50 = vpop.permute.xlu1 %3677 }
 0x1f7   : > { %2317 = vadd.xlane.f32.xlu1 %v2316_v58 }
 0x1f9   : > { %2320 = vadd.xlane.f32.xlu0 %v2319_v1 }
 0x20a   : > { %v4989_v7 = vpop.f32.mrb[16].mxu0 }
 0x20b   : > { %v2098_v13 = vadd.f32 %v4989_v7, %v6192_v19  ;;  %v2089_v20 = vpop.f32.mrb[17].mxu0 }
 0x20c   : > { %v2090_v4 = vadd.f32 %v6192_v19, %v2089_v20  ;;  %v4990_v9 = vpop.f32.mrb[18].mxu0 }
 0x20d   : > { %vm2170_vm13 = vcmp.ge.f32.partialorder %v2098_v13, 0.0  ;;  %v2202_v18 = vmul.f32 0.2, %v2098_v13  ;;  %v2101_v17 = vadd.f32 %v4990_v9, %v6192_v19  ;;  %v2092_v22 = vpop.f32.mrb[19].mxu0 }
 0x20e   : > { %vm2168_vm15 = vcmp.ge.f32.partialorder %v2090_v4, 0.0  ;;  %v2200_v5 = vmul.f32 0.2, %v2090_v4  ;;  %v2093_v26 = vadd.f32 %v6192_v19, %v2092_v22 }
 0x20f   : > { %vm2171_vm2 = vcmp.ge.f32.partialorder %v2101_v17, 0.0  ;;  %v2203_v29 = vmul.f32 0.2, %v2101_v17  ;;  %v6339_v16 = vsel %vm2170_vm13, %v2098_v13, %v2202_v18 }
 0x210   : > { %vm2169_vm12 = vcmp.ge.f32.partialorder %v2093_v26, 0.0  ;;  %v2201_v30 = vmul.f32 0.2, %v2093_v26  ;;  %v2266_v28 = vmul.f32 %v6339_v16, %v6339_v16  ;;  %v6343_v24 = vsel %vm2168_vm15, %v2090_v4, %v2200_v5 }
 0x211   : > { %v6345_v34 = vsel %vm2171_vm2, %v2101_v17, %v2203_v29  ;;  %v2264_v41 = vmul.f32 %v6343_v24, %v6343_v24  ;;  %vm7550_vm2 = vcmask 60416  }
 0x212   : > { %v2334_v47 = vsel %vm1697_vm14, %v2266_v28, 0.0  ;;  %v2267_v36 = vmul.f32 %v6345_v34, %v6345_v34  ;;  %v6354_v2 = vsel %vm2169_vm12, %v2093_v26, %v2201_v30  ;;  %vm6401_vm12 = vmand %vm7550_vm2, %vm292_vm5 }
 0x213   : > { %2335 = vadd.xlane.f32.xlu1 %v2334_v47  ;;  %v2265_v45 = vmul.f32 %v6354_v2, %v6354_v2  ;;  %v2328_v40 = vsel %vm1697_vm14, %v2264_v41, 0.0  ;;  %vm7553_vm5 = vmmov %vm7550_vm2 }
 0x214   : > { %v2337_v25 = vsel %vm1697_vm14, %v2267_v36, 0.0 }
 0x215   : > { %2338 = vadd.xlane.f32.xlu0 %v2337_v25  ;;  %v2331_v43 = vsel %vm1697_vm14, %v2265_v45, 0.0 }
 0x217   : > { %2329 = vadd.xlane.f32.xlu1 %v2328_v40 }
 0x219   : > { %2332 = vadd.xlane.f32.xlu0 %v2331_v43 }
 0x220   : > { %v2288_v33 = vpop.xlane.xlu0 %2287 }
 0x221   : > { %v2379_v57 = vmul.f32 0.125, %v2288_v33 }
 0x223   : > { %v2411_v58 = vadd.f32 1e-08, %v2379_v57  ;;  %v2285_v53 = vpop.xlane.xlu1 %2284 }
 0x224   : > { %v2378_v1 = vmul.f32 0.125, %v2285_v53  ;;  %v2282_v3 = vpop.xlane.xlu0 %2281 }
 0x225   : > { %5148 = vrsqrt.f32 %v2411_v58  ;;  %v2377_v62 = vmul.f32 0.125, %v2282_v3 }
 0x226   : > { %v2410_v38 = vadd.f32 1e-08, %v2378_v1 }
 0x227   : > { %v2409_v12 = vadd.f32 1e-08, %v2377_v62 }
 0x228   : > { %5150 = vrsqrt.f32 %v2410_v38  ;;  %v2291_v7 = vpop.xlane.xlu0 %2290 }
 0x229   : > { %5152 = vrsqrt.f32 %v2409_v12  ;;  %v2380_v13 = vmul.f32 0.125, %v2291_v7 }
 0x22a   : > { %v4993_v20 = vpop.f32.mrb[20].mxu0 }
 0x22b   : > { %v2412_v4 = vadd.f32 1e-08, %v2380_v13  ;;  %v2114_v9 = vadd.f32 %v4993_v20, %v6192_v19  ;;  %v2105_v18 = vpop.f32.mrb[21].mxu0 }
 0x22c   : > { %v2106_v17 = vadd.f32 %v6192_v19, %v2105_v18  ;;  %v4994_v22 = vpop.f32.mrb[22].mxu0 }
 0x22d   : > { %5154 = vrsqrt.f32 %v2412_v4  ;;  %vm2174_vm1 = vcmp.ge.f32.partialorder %v2114_v9, 0.0  ;;  %v2206_v5 = vmul.f32 0.2, %v2114_v9  ;;  %v2117_v26 = vadd.f32 %v4994_v22, %v6192_v19  ;;  %v2108_v29 = vpop.f32.mrb[23].mxu0 }
 0x22e   : > { %vm2172_vm7 = vcmp.ge.f32.partialorder %v2106_v17, 0.0  ;;  %v2204_v30 = vmul.f32 0.2, %v2106_v17  ;;  %v2109_v28 = vadd.f32 %v6192_v19, %v2108_v29 }
 0x22f   : > { %v5149_v47 = vpop.eup %5148  ;;  %vm2175_vm13 = vcmp.ge.f32.partialorder %v2117_v26, 0.0  ;;  %v2207_v36 = vmul.f32 0.2, %v2117_v26  ;;  %v6377_v41 = vsel %vm2174_vm1, %v2114_v9, %v2206_v5  ;;  %vm7554_vm1 = vmmov %vm7550_vm2 }
 0x230   : > { %v2475_v25 = vmul.f32 %v5149_v47, %v6210_v63  ;;  %vm2173_vm15 = vcmp.ge.f32.partialorder %v2109_v28, 0.0  ;;  %v2205_v45 = vmul.f32 0.2, %v2109_v28  ;;  %v2270_v48 = vmul.f32 %v6377_v41, %v6377_v41 }
 0x231   : > { %v6382_v10 = vsel %vm2175_vm13, %v2117_v26, %v2207_v36  ;;  %v6384_v40 = vsel %vm2172_vm7, %v2106_v17, %v2204_v30  ;;  %v2928_v26 = vld [vmem:[#allocation3 + $0x14] sm:$0x1]  ;;  %v2924_v36 = vld [vmem:[#allocation3 + $0xc] sm:$0xf] }
 0x232   : > { %v5151_v61 = vpop.eup %5150  ;;  %v4895_v52 = vpack.c.bf16 %v2475_v25, %v2475_v25  ;;  %v2346_v43 = vsel %vm1697_vm14, %v2270_v48, 0.0  ;;  %v2271_v54 = vmul.f32 %v6382_v10, %v6382_v10  ;;  %v2268_v55 = vmul.f32 %v6384_v40, %v6384_v40 }
 0x233   : > { %v5153_v63 = vpop.eup %5152  ;;  %v2474_v33 = vmul.f32 %v5151_v61, %v6220_v15  ;;  %2347 = vadd.xlane.f32.xlu1 %v2346_v43  ;;  %v6392_v57 = vsel %vm2173_vm15, %v2109_v28, %v2205_v45  ;;  %v444_v45 = vld [vmem:[#allocation3 + $0x80] sm:$0x1] }
 0x234   : > { %v2619_v46 = vshrl.u32 %v4895_v52, 16  ;;  %v2473_v58 = vmul.f32 %v5153_v63, %v6214_v60  ;;  %v2349_v53 = vsel %vm1697_vm14, %v2271_v54, 0.0  ;;  %v2269_v1 = vmul.f32 %v6392_v57, %v6392_v57  ;;  %v2931_v60 = vld [vmem:[#allocation3 + $0x18] sm:$0xf]  ;;  %v386_v54 = vld [vmem:[#allocation3 + $0x6c] sm:$0x1] }
 0x235   : > { %v4894_v59 = vpack.c.bf16 %v2474_v33, %v2474_v33  ;;  %2350 = vadd.xlane.f32.xlu0 %v2349_v53  ;;  %v2622_v62 = vshll.u32 %v4895_v52, 16  ;;  %v2340_v12 = vsel %vm1697_vm14, %v2268_v55, 0.0  ;;  %v445_v52 = vsel %vm5995_vm8, 0, %v444_v45  ;;  %v441_v53 = vld [vmem:[#allocation3 + $0x74] sm:$0x1] }
 0x236   : > { %v2621_v3 = vrot.slane %v2619_v46, 7  ;;  %v4893_v38 = vpack.c.bf16 %v2473_v58, %v2473_v58  ;;  %v2343_v9 = vsel %vm1697_vm14, %v2269_v1, 0.0  ;;  %446 = vst [vmem:[#allocation3 + $0x80] sm:$0x1] %v445_v52  ;;  %v387_v33 = vsel %vm5985_vm4, 0, %v386_v54 }
 0x237   : > { %v5155_v7 = vpop.eup %5154  ;;  %v2610_v13 = vshrl.u32 %v4894_v59, 16  ;;  %2341 = vadd.xlane.f32.xlu1 %v2340_v12  ;;  %v2613_v17 = vshll.u32 %v4894_v59, 16  ;;  %388 = vst [vmem:[#allocation3 + $0x6c] sm:$0x1] %v387_v33  ;;  %v2935_v59 = vld [vmem:[#allocation3 + $0x20] sm:$0x1] }
 0x238   : > { %v2624_v20 = vor.u32 %v2622_v62, %v2621_v3  ;;  %v2602_v4 = vshrl.u32 %v4893_v38, 16  ;;  %v2476_v22 = vmul.f32 %v5155_v7, %v6229_v21  ;;  %v2605_v30 = vshll.u32 %v4893_v38, 16 }
 0x239   : > { %v2612_v18 = vrot.slane %v2610_v13, 7  ;;  %2344 = vadd.xlane.f32.xlu0 %v2343_v9  ;;  %v442_v62 = vsel %vm5995_vm8, 0, %v441_v53  ;;  %v2625_v38 = vrot.slane %v2621_v3, 4 }
 0x23a   : > { %v2932_v5 = vsel %vm6401_vm12, %v2624_v20, %v2931_v60  ;;  %v2604_v29 = vrot.slane %v2602_v4, 7  ;;  %v4896_v25 = vpack.c.bf16 %v2476_v22, %v2476_v22  ;;  %443 = vst [vmem:[#allocation3 + $0x74] sm:$0x1] %v442_v62  ;;  %v395_v20 = vld [vmem:[#allocation3 + $0x90] sm:$0x1] }
 0x23b   : > { %2933 = vst [vmem:[#allocation3 + $0x18] sm:$0xf] %v2932_v5  ;;  %v2615_v28 = vor.u32 %v2613_v17, %v2612_v18  ;;  %v2617_v47 = vrot.slane %v2612_v18, 4  ;;  %v396_v3 = vsel %vm5985_vm4, 0, %v395_v20 }
 0x23c   : > { %v2607_v48 = vor.u32 %v2605_v30, %v2604_v29  ;;  %v2608_v61 = vrot.slane %v2604_v29, 4  ;;  %v2627_v43 = vshrl.u32 %v4896_v25, 16  ;;  %v2630_v58 = vshll.u32 %v4896_v25, 16  ;;  %397 = vst [vmem:[#allocation3 + $0x90] sm:$0x1] %v396_v3 }
 0x23d   : > { %v2929_v21 = vsel %vm5985_vm4, %v2617_v47, %v2928_v26 }
 0x23e   : > { %2930 = vst [vmem:[#allocation3 + $0x14] sm:$0x1] %v2929_v21  ;;  %v2616_v55 = vsel %vm5420_vm9, %v2608_v61, %v2615_v28  ;;  %v2925_v63 = vsel %vm6401_vm12, %v2607_v48, %v2924_v36  ;;  %v2629_v46 = vrot.slane %v2627_v43, 7 }
 0x23f   : > { %2926 = vst [vmem:[#allocation3 + $0xc] sm:$0xf] %v2925_v63  ;;  %2927 = vst.msk [vmem:[#allocation3 + $0x10] sm:$0xf] %vm7553_vm5, %v2616_v55 }
 0x240   : > { %v2300_v1 = vpop.xlane.xlu1 %2299  ;;  %v2632_v12 = vor.u32 %v2630_v58, %v2629_v46  ;;  %v2634_v7 = vrot.slane %v2629_v46, 4  ;;  %vm7555_vm5 = vmmov %vm7554_vm1 }
 0x241   : > { %v2383_v60 = vmul.f32 0.125, %v2300_v1 }
 0x242   : > { %v2303_v13 = vpop.xlane.xlu0 %2302  ;;  %v2633_v4 = vsel %vm5420_vm9, %v2625_v38, %v2632_v12  ;;  %v2936_v9 = vsel %vm5985_vm4, %v2634_v7, %v2935_v59 }
 0x243   : > { %v2415_v18 = vadd.f32 1e-08, %v2383_v60  ;;  %v2384_v17 = vmul.f32 0.125, %v2303_v13  ;;  %2934 = vst.msk [vmem:[#allocation3 + $0x1c] sm:$0xf] %vm7554_vm1, %v2633_v4 }
 0x244   : > { %2937 = vst [vmem:[#allocation3 + $0x20] sm:$0x1] %v2936_v9  ;;  %v2294_v22 = vpop.xlane.xlu1 %2293 }
 0x245   : > { %5156 = vrsqrt.f32 %v2415_v18  ;;  %v2416_v5 = vadd.f32 1e-08, %v2384_v17  ;;  %v2381_v26 = vmul.f32 0.125, %v2294_v22 }
 0x246   : > { %v2297_v29 = vpop.xlane.xlu0 %2296 }
 0x247   : > { %5158 = vrsqrt.f32 %v2416_v5  ;;  %v2413_v30 = vadd.f32 1e-08, %v2381_v26  ;;  %v2382_v28 = vmul.f32 0.125, %v2297_v29 }
 0x249   : > { %5160 = vrsqrt.f32 %v2413_v30  ;;  %v2414_v47 = vadd.f32 1e-08, %v2382_v28 }
 0x24a   : > { %v4997_v36 = vpop.f32.mrb[24].mxu0 }
 0x24b   : > { %5162 = vrsqrt.f32 %v2414_v47  ;;  %v2130_v25 = vadd.f32 %v4997_v36, %v6192_v19  ;;  %v2121_v45 = vpop.f32.mrb[25].mxu0  ;;  %v2945_v47 = vld [vmem:[#allocation3 + $0x30] sm:$0xf] }
 0x24c   : > { %v2122_v48 = vadd.f32 %v6192_v19, %v2121_v45  ;;  %v4998_v61 = vpop.f32.mrb[26].mxu0 }
 0x24d   : > { %vm2178_vm7 = vcmp.ge.f32.partialorder %v2130_v25, 0.0  ;;  %v2210_v52 = vmul.f32 0.2, %v2130_v25  ;;  %v2133_v21 = vadd.f32 %v4998_v61, %v6192_v19  ;;  %v2124_v43 = vpop.f32.mrb[27].mxu0 }
 0x24e   : > { %vm2176_vm13 = vcmp.ge.f32.partialorder %v2122_v48, 0.0  ;;  %v2208_v54 = vmul.f32 0.2, %v2122_v48  ;;  %v2125_v55 = vadd.f32 %v6192_v19, %v2124_v43 }
 0x24f   : > { %v5157_v63 = vpop.eup %5156  ;;  %vm2179_vm15 = vcmp.ge.f32.partialorder %v2133_v21, 0.0  ;;  %v2211_v33 = vmul.f32 0.2, %v2133_v21  ;;  %v6433_v46 = vsel %vm2178_vm7, %v2130_v25, %v2210_v52  ;;  %v2949_v52 = vld [vmem:[#allocation3 + $0x38] sm:$0x1] }
 0x250   : > { %v2479_v58 = vmul.f32 %v5157_v63, %v6243_v39  ;;  %vm2177_vm2 = vcmp.ge.f32.partialorder %v2125_v55, 0.0  ;;  %v2209_v53 = vmul.f32 0.2, %v2125_v55  ;;  %v2274_v59 = vmul.f32 %v6433_v46, %v6433_v46 }
 0x251   : > { %v5159_v1 = vpop.eup %5158  ;;  %v6438_v62 = vsel %vm2179_vm15, %v2133_v21, %v2211_v33  ;;  %v6440_v38 = vsel %vm2176_vm13, %v2122_v48, %v2208_v54 }
 0x252   : > { %v4899_v12 = vpack.c.bf16 %v2479_v58, %v2479_v58  ;;  %v2480_v7 = vmul.f32 %v5159_v1, %v6249_v44  ;;  %v2358_v60 = vsel %vm1697_vm14, %v2274_v59, 0.0  ;;  %v2275_v13 = vmul.f32 %v6438_v62, %v6438_v62  ;;  %v450_v59 = vld [vmem:[#allocation3 + $0x98] sm:$0x1] }
 0x253   : > { %v5161_v20 = vpop.eup %5160  ;;  %2359 = vadd.xlane.f32.xlu1 %v2358_v60  ;;  %v2272_v39 = vmul.f32 %v6440_v38, %v6440_v38  ;;  %v6448_v4 = vsel %vm2177_vm2, %v2125_v55, %v2209_v53 }
 0x254   : > { %v2653_v9 = vshrl.u32 %v4899_v12, 16  ;;  %v4900_v18 = vpack.c.bf16 %v2480_v7, %v2480_v7  ;;  %v2477_v17 = vmul.f32 %v5161_v20, %v6247_v42  ;;  %v2656_v3 = vshll.u32 %v4899_v12, 16 }
 0x255   : > { %v5163_v22 = vpop.eup %5162  ;;  %v2361_v44 = vsel %vm1697_vm14, %v2275_v13, 0.0  ;;  %v2273_v5 = vmul.f32 %v6448_v4, %v6448_v4  ;;  %v2352_v28 = vsel %vm1697_vm14, %v2272_v39, 0.0  ;;  %v451_v20 = vsel %vm5995_vm8, 0, %v450_v59  ;;  %v392_v39 = vld [vmem:[#allocation3 + $0x84] sm:$0x1] }
 0x256   : > { %v2655_v26 = vrot.slane %v2653_v9, 7  ;;  %v2661_v29 = vshrl.u32 %v4900_v18, 16  ;;  %v4897_v30 = vpack.c.bf16 %v2477_v17, %v2477_v17  ;;  %2362 = vadd.xlane.f32.xlu0 %v2361_v44  ;;  %v2478_v36 = vmul.f32 %v5163_v22, %v6256_v49  ;;  %v2938_v49 = vld [vmem:[#allocation3 + $0x24] sm:$0xf]  ;;  %452 = vst [vmem:[#allocation3 + $0x98] sm:$0x1] %v451_v20 }
 0x257   : > { %2353 = vadd.xlane.f32.xlu1 %v2352_v28  ;;  %v2664_v42 = vshll.u32 %v4900_v18, 16  ;;  %v2355_v54 = vsel %vm1697_vm14, %v2273_v5, 0.0  ;;  %v2942_v18 = vld [vmem:[#allocation3 + $0x2c] sm:$0x1]  ;;  %v393_v17 = vsel %vm5985_vm4, 0, %v392_v39 }
 0x258   : > { %v2658_v25 = vor.u32 %v2656_v3, %v2655_v26  ;;  %v2663_v45 = vrot.slane %v2661_v29, 7  ;;  %v2636_v48 = vshrl.u32 %v4897_v30, 16  ;;  %v2659_v61 = vrot.slane %v2655_v26, 4  ;;  %394 = vst [vmem:[#allocation3 + $0x84] sm:$0x1] %v393_v17 }
 0x259   : > { %v2639_v21 = vshll.u32 %v4897_v30, 16  ;;  %v4898_v43 = vpack.c.bf16 %v2478_v36, %v2478_v36  ;;  %v447_v5 = vld [vmem:[#allocation3 + $0x8c] sm:$0x1] }
 0x25a   : > { %v2946_v55 = vsel %vm6401_vm12, %v2658_v25, %v2945_v47  ;;  %v2666_v63 = vor.u32 %v2664_v42, %v2663_v45  ;;  %v2668_v33 = vrot.slane %v2663_v45, 4  ;;  %v2638_v58 = vrot.slane %v2636_v48, 7  ;;  %2356 = vadd.xlane.f32.xlu0 %v2355_v54  ;;  %v401_v25 = vld [vmem:[#allocation3 + $0xa8] sm:$0x1] }
 0x25b   : > { %2947 = vst [vmem:[#allocation3 + $0x30] sm:$0xf] %v2946_v55  ;;  %v2644_v53 = vshrl.u32 %v4898_v43, 16  ;;  %v2647_v13 = vshll.u32 %v4898_v43, 16  ;;  %v448_v29 = vsel %vm5995_vm8, 0, %v447_v5  ;;  %v402_v48 = vsel %vm5985_vm4, 0, %v401_v25 }
 0x25c   : > { %v2667_v1 = vsel %vm5420_vm9, %v2659_v61, %v2666_v63  ;;  %v2950_v12 = vsel %vm5985_vm4, %v2668_v33, %v2949_v52  ;;  %v2641_v7 = vor.u32 %v2639_v21, %v2638_v58  ;;  %v2642_v22 = vrot.slane %v2638_v58, 4  ;;  %449 = vst [vmem:[#allocation3 + $0x8c] sm:$0x1] %v448_v29  ;;  %403 = vst [vmem:[#allocation3 + $0xa8] sm:$0x1] %v402_v48 }
 0x25d   : > { %2948 = vst.msk [vmem:[#allocation3 + $0x34] sm:$0xf] %vm7555_vm5, %v2667_v1  ;;  %2951 = vst [vmem:[#allocation3 + $0x38] sm:$0x1] %v2950_v12  ;;  %v2646_v60 = vrot.slane %v2644_v53, 7 }
 0x25e   : > { %v2939_v9 = vsel %vm6401_vm12, %v2641_v7, %v2938_v49  ;;  %vm7556_vm5 = vmmov %vm7554_vm1 }
 0x25f   : > { %2940 = vst [vmem:[#allocation3 + $0x24] sm:$0xf] %v2939_v9  ;;  %v2649_v3 = vor.u32 %v2647_v13, %v2646_v60  ;;  %v2651_v44 = vrot.slane %v2646_v60, 4 }
 0x260   : > { %v2312_v26 = vpop.xlane.xlu1 %2311 }
 0x261   : > { %v2650_v30 = vsel %vm5420_vm9, %v2642_v22, %v2649_v3  ;;  %v2943_v28 = vsel %vm5985_vm4, %v2651_v44, %v2942_v18  ;;  %v2387_v47 = vmul.f32 0.125, %v2312_v26 }
 0x262   : > { %2941 = vst.msk [vmem:[#allocation3 + $0x28] sm:$0xf] %vm7554_vm1, %v2650_v30  ;;  %2944 = vst [vmem:[#allocation3 + $0x2c] sm:$0x1] %v2943_v28  ;;  %v2315_v36 = vpop.xlane.xlu0 %2314 }
 0x263   : > { %v2419_v45 = vadd.f32 1e-08, %v2387_v47  ;;  %v2388_v42 = vmul.f32 0.125, %v2315_v36 }
 0x264   : > { %v2306_v61 = vpop.xlane.xlu1 %2305 }
 0x265   : > { %5164 = vrsqrt.f32 %v2419_v45  ;;  %v2420_v52 = vadd.f32 1e-08, %v2388_v42  ;;  %v2385_v21 = vmul.f32 0.125, %v2306_v61 }
 0x266   : > { %v2309_v43 = vpop.xlane.xlu0 %2308 }
 0x267   : > { %5166 = vrsqrt.f32 %v2420_v52  ;;  %v2417_v54 = vadd.f32 1e-08, %v2385_v21  ;;  %v2386_v55 = vmul.f32 0.125, %v2309_v43  ;;  %v5001_v63 = vpop.f32.mrb[28].mxu0 }
 0x268   : > { %v2146_v33 = vadd.f32 %v5001_v63, %v6192_v19  ;;  %v2137_v58 = vpop.f32.mrb[29].mxu0 }
 0x269   : > { %5168 = vrsqrt.f32 %v2417_v54  ;;  %v2418_v49 = vadd.f32 1e-08, %v2386_v55  ;;  %v2138_v53 = vadd.f32 %v6192_v19, %v2137_v58  ;;  %v5002_v59 = vpop.f32.mrb[30].mxu0 }
 0x26a   : > { %vm2182_vm7 = vcmp.ge.f32.partialorder %v2146_v33, 0.0  ;;  %v2214_v1 = vmul.f32 0.2, %v2146_v33  ;;  %v2149_v12 = vadd.f32 %v5002_v59, %v6192_v19  ;;  %v2140_v7 = vpop.f32.mrb[31].mxu0 }
 0x26b   : > { %5170 = vrsqrt.f32 %v2418_v49  ;;  %vm2180_vm13 = vcmp.ge.f32.partialorder %v2138_v53, 0.0  ;;  %v2212_v60 = vmul.f32 0.2, %v2138_v53  ;;  %v2141_v13 = vadd.f32 %v6192_v19, %v2140_v7 }
 0x26c   : > { %vm2183_vm15 = vcmp.ge.f32.partialorder %v2149_v12, 0.0  ;;  %v2215_v20 = vmul.f32 0.2, %v2149_v12  ;;  %v6483_v39 = vsel %vm2182_vm7, %v2146_v33, %v2214_v1  ;;  %v2959_v33 = vld [vmem:[#allocation3 + $0x48] sm:$0xf]  ;;  %vm7557_vm7 = vmmov %vm7554_vm1 }
 0x26d   : > { %vm2181_vm2 = vcmp.ge.f32.partialorder %v2141_v13, 0.0  ;;  %v2213_v9 = vmul.f32 0.2, %v2141_v13  ;;  %v2278_v18 = vmul.f32 %v6483_v39, %v6483_v39  ;;  %v6487_v17 = vsel %vm2180_vm13, %v2138_v53, %v2212_v60  ;;  %vm7558_vm13 = vmmov %vm7554_vm1 }
 0x26e   : > { %v6489_v22 = vsel %vm2183_vm15, %v2149_v12, %v2215_v20  ;;  %v2276_v19 = vmul.f32 %v6487_v17, %v6487_v17  ;;  %v2963_v12 = vld [vmem:[#allocation3 + $0x50] sm:$0x1]  ;;  %vm4096_vm15 = vcmask 1043456  }
 0x26f   : > { %v5165_v3 = vpop.eup %5164  ;;  %v2370_v44 = vsel %vm1697_vm14, %v2278_v18, 0.0  ;;  %v2279_v5 = vmul.f32 %v6489_v22, %v6489_v22  ;;  %v6496_v26 = vsel %vm2181_vm2, %v2141_v13, %v2213_v9  ;;  %v2952_v18 = vld [vmem:[#allocation3 + $0x3c] sm:$0xf]  ;;  %vm7559_vm2 = vmmov %vm7554_vm1 }
 0x270   : > { %v2483_v29 = vmul.f32 %v5165_v3, %v6275_v11  ;;  %2371 = vadd.xlane.f32.xlu1 %v2370_v44  ;;  %v2277_v47 = vmul.f32 %v6496_v26, %v6496_v26  ;;  %v2364_v42 = vsel %vm1697_vm14, %v2276_v19, 0.0  ;;  %v456_v44 = vld [vmem:[#allocation3 + $0xb0] sm:$0x1] }
 0x271   : > { %v5167_v30 = vpop.eup %5166  ;;  %v2373_v28 = vsel %vm1697_vm14, %v2279_v5, 0.0 }
 0x272   : > { %v4903_v36 = vpack.c.bf16 %v2483_v29, %v2483_v29  ;;  %v2484_v25 = vmul.f32 %v5167_v30, %v6281_v32  ;;  %2374 = vadd.xlane.f32.xlu0 %v2373_v28  ;;  %v2367_v21 = vsel %vm1697_vm14, %v2277_v47, 0.0  ;;  %v457_v28 = vsel %vm5995_vm8, 0, %v456_v44  ;;  %v398_v47 = vld [vmem:[#allocation3 + $0x9c] sm:$0x1] }
 0x273   : > { %v5169_v45 = vpop.eup %5168  ;;  %458 = vst [vmem:[#allocation3 + $0xb0] sm:$0x1] %v457_v28 }
 0x274   : > { %v2687_v48 = vshrl.u32 %v4903_v36, 16  ;;  %v4904_v61 = vpack.c.bf16 %v2484_v25, %v2484_v25  ;;  %v2481_v52 = vmul.f32 %v5169_v45, %v6279_v6  ;;  %2365 = vadd.xlane.f32.xlu1 %v2364_v42  ;;  %v2690_v54 = vshll.u32 %v4903_v36, 16  ;;  %v2956_v25 = vld [vmem:[#allocation3 + $0x44] sm:$0x1] }
 0x275   : > { %v5171_v11 = vpop.eup %5170  ;;  %v399_v45 = vsel %vm5985_vm4, 0, %v398_v47 }
 0x276   : > { %v2689_v43 = vrot.slane %v2687_v48, 7  ;;  %v2695_v55 = vshrl.u32 %v4904_v61, 16  ;;  %v4901_v63 = vpack.c.bf16 %v2481_v52, %v2481_v52  ;;  %2368 = vadd.xlane.f32.xlu0 %v2367_v21  ;;  %v2482_v32 = vmul.f32 %v5171_v11, %v6288_v8  ;;  %v5110_v52 = vld [vmem:[#allocation3 + $0x18] sm:$0xff]   ;;  %400 = vst [vmem:[#allocation3 + $0x9c] sm:$0x1] %v399_v45 }
 0x277   : > { %v2698_v53 = vshll.u32 %v4904_v61, 16  ;;  %v453_v11 = vld [vmem:[#allocation3 + $0xa4] sm:$0x1]  ;;  %v3244_v28 = vshrl.u32 %v5110_v52, 16 }
 0x278   : > { %v2692_v58 = vor.u32 %v2690_v54, %v2689_v43  ;;  %v2697_v49 = vrot.slane %v2695_v55, 7  ;;  %v2670_v59 = vshrl.u32 %v4901_v63, 16  ;;  %v2693_v1 = vrot.slane %v2689_v43, 4  ;;  %v5111_v43 = vld [vmem:[#allocation3 + $0x20] ss:$0 sps:$4 sm:$0x11]  }
 0x279   : > { %v2673_v7 = vshll.u32 %v4901_v63, 16  ;;  %v4902_v6 = vpack.c.bf16 %v2482_v32, %v2482_v32  ;;  %v454_v54 = vsel %vm5995_vm8, 0, %v453_v11  ;;  %v3251_v47 = vshll.u32 %v5111_v43, 16 }
 0x27a   : > { %v2960_v60 = vsel %vm6401_vm12, %v2692_v58, %v2959_v33  ;;  %v2700_v13 = vor.u32 %v2698_v53, %v2697_v49  ;;  %v2702_v20 = vrot.slane %v2697_v49, 4  ;;  %v2672_v9 = vrot.slane %v2670_v59, 7  ;;  %455 = vst [vmem:[#allocation3 + $0xa4] sm:$0x1] %v454_v54  ;;  %v407_v49 = vld [vmem:[#allocation3 + $0xc0] sm:$0x1] }
 0x27b   : > { %2961 = vst [vmem:[#allocation3 + $0x48] sm:$0xf] %v2960_v60  ;;  %v2678_v3 = vshrl.u32 %v4902_v6, 16  ;;  %v2681_v30 = vshll.u32 %v4902_v6, 16  ;;  %v3450_v60 = vrot.slane %v5111_v43, 1  ;;  %v3253_v45 = vrot.slane %v3251_v47, 1 }
 0x27c   : > { %v2701_v8 = vsel %vm5420_vm9, %v2693_v1, %v2700_v13  ;;  %v2964_v5 = vsel %vm5985_vm4, %v2702_v20, %v2963_v12  ;;  %v2675_v19 = vor.u32 %v2673_v7, %v2672_v9  ;;  %v2676_v42 = vrot.slane %v2672_v9, 4  ;;  %v6527_v58 = vld [vmem:[#allocation3 + $0x14] ss:$0 sps:$4 sm:$0x11]   ;;  %v6529_v12 = vld [vmem:[#allocation3 + $0xc] sm:$0xff]  }
 0x27d   : > { %2962 = vst.msk [vmem:[#allocation3 + $0x4c] sm:$0xf] %vm7556_vm5, %v2701_v8  ;;  %2965 = vst [vmem:[#allocation3 + $0x50] sm:$0x1] %v2964_v5  ;;  %v2680_v29 = vrot.slane %v2678_v3, 7  ;;  %v3449_v1 = vrot.slane %v5110_v52, 1 }
 0x27e   : > { %v2953_v36 = vsel %vm6401_vm12, %v2675_v19, %v2952_v18  ;;  %v408_v7 = vsel %vm5985_vm4, 0, %v407_v49  ;;  %v3246_v13 = vshll.u32 %v5110_v52, 16  ;;  %v3446_v5 = vrot.slane %v6529_v12, 1  ;;  %v2966_v47 = vld [vmem:[#allocation3 + $0x54] sm:$0xf]  ;;  %vm7560_vm5 = vmmov %vm7554_vm1 }
 0x27f   : > { %2954 = vst [vmem:[#allocation3 + $0x3c] sm:$0xf] %v2953_v36  ;;  %v2683_v48 = vor.u32 %v2681_v30, %v2680_v29  ;;  %v2685_v61 = vrot.slane %v2680_v29, 4  ;;  %409 = vst [vmem:[#allocation3 + $0xc0] sm:$0x1] %v408_v7  ;;  %v3451_v8 = vsel %vm1345_vm10, %v3449_v1, %v3450_v60  ;;  %v3447_v19 = vrot.slane %v6527_v58, 1 }
 0x280   : > { %v2324_v21 = vpop.xlane.xlu1 %2323  ;;  %v3248_v29 = vrot.slane %v3246_v13, 1  ;;  %v3234_v54 = vshll.u32 %v6529_v12, 16  ;;  %v6556_v7 = vld [vmem:[#allocation3 + $0x30] sm:$0xff]  }
 0x281   : > { %v2684_v55 = vsel %vm5420_vm9, %v2676_v42, %v2683_v48  ;;  %v2957_v63 = vsel %vm5985_vm4, %v2685_v61, %v2956_v25  ;;  %v2391_v33 = vmul.f32 0.125, %v2324_v21  ;;  %v3448_v36 = vsel %vm1345_vm10, %v3446_v5, %v3447_v19  ;;  %v2977_v5 = vld [vmem:[#allocation3 + $0x68] sm:$0x1] }
 0x282   : > { %2955 = vst.msk [vmem:[#allocation3 + $0x40] sm:$0xf] %vm7554_vm1, %v2684_v55  ;;  %2958 = vst [vmem:[#allocation3 + $0x44] sm:$0x1] %v2957_v63  ;;  %v2327_v32 = vpop.xlane.xlu0 %2326  ;;  %v3249_v25 = vor.u32 %v3248_v29, %v3244_v28  ;;  %v3236_v60 = vrot.slane %v3234_v54, 1 }
 0x283   : > { %v2423_v53 = vadd.f32 1e-08, %v2391_v33  ;;  %v2392_v59 = vmul.f32 0.125, %v2327_v32  ;;  %v2973_v32 = vld [vmem:[#allocation3 + $0x60] sm:$0xf] }
 0x284   : > { %v2318_v6 = vpop.xlane.xlu1 %2317  ;;  %v6545_v61 = vsel %vm1120_vm11, %v3249_v25, %v3253_v45 }
 0x285   : > { %5172 = vrsqrt.f32 %v2423_v53  ;;  %v2424_v20 = vadd.f32 1e-08, %v2392_v59  ;;  %v2389_v9 = vmul.f32 0.125, %v2318_v6  ;;  %3530 = vrot.lane.b32.xlu1 %v5110_v52, %s5304_s26  ;;  %v6558_v6 = vld [vmem:[#allocation3 + $0x38] ss:$0 sps:$4 sm:$0x11]  }
 0x286   : > { %v2321_v18 = vpop.xlane.xlu0 %2320 }
 0x287   : > { %5174 = vrsqrt.f32 %v2424_v20  ;;  %v2421_v3 = vadd.f32 1e-08, %v2389_v9  ;;  %v2390_v44 = vmul.f32 0.125, %v2321_v18 }
 0x289   : > { %5176 = vrsqrt.f32 %v2421_v3  ;;  %v2422_v30 = vadd.f32 1e-08, %v2390_v44  ;;  %3612 = vrot.lane.b32.xlu1 %v3451_v8, %s5311_s16  ;;  %v462_v3 = vld [vmem:[#allocation3 + $0xc8] sm:$0x1] }
 0x28b   : > { %5178 = vrsqrt.f32 %v2422_v30 }
 0x28c   : > { %3647 = vrot.lane.b32.xlu0 %v5110_v52, %s5310_s13 }
 0x28d   : > { %3493 = vrot.lane.b32.xlu1 %v3448_v36, %s5308_s9 }
 0x28f   : > { %v5173_v42 = vpop.eup %5172 }
 0x290   : > { %v2487_v48 = vmul.f32 %v5173_v42, %v6307_v51  ;;  %3528 = vrot.lane.b32.xlu0 %v6529_v12, %s5304_s26  ;;  %v6568_v42 = vld [vmem:[#allocation3 + $0x24] sm:$0xff]  }
 0x291   : > { %v5175_v11 = vpop.eup %5174  ;;  %3577 = vrot.lane.b32.xlu1 %v6545_v61, %s5307_s8 }
 0x292   : > { %v4907_v52 = vpack.c.bf16 %v2487_v48, %v2487_v48  ;;  %v2488_v21 = vmul.f32 %v5175_v11, %v6313_v27  ;;  %v3455_v48 = vrot.slane %v6556_v7, 1  ;;  %v3270_v11 = vshll.u32 %v6556_v7, 16 }
 0x293   : > { %v5177_v43 = vpop.eup %5176 }
 0x294   : > { %v2721_v55 = vshrl.u32 %v4907_v52, 16  ;;  %v4908_v63 = vpack.c.bf16 %v2488_v21, %v2488_v21  ;;  %v2485_v51 = vmul.f32 %v5177_v43, %v6311_v14  ;;  %3729 = vrot.lane.b32.xlu0 %v3451_v8, %s5312_s17  ;;  %v2724_v53 = vshll.u32 %v4907_v52, 16 }
 0x295   : > { %v5179_v33 = vpop.eup %5178  ;;  %3415 = vrot.lane.b32.xlu1 %v6545_v61, %s5302_s24  ;;  %v3232_v14 = vshrl.u32 %v6529_v12, 16 }
 0x296   : > { %v2723_v49 = vrot.slane %v2721_v55, 7  ;;  %v2729_v59 = vshrl.u32 %v4908_v63, 16  ;;  %v4905_v1 = vpack.c.bf16 %v2485_v51, %v2485_v51  ;;  %v2486_v27 = vmul.f32 %v5179_v33, %v6320_v56  ;;  %v459_v51 = vld [vmem:[#allocation3 + $0xbc] sm:$0x1] }
 0x297   : > { %v2732_v9 = vshll.u32 %v4908_v63, 16  ;;  %v463_v56 = vsel %vm5995_vm8, 0, %v462_v3  ;;  %v3456_v55 = vrot.slane %v6558_v6, 1  ;;  %v6580_v63 = vld [vmem:[#allocation3 + $0x2c] ss:$0 sps:$4 sm:$0x11]  }
 0x298   : > { %v2726_v13 = vor.u32 %v2724_v53, %v2723_v49  ;;  %v2731_v20 = vrot.slane %v2729_v59, 7  ;;  %v2704_v18 = vshrl.u32 %v4905_v1, 16  ;;  %3495 = vrot.lane.b32.xlu0 %v3451_v8, %s5308_s9  ;;  %v2727_v44 = vrot.slane %v2723_v49, 4  ;;  %464 = vst [vmem:[#allocation3 + $0xc8] sm:$0x1] %v463_v56 }
 0x299   : > { %v2707_v19 = vshll.u32 %v4905_v1, 16  ;;  %v4906_v29 = vpack.c.bf16 %v2486_v27, %v2486_v27  ;;  %3534 = vrot.lane.b32.xlu1 %v6556_v7, %s5304_s26  ;;  %v404_v8 = vld [vmem:[#allocation3 + $0xb4] sm:$0x1]  ;;  %v3239_v49 = vshll.u32 %v6527_v58, 16  ;;  %v460_v53 = vsel %vm5995_vm8, 0, %v459_v51 }
 0x29a   : > { %v2974_v12 = vsel %vm6401_vm12, %v2726_v13, %v2973_v32  ;;  %v2734_v30 = vor.u32 %v2732_v9, %v2731_v20  ;;  %v2736_v28 = vrot.slane %v2731_v20, 4  ;;  %v2706_v25 = vrot.slane %v2704_v18, 7  ;;  %v2970_v59 = vld [vmem:[#allocation3 + $0x5c] sm:$0x1]  ;;  %461 = vst [vmem:[#allocation3 + $0xbc] sm:$0x1] %v460_v53 }
 0x29b   : > { %2975 = vst [vmem:[#allocation3 + $0x60] sm:$0xf] %v2974_v12  ;;  %v2712_v45 = vshrl.u32 %v4906_v29, 16  ;;  %v405_v52 = vsel %vm5985_vm4, 0, %v404_v8  ;;  %v2715_v32 = vshll.u32 %v4906_v29, 16  ;;  %v3237_v20 = vor.u32 %v3236_v60, %v3232_v14 }
 0x29c   : > { %v2735_v21 = vsel %vm5420_vm9, %v2727_v44, %v2734_v30  ;;  %v2978_v43 = vsel %vm5985_vm4, %v2736_v28, %v2977_v5  ;;  %v2709_v54 = vor.u32 %v2707_v19, %v2706_v25  ;;  %3610 = vrot.lane.b32.xlu0 %v3448_v36, %s5311_s16  ;;  %406 = vst [vmem:[#allocation3 + $0xb4] sm:$0x1] %v405_v52  ;;  %v2710_v1 = vrot.slane %v2706_v25, 4 }
 0x29d   : > { %2976 = vst.msk [vmem:[#allocation3 + $0x64] sm:$0xf] %vm7557_vm7, %v2735_v21  ;;  %2979 = vst [vmem:[#allocation3 + $0x68] sm:$0x1] %v2978_v43  ;;  %v2714_v33 = vrot.slane %v2712_v45, 7  ;;  %3649 = vrot.lane.b32.xlu1 %v6568_v42, %s5310_s13  ;;  %v6593_v58 = vsel %vm1345_vm10, %v3455_v48, %v3456_v55  ;;  %v3452_v18 = vrot.slane %v6568_v42, 1 }
 0x29e   : > { %v2967_v36 = vsel %vm6401_vm12, %v2709_v54, %v2966_v47  ;;  %v3453_v3 = vrot.slane %v6580_v63, 1  ;;  %v3272_v44 = vrot.slane %v3270_v11, 1  ;;  %v3241_v60 = vrot.slane %v3239_v49, 1  ;;  %v5133_v21 = vld [vmem:[%s7525_s3] sm:$0xff]   ;;  %vm7561_vm7 = vmmov %vm7554_vm1 }
 0x29f   : > { %2968 = vst [vmem:[#allocation3 + $0x54] sm:$0xf] %v2967_v36  ;;  %v2717_v27 = vor.u32 %v2715_v32, %v2714_v33  ;;  %v2719_v13 = vrot.slane %v2714_v33, 4  ;;  %v3268_v29 = vshrl.u32 %v6556_v7, 16  ;;  %v3275_v56 = vshll.u32 %v6558_v6, 16  ;;  %5003 = vmatprep.subr.bf16.mxu1 %v5133_v21  ;;  %v5135_v33 = vld [vmem:[%s7525_s3 + $0x8] sm:$0xff]  }
 0x2a0   : > { %v2336_v9 = vpop.xlane.xlu1 %2335  ;;  %3694 = vrot.lane.b32.xlu0 %v6545_v61, %s5313_s20  ;;  %v3242_v28 = vsel %vm1120_vm11, %v3237_v20, %v3241_v60  ;;  %v6609_v25 = vsel %vm1345_vm10, %v3452_v18, %v3453_v3  ;;  %v3258_v45 = vshll.u32 %v6568_v42, 16  ;;  %5004 = vmatpush3.bf16.msra.mxu1 %v5133_v21  ;;  %v3256_v49 = vshrl.u32 %v6568_v42, 16 }
 0x2a1   : > { %v2718_v5 = vsel %vm5420_vm9, %v2710_v1, %v2717_v27  ;;  %v2971_v19 = vsel %vm5985_vm4, %v2719_v13, %v2970_v59  ;;  %v2395_v14 = vmul.f32 0.125, %v2336_v9  ;;  %3616 = vrot.lane.b32.xlu1 %v6593_v58, %s5311_s16  ;;  %v3273_v8 = vor.u32 %v3272_v44, %v3268_v29  ;;  %5005 = vmatprep.subr.bf16.mxu1 %v5135_v33  ;;  %v5136_v59 = vld [vmem:[%s7525_s3 + $0x10] sm:$0xff]  }
 0x2a2   : > { %2969 = vst.msk [vmem:[#allocation3 + $0x58] sm:$0xf] %vm7558_vm13, %v2718_v5  ;;  %2972 = vst [vmem:[#allocation3 + $0x5c] sm:$0x1] %v2971_v19  ;;  %v2339_v61 = vpop.xlane.xlu0 %2338  ;;  %v3277_v52 = vrot.slane %v3275_v56, 1  ;;  %v3260_v51 = vrot.slane %v3258_v45, 1 }
 0x2a3   : > { %v2427_v12 = vadd.f32 1e-08, %v2395_v14  ;;  %v2396_v30 = vmul.f32 0.125, %v2339_v61  ;;  %v3263_v53 = vshll.u32 %v6580_v63, 16  ;;  %v5138_v5 = vld [vmem:[%s7525_s3 + $0x20] ss:$0 sps:$4 sm:$0xff]   ;;  %vm7562_vm13 = vmmov %vm7554_vm1 }
 0x2a4   : > { %v2330_v47 = vpop.xlane.xlu1 %2329  ;;  %3413 = vrot.lane.b32.xlu0 %v3242_v28, %s5302_s24  ;;  %v6619_v55 = vsel %vm1120_vm11, %v3273_v8, %v3277_v52  ;;  %v3261_v36 = vor.u32 %v3260_v51, %v3256_v49  ;;  %5006 = vmatpush3.bf16.msra.mxu1 %v5135_v33  ;;  %v6657_v56 = vld [vmem:[#allocation3 + $0x48] sm:$0xff]   ;;  %v5120_v8 = vld [vmem:[#allocation3 + $0x50] ss:$0 sps:$4 sm:$0x11]   ;;  %v4098_v52 = vsel %vm4096_vm15, %v5138_v5, 0  ;;  %v6666_v33 = vld [vmem:[#allocation3 + $0x3c] sm:$0xff]  }
 0x2a5   : > { %5180 = vrsqrt.f32 %v2427_v12  ;;  %v2428_v48 = vadd.f32 1e-08, %v2396_v30  ;;  %v2393_v11 = vmul.f32 0.125, %v2330_v47  ;;  %3497 = vrot.lane.b32.xlu1 %v6609_v25, %s5308_s9  ;;  %v3265_v1 = vrot.slane %v3263_v53, 1  ;;  %5007 = vmatprep.subr.bf16.mxu1 %v5136_v59  ;;  %v2980_v51 = vld [vmem:[#allocation3 + $0x6c] sm:$0xf] }
 0x2a6   : > { %v2333_v6 = vpop.xlane.xlu0 %2332  ;;  %v3294_v49 = vshll.u32 %v6657_v56, 16 }
 0x2a7   : > { %5182 = vrsqrt.f32 %v2428_v48  ;;  %v2425_v43 = vadd.f32 1e-08, %v2393_v11  ;;  %v2394_v54 = vmul.f32 0.125, %v2333_v6  ;;  %v6639_v63 = vsel %vm1120_vm11, %v3261_v36, %v3265_v1  ;;  %v2991_v48 = vld [vmem:[#allocation3 + $0x80] sm:$0x1] }
 0x2a8   : > { %3575 = vrot.lane.b32.xlu0 %v3242_v28, %s5307_s8  ;;  %5008 = vmatpush3.bf16.msra.mxu1 %v5136_v59  ;;  %v3462_v1 = vrot.slane %v5120_v8, 1 }
 0x2a9   : > { %5184 = vrsqrt.f32 %v2425_v43  ;;  %v2426_v32 = vadd.f32 1e-08, %v2394_v54  ;;  %3581 = vrot.lane.b32.xlu1 %v6619_v55, %s5307_s8 }
 0x2ab   : > { %5186 = vrsqrt.f32 %v2426_v32  ;;  %v3461_v32 = vrot.slane %v6657_v56, 1 }
 0x2ac   : > { %3651 = vrot.lane.b32.xlu0 %v6556_v7, %s5310_s13  ;;  %v5137_v7 = vld [vmem:[%s7525_s3 + $0x18] sm:$0xff]  }
 0x2ad   : > { %3419 = vrot.lane.b32.xlu1 %v6619_v55, %s5302_s24  ;;  %5009 = vmatprep.subr.bf16.mxu1 %v5137_v7 }
 0x2ae   : > { %5010 = vmatpush3.bf16.msra.mxu1 %v5137_v7 }
 0x2af   : > { %v5181_v27 = vpop.eup %5180  ;;  %5046 = vmatprep.subr.msk.bf16.mxu1 %vm4096_vm15, %v5138_v5  ;;  %v3458_v5 = vrot.slane %v6666_v33, 1  ;;  %vm7564_vm15 = vmmov %vm7554_vm1 }
 0x2b0   : > { %v2491_v13 = vmul.f32 %v5181_v27, %v6339_v16  ;;  %3532 = vrot.lane.b32.xlu0 %v6568_v42, %s5304_s26  ;;  %v5121_v27 = vld [vmem:[#allocation3 + $0x44] ss:$0 sps:$4 sm:$0x11]  }
 0x2b1   : > { %v5183_v20 = vpop.eup %5182  ;;  %3696 = vrot.lane.b32.xlu1 %v6639_v63, %s5313_s20 }
 0x2b2   : > { %v4911_v9 = vpack.c.bf16 %v2491_v13, %v2491_v13  ;;  %v2492_v18 = vmul.f32 %v5183_v20, %v6345_v34  ;;  %5012 = vmatpush3.bf16.msra.mxu1 %v4098_v52 }
 0x2b3   : > { %v5185_v16 = vpop.eup %5184 }
 0x2b4   : > { %v2755_v3 = vshrl.u32 %v4911_v9, 16  ;;  %v4912_v44 = vpack.c.bf16 %v2492_v18, %v2492_v18  ;;  %v2489_v42 = vmul.f32 %v5185_v16, %v6343_v24  ;;  %3733 = vrot.lane.b32.xlu0 %v6593_v58, %s5312_s17  ;;  %v2758_v14 = vshll.u32 %v4911_v9, 16  ;;  %v2987_v24 = vld [vmem:[#allocation3 + $0x78] sm:$0xf]  ;;  %v2984_v9 = vld [vmem:[#allocation3 + $0x74] sm:$0x1] }
 0x2b5   : > { %v5187_v19 = vpop.eup %5186  ;;  %3417 = vrot.lane.b32.xlu1 %v6639_v63, %s5302_s24 }
 0x2b6   : > { %v2757_v34 = vrot.slane %v2755_v3, 7  ;;  %v2763_v60 = vshrl.u32 %v4912_v44, 16  ;;  %v4909_v61 = vpack.c.bf16 %v2489_v42, %v2489_v42  ;;  %v2490_v29 = vmul.f32 %v5187_v19, %v6354_v2 }
 0x2b7   : > { %v2766_v28 = vshll.u32 %v4912_v44, 16  ;;  %v6684_v42 = vsel %vm1345_vm10, %v3461_v32, %v3462_v1  ;;  %v3459_v19 = vrot.slane %v5121_v27, 1 }
 0x2b8   : > { %v2760_v12 = vor.u32 %v2758_v14, %v2757_v34  ;;  %v2765_v30 = vrot.slane %v2763_v60, 7  ;;  %v2738_v47 = vshrl.u32 %v4909_v61, 16  ;;  %3499 = vrot.lane.b32.xlu0 %v6593_v58, %s5308_s9  ;;  %v2761_v45 = vrot.slane %v2757_v34, 4 }
 0x2b9   : > { %v2741_v11 = vshll.u32 %v4909_v61, 16  ;;  %v4910_v6 = vpack.c.bf16 %v2490_v29, %v2490_v29  ;;  %3538 = vrot.lane.b32.xlu1 %v6657_v56, %s5304_s26  ;;  %v3296_v34 = vrot.slane %v3294_v49, 1  ;;  %v3299_v29 = vshll.u32 %v5120_v8, 16 }
 0x2ba   : > { %v2988_v2 = vsel %vm6401_vm12, %v2760_v12, %v2987_v24  ;;  %v2768_v21 = vor.u32 %v2766_v28, %v2765_v30  ;;  %v2770_v43 = vrot.slane %v2765_v30, 4  ;;  %v2740_v54 = vrot.slane %v2738_v47, 7 }
 0x2bb   : > { %2989 = vst [vmem:[#allocation3 + $0x78] sm:$0xf] %v2988_v2  ;;  %v2746_v58 = vshrl.u32 %v4910_v6, 16  ;;  %v2749_v7 = vshll.u32 %v4910_v6, 16  ;;  %v3292_v24 = vshrl.u32 %v6657_v56, 16  ;;  %v6698_v47 = vsel %vm1345_vm10, %v3458_v5, %v3459_v19 }
 0x2bc   : > { %v2769_v53 = vsel %vm5420_vm9, %v2761_v45, %v2768_v21  ;;  %v2992_v36 = vsel %vm5985_vm4, %v2770_v43, %v2991_v48  ;;  %v2743_v59 = vor.u32 %v2741_v11, %v2740_v54  ;;  %3731 = vrot.lane.b32.xlu0 %v6609_v25, %s5312_s17  ;;  %v2744_v18 = vrot.slane %v2740_v54, 4 }
 0x2bd   : > { %2990 = vst.msk [vmem:[#allocation3 + $0x7c] sm:$0xf] %vm7559_vm2, %v2769_v53  ;;  %2993 = vst [vmem:[#allocation3 + $0x80] sm:$0x1] %v2992_v36  ;;  %v2748_v13 = vrot.slane %v2746_v58, 7  ;;  %3653 = vrot.lane.b32.xlu1 %v6666_v33, %s5310_s13  ;;  %v3297_v45 = vor.u32 %v3296_v34, %v3292_v24  ;;  %v3282_v48 = vshll.u32 %v6666_v33, 16 }
 0x2be   : > { %v2981_v20 = vsel %vm6401_vm12, %v2743_v59, %v2980_v51  ;;  %v3301_v8 = vrot.slane %v3299_v29, 1  ;;  %v3280_v51 = vshrl.u32 %v6666_v33, 16  ;;  %v3287_v58 = vshll.u32 %v5121_v27, 16 }
 0x2bf   : > { %2982 = vst [vmem:[#allocation3 + $0x6c] sm:$0xf] %v2981_v20  ;;  %v2751_v16 = vor.u32 %v2749_v7, %v2748_v13  ;;  %v2753_v3 = vrot.slane %v2748_v13, 4  ;;  %v3284_v43 = vrot.slane %v3282_v48, 1  ;;  %v6738_v48 = vld [vmem:[#allocation3 + $0x54] sm:$0xff]   ;;  %vm3955_vm2 = vcmask 457728  }
 0x2c0   : > { %v2348_v44 = vpop.xlane.xlu1 %2347  ;;  %3614 = vrot.lane.b32.xlu0 %v6609_v25, %s5311_s16 }
 0x2c1   : > { %v2752_v14 = vsel %vm5420_vm9, %v2744_v18, %v2751_v16  ;;  %v2985_v60 = vsel %vm5985_vm4, %v2753_v3, %v2984_v9  ;;  %v2399_v61 = vmul.f32 0.125, %v2348_v44  ;;  %3620 = vrot.lane.b32.xlu1 %v6684_v42, %s5311_s16  ;;  %v3285_v32 = vor.u32 %v3284_v43, %v3280_v51  ;;  %v3001_v3 = vld [vmem:[#allocation3 + $0x90] sm:$0xf] }
 0x2c2   : > { %2983 = vst.msk [vmem:[#allocation3 + $0x70] sm:$0xf] %vm7560_vm5, %v2752_v14  ;;  %2986 = vst [vmem:[#allocation3 + $0x74] sm:$0x1] %v2985_v60  ;;  %v2351_v25 = vpop.xlane.xlu0 %2350  ;;  %vm3988_vm5 = vcmask 523264  }
 0x2c3   : > { %v2431_v12 = vadd.f32 1e-08, %v2399_v61  ;;  %v2400_v30 = vmul.f32 0.125, %v2351_v25  ;;  %v5124_v14 = vld [vmem:[#allocation3 + $0x68] ss:$0 sps:$4 sm:$0x11]  }
 0x2c4   : > { %v2342_v28 = vpop.xlane.xlu1 %2341  ;;  %3698 = vrot.lane.b32.xlu0 %v6619_v55, %s5313_s20  ;;  %v6706_v55 = vsel %vm1120_vm11, %v3297_v45, %v3301_v8  ;;  %v3005_v61 = vld [vmem:[#allocation3 + $0x98] sm:$0x1] }
 0x2c5   : > { %5188 = vrsqrt.f32 %v2431_v12  ;;  %v2432_v11 = vadd.f32 1e-08, %v2400_v30  ;;  %v2397_v6 = vmul.f32 0.125, %v2342_v28  ;;  %3501 = vrot.lane.b32.xlu1 %v6698_v47, %s5308_s9  ;;  %v2994_v28 = vld [vmem:[#allocation3 + $0x84] sm:$0xf] }
 0x2c6   : > { %v2345_v52 = vpop.xlane.xlu0 %2344 }
 0x2c7   : > { %5190 = vrsqrt.f32 %v2432_v11  ;;  %v2429_v2 = vadd.f32 1e-08, %v2397_v6  ;;  %v2398_v21 = vmul.f32 0.125, %v2345_v52 }
 0x2c8   : > { %3579 = vrot.lane.b32.xlu0 %v6639_v63, %s5307_s8  ;;  %v3289_v63 = vrot.slane %v3287_v58, 1  ;;  %v2998_v58 = vld [vmem:[#allocation3 + $0x8c] sm:$0x1] }
 0x2c9   : > { %5192 = vrsqrt.f32 %v2429_v2  ;;  %v2430_v54 = vadd.f32 1e-08, %v2398_v21  ;;  %3585 = vrot.lane.b32.xlu1 %v6706_v55, %s5307_s8  ;;  %v3468_v2 = vrot.slane %v5124_v14, 1  ;;  %v5125_v21 = vld [vmem:[#allocation3 + $0x5c] ss:$0 sps:$4 sm:$0x11]  }
 0x2ca   : > { %v6719_v36 = vsel %vm1120_vm11, %v3285_v32, %v3289_v63 }
 0x2cb   : > { %5194 = vrsqrt.f32 %v2430_v54 }
 0x2cc   : > { %3655 = vrot.lane.b32.xlu0 %v6657_v56, %s5310_s13 }
 0x2cd   : > { %3423 = vrot.lane.b32.xlu1 %v6706_v55, %s5302_s24 }
 0x2cf   : > { %v5189_v49 = vpop.eup %5188 }
 0x2d0   : > { %v2495_v53 = vmul.f32 %v5189_v49, %v6377_v41  ;;  %3536 = vrot.lane.b32.xlu0 %v6666_v33, %s5304_s26 }
 0x2d1   : > { %v5191_v59 = vpop.eup %5190  ;;  %3700 = vrot.lane.b32.xlu1 %v6719_v36, %s5313_s20 }
 0x2d2   : > { %v4915_v1 = vpack.c.bf16 %v2495_v53, %v2495_v53  ;;  %v2496_v56 = vmul.f32 %v5191_v59, %v6382_v10  ;;  %v6730_v10 = vld [vmem:[#allocation3 + $0x60] sm:$0xff]  }
 0x2d3   : > { %v5193_v27 = vpop.eup %5192  ;;  %v3318_v11 = vshll.u32 %v6730_v10, 16 }
 0x2d4   : > { %v2789_v13 = vshrl.u32 %v4915_v1, 16  ;;  %v4916_v7 = vpack.c.bf16 %v2496_v56, %v2496_v56  ;;  %v2493_v20 = vmul.f32 %v5193_v27, %v6384_v40  ;;  %3737 = vrot.lane.b32.xlu0 %v6684_v42, %s5312_s17  ;;  %v2792_v9 = vshll.u32 %v4915_v1, 16 }
 0x2d5   : > { %v5195_v41 = vpop.eup %5194  ;;  %3421 = vrot.lane.b32.xlu1 %v6719_v36, %s5302_s24  ;;  %v3464_v1 = vrot.slane %v6738_v48, 1  ;;  %v3465_v56 = vrot.slane %v5125_v21, 1  ;;  %v3320_v27 = vrot.slane %v3318_v11, 1 }
 0x2d6   : > { %v2791_v33 = vrot.slane %v2789_v13, 7  ;;  %v2797_v18 = vshrl.u32 %v4916_v7, 16  ;;  %v4913_v16 = vpack.c.bf16 %v2493_v20, %v2493_v20  ;;  %v2494_v44 = vmul.f32 %v5195_v41, %v6392_v57 }
 0x2d7   : > { %v2800_v34 = vshll.u32 %v4916_v7, 16  ;;  %v3323_v41 = vshll.u32 %v5124_v14, 16 }
 0x2d8   : > { %v2794_v5 = vor.u32 %v2792_v9, %v2791_v33  ;;  %v2799_v19 = vrot.slane %v2797_v18, 7  ;;  %v2772_v40 = vshrl.u32 %v4913_v16, 16  ;;  %3503 = vrot.lane.b32.xlu0 %v6684_v42, %s5308_s9  ;;  %v2795_v60 = vrot.slane %v2791_v33, 4 }
 0x2d9   : > { %v2775_v25 = vshll.u32 %v4913_v16, 16  ;;  %v4914_v24 = vpack.c.bf16 %v2494_v44, %v2494_v44  ;;  %3542 = vrot.lane.b32.xlu1 %v6730_v10, %s5304_s26  ;;  %v3467_v42 = vrot.slane %v6730_v10, 1 }
 0x2da   : > { %v3002_v57 = vsel %vm6401_vm12, %v2794_v5, %v3001_v3  ;;  %v2802_v29 = vor.u32 %v2800_v34, %v2799_v19  ;;  %v2804_v12 = vrot.slane %v2799_v19, 4  ;;  %v2774_v30 = vrot.slane %v2772_v40, 7 }
 0x2db   : > { %3003 = vst [vmem:[#allocation3 + $0x90] sm:$0xf] %v3002_v57  ;;  %v2780_v45 = vshrl.u32 %v4914_v24, 16  ;;  %v2783_v54 = vshll.u32 %v4914_v24, 16  ;;  %v6756_v59 = vsel %vm1345_vm10, %v3467_v42, %v3468_v2  ;;  %v6770_v3 = vsel %vm1345_vm10, %v3464_v1, %v3465_v56 }
 0x2dc   : > { %v2803_v6 = vsel %vm5420_vm9, %v2795_v60, %v2802_v29  ;;  %v3006_v52 = vsel %vm5985_vm4, %v2804_v12, %v3005_v61  ;;  %v2777_v8 = vor.u32 %v2775_v25, %v2774_v30  ;;  %3735 = vrot.lane.b32.xlu0 %v6698_v47, %s5312_s17  ;;  %v2778_v32 = vrot.slane %v2774_v30, 4 }
 0x2dd   : > { %3004 = vst.msk [vmem:[#allocation3 + $0x94] sm:$0xf] %vm7554_vm1, %v2803_v6  ;;  %3007 = vst [vmem:[#allocation3 + $0x98] sm:$0x1] %v3006_v52  ;;  %v2782_v43 = vrot.slane %v2780_v45, 7  ;;  %3657 = vrot.lane.b32.xlu1 %v6738_v48, %s5310_s13  ;;  %v3306_v5 = vshll.u32 %v6738_v48, 16 }
 0x2de   : > { %v2995_v51 = vsel %vm6401_vm12, %v2777_v8, %v2994_v28  ;;  %v3325_v40 = vrot.slane %v3323_v41, 1  ;;  %v3304_v57 = vshrl.u32 %v6738_v48, 16  ;;  %v3311_v29 = vshll.u32 %v5125_v21, 16 }
 0x2df   : > { %2996 = vst [vmem:[#allocation3 + $0x84] sm:$0xf] %v2995_v51  ;;  %v2785_v63 = vor.u32 %v2783_v54, %v2782_v43  ;;  %v2787_v49 = vrot.slane %v2782_v43, 4  ;;  %v3308_v25 = vrot.slane %v3306_v5, 1 }
 0x2e0   : > { %v2360_v53 = vpop.xlane.xlu1 %2359  ;;  %3618 = vrot.lane.b32.xlu0 %v6698_v47, %s5311_s16  ;;  %v3316_v47 = vshrl.u32 %v6730_v10, 16  ;;  %v6803_v51 = vld [vmem:[#allocation3 + $0x80] ss:$0 sps:$4 sm:$0x11]  }
 0x2e1   : > { %v2786_v13 = vsel %vm5420_vm9, %v2778_v32, %v2785_v63  ;;  %v2999_v7 = vsel %vm5985_vm4, %v2787_v49, %v2998_v58  ;;  %v2403_v20 = vmul.f32 0.125, %v2360_v53  ;;  %3624 = vrot.lane.b32.xlu1 %v6756_v59, %s5311_s16  ;;  %v3309_v12 = vor.u32 %v3308_v25, %v3304_v57  ;;  %v3015_v58 = vld [vmem:[#allocation3 + $0xa8] sm:$0xf]  ;;  %v3012_v57 = vld [vmem:[#allocation3 + $0xa4] sm:$0x1] }
 0x2e2   : > { %2997 = vst.msk [vmem:[#allocation3 + $0x88] sm:$0xf] %vm7561_vm7, %v2786_v13  ;;  %3000 = vst [vmem:[#allocation3 + $0x8c] sm:$0x1] %v2999_v7  ;;  %v3321_v44 = vor.u32 %v3320_v27, %v3316_v47  ;;  %v3019_v7 = vld [vmem:[#allocation3 + $0xb0] sm:$0x1] }
 0x2e3   : > { %v2435_v33 = vadd.f32 1e-08, %v2403_v20  ;;  %v2363_v9 = vpop.xlane.xlu0 %2362  ;;  %v3474_v47 = vrot.slane %v6803_v51, 1 }
 0x2e4   : > { %v2404_v18 = vmul.f32 0.125, %v2363_v9  ;;  %v2354_v16 = vpop.xlane.xlu1 %2353  ;;  %3702 = vrot.lane.b32.xlu0 %v6706_v55, %s5313_s20  ;;  %v6778_v55 = vsel %vm1120_vm11, %v3321_v44, %v3325_v40  ;;  %v3008_v9 = vld [vmem:[#allocation3 + $0x9c] sm:$0xf] }
 0x2e5   : > { %5196 = vrsqrt.f32 %v2435_v33  ;;  %v2401_v19 = vmul.f32 0.125, %v2354_v16  ;;  %3505 = vrot.lane.b32.xlu1 %v6770_v3, %s5308_s9  ;;  %v6815_v16 = vld [vmem:[#allocation3 + $0x6c] sm:$0xff]  }
 0x2e6   : > { %v2436_v34 = vadd.f32 1e-08, %v2404_v18 }
 0x2e7   : > { %v2433_v14 = vadd.f32 1e-08, %v2401_v19  ;;  %v2357_v60 = vpop.xlane.xlu0 %2356  ;;  %v6819_v19 = vld [vmem:[#allocation3 + $0x74] ss:$0 sps:$4 sm:$0x11]  }
 0x2e8   : > { %5198 = vrsqrt.f32 %v2436_v34  ;;  %v2402_v61 = vmul.f32 0.125, %v2357_v60  ;;  %3583 = vrot.lane.b32.xlu0 %v6719_v36, %s5307_s8  ;;  %v3313_v36 = vrot.slane %v3311_v29, 1  ;;  %v465_v34 = vld [vmem:[#allocation3 + $0xd4] sm:$0x1] }
 0x2e9   : > { %5200 = vrsqrt.f32 %v2433_v14  ;;  %3589 = vrot.lane.b32.xlu1 %v6778_v55, %s5307_s8  ;;  %v466_v25 = vsel %vm5995_vm8, 0, %v465_v34  ;;  %vm7563_vm8 = vmmov %vm7554_vm1 }
 0x2ea   : > { %v2434_v24 = vadd.f32 1e-08, %v2402_v61  ;;  %v6791_v45 = vsel %vm1120_vm11, %v3309_v12, %v3313_v36  ;;  %467 = vst [vmem:[#allocation3 + $0xd4] sm:$0x1] %v466_v25 }
 0x2ec   : > { %5202 = vrsqrt.f32 %v2434_v24  ;;  %3659 = vrot.lane.b32.xlu0 %v6730_v10, %s5310_s13 }
 0x2ed   : > { %3427 = vrot.lane.b32.xlu1 %v6778_v55, %s5302_s24 }
 0x2ef   : > { %v5197_v30 = vpop.eup %5196 }
 0x2f0   : > { %v2499_v28 = vmul.f32 %v5197_v30, %v6433_v46  ;;  %3540 = vrot.lane.b32.xlu0 %v6738_v48, %s5304_s26  ;;  %v6799_v46 = vld [vmem:[#allocation3 + $0x78] sm:$0xff]  }
 0x2f1   : > { %3704 = vrot.lane.b32.xlu1 %v6791_v45, %s5313_s20  ;;  %v3473_v49 = vrot.slane %v6799_v46, 1  ;;  %v3342_v27 = vshll.u32 %v6799_v46, 16 }
 0x2f2   : > { %v5199_v42 = vpop.eup %5198  ;;  %v4919_v11 = vpack.c.bf16 %v2499_v28, %v2499_v28 }
 0x2f3   : > { %v5201_v10 = vpop.eup %5200  ;;  %v2500_v6 = vmul.f32 %v5199_v42, %v6438_v62  ;;  %v3344_v12 = vrot.slane %v3342_v27, 1 }
 0x2f4   : > { %v2823_v52 = vshrl.u32 %v4919_v11, 16  ;;  %v2497_v8 = vmul.f32 %v5201_v10, %v6440_v38  ;;  %3741 = vrot.lane.b32.xlu0 %v6756_v59, %s5312_s17  ;;  %v2826_v43 = vshll.u32 %v4919_v11, 16  ;;  %v6833_v11 = vsel %vm1345_vm10, %v3473_v49, %v3474_v47 }
 0x2f5   : > { %v4920_v48 = vpack.c.bf16 %v2500_v6, %v2500_v6  ;;  %3425 = vrot.lane.b32.xlu1 %v6791_v45, %s5302_s24  ;;  %v3470_v6 = vrot.slane %v6815_v16, 1 }
 0x2f6   : > { %v5203_v2 = vpop.eup %5202  ;;  %v2825_v21 = vrot.slane %v2823_v52, 7  ;;  %v4917_v54 = vpack.c.bf16 %v2497_v8, %v2497_v8  ;;  %v3471_v52 = vrot.slane %v6819_v19, 1 }
 0x2f7   : > { %v2831_v62 = vshrl.u32 %v4920_v48, 16  ;;  %v2498_v32 = vmul.f32 %v5203_v2, %v6448_v4  ;;  %v2834_v1 = vshll.u32 %v4920_v48, 16 }
 0x2f8   : > { %v2828_v38 = vor.u32 %v2826_v43, %v2825_v21  ;;  %v2806_v63 = vshrl.u32 %v4917_v54, 16  ;;  %3507 = vrot.lane.b32.xlu0 %v6756_v59, %s5308_s9  ;;  %v2809_v20 = vshll.u32 %v4917_v54, 16  ;;  %v2829_v41 = vrot.slane %v2825_v21, 4 }
 0x2f9   : > { %v2833_v53 = vrot.slane %v2831_v62, 7  ;;  %v4918_v56 = vpack.c.bf16 %v2498_v32, %v2498_v32  ;;  %3546 = vrot.lane.b32.xlu1 %v6799_v46, %s5304_s26  ;;  %v3340_v21 = vshrl.u32 %v6799_v46, 16  ;;  %v3347_v43 = vshll.u32 %v6803_v51, 16 }
 0x2fa   : > { %v3016_v13 = vsel %vm6401_vm12, %v2828_v38, %v3015_v58  ;;  %v2808_v4 = vrot.slane %v2806_v63, 7  ;;  %v3330_v32 = vshll.u32 %v6815_v16, 16  ;;  %v6852_v49 = vsel %vm1345_vm10, %v3470_v6, %v3471_v52  ;;  %v3033_v6 = vld [vmem:[#allocation3 + $0xc8] sm:$0x1] }
 0x2fb   : > { %3017 = vst [vmem:[#allocation3 + $0xa8] sm:$0xf] %v3016_v13  ;;  %v2836_v59 = vor.u32 %v2834_v1, %v2833_v53  ;;  %v2838_v33 = vrot.slane %v2833_v53, 4  ;;  %v2814_v18 = vshrl.u32 %v4918_v56, 16  ;;  %v2817_v5 = vshll.u32 %v4918_v56, 16 }
 0x2fc   : > { %v2811_v44 = vor.u32 %v2809_v20, %v2808_v4  ;;  %3739 = vrot.lane.b32.xlu0 %v6770_v3, %s5312_s17  ;;  %v2812_v36 = vrot.slane %v2808_v4, 4  ;;  %v3345_v62 = vor.u32 %v3344_v12, %v3340_v21  ;;  %v3349_v53 = vrot.slane %v3347_v43, 1  ;;  %v3029_v12 = vld [vmem:[#allocation3 + $0xc0] sm:$0xf] }
 0x2fd   : > { %v2837_v40 = vsel %vm5420_vm9, %v2829_v41, %v2836_v59  ;;  %v3020_v14 = vsel %vm5985_vm4, %v2838_v33, %v3019_v7  ;;  %v2816_v60 = vrot.slane %v2814_v18, 7  ;;  %v2372_v61 = vpop.xlane.xlu1 %2371  ;;  %3661 = vrot.lane.b32.xlu1 %v6815_v16, %s5310_s13  ;;  %v3328_v7 = vshrl.u32 %v6815_v16, 16 }
 0x2fe   : > { %3018 = vst.msk [vmem:[#allocation3 + $0xac] sm:$0xf] %vm7562_vm13, %v2837_v40  ;;  %3021 = vst [vmem:[#allocation3 + $0xb0] sm:$0x1] %v3020_v14  ;;  %v3009_v24 = vsel %vm6401_vm12, %v2811_v44, %v3008_v9  ;;  %v2407_v29 = vmul.f32 0.125, %v2372_v61  ;;  %v6863_v27 = vsel %vm1120_vm11, %v3345_v62, %v3349_v53  ;;  %v3335_v4 = vshll.u32 %v6819_v19, 16 }
 0x2ff   : > { %3010 = vst [vmem:[#allocation3 + $0x9c] sm:$0xf] %v3009_v24  ;;  %v2819_v30 = vor.u32 %v2817_v5, %v2816_v60  ;;  %v2821_v28 = vrot.slane %v2816_v60, 4  ;;  %v2375_v42 = vpop.xlane.xlu0 %2374 }
 0x300   : > { %v2439_v23 = vadd.f32 1e-08, %v2407_v29  ;;  %v2408_v10 = vmul.f32 0.125, %v2375_v42  ;;  %3622 = vrot.lane.b32.xlu0 %v6770_v3, %s5311_s16  ;;  %v3337_v9 = vrot.slane %v3335_v4, 1 }
 0x301   : > { %v2820_v8 = vsel %vm5420_vm9, %v2812_v36, %v2819_v30  ;;  %v3013_v48 = vsel %vm5985_vm4, %v2821_v28, %v3012_v57  ;;  %v2366_v2 = vpop.xlane.xlu1 %2365  ;;  %3628 = vrot.lane.b32.xlu1 %v6833_v11, %s5311_s16 }
 0x302   : > { %3011 = vst.msk [vmem:[#allocation3 + $0xa0] sm:$0xf] %vm7563_vm8, %v2820_v8  ;;  %3014 = vst [vmem:[#allocation3 + $0xa4] sm:$0x1] %v3013_v48  ;;  %5204 = vrsqrt.f32 %v2439_v23  ;;  %v2440_v3 = vadd.f32 1e-08, %v2408_v10 }
 0x303   : > { %v2405_v54 = vmul.f32 0.125, %v2366_v2  ;;  %v2369_v58 = vpop.xlane.xlu0 %2368 }
 0x304   : > { %5206 = vrsqrt.f32 %v2440_v3  ;;  %v2406_v63 = vmul.f32 0.125, %v2369_v58  ;;  %3706 = vrot.lane.b32.xlu0 %v6778_v55, %s5313_s20  ;;  %v3332_v55 = vrot.slane %v3330_v32, 1  ;;  %v6904_v3 = vld [vmem:[#allocation3 + $0x90] sm:$0xff]  }
 0x305   : > { %v2437_v38 = vadd.f32 1e-08, %v2405_v54  ;;  %v6854_v51 = vpop.permute.xlu1 %3530  ;;  %3509 = vrot.lane.b32.xlu1 %v6852_v49, %s5308_s9  ;;  %v5132_v54 = vld [vmem:[#allocation3 + $0x98] ss:$0 sps:$4 sm:$0x11]  }
 0x306   : > { %v2438_v1 = vadd.f32 1e-08, %v2406_v63  ;;  %v3022_v58 = vld [vmem:[#allocation3 + $0xb4] sm:$0xf] }
 0x307   : > { %5208 = vrsqrt.f32 %v2437_v38  ;;  %v6858_v56 = vpop.permute.xlu0 %3647 }
 0x308   : > { %5210 = vrsqrt.f32 %v2438_v1  ;;  %3587 = vrot.lane.b32.xlu0 %v6791_v45, %s5307_s8  ;;  %v3333_v45 = vor.u32 %v3332_v55, %v3328_v7  ;;  %v3026_v7 = vld [vmem:[#allocation3 + $0xbc] sm:$0x1] }
 0x309   : > { %v6865_v13 = vpop.permute.xlu1 %3612  ;;  %3593 = vrot.lane.b32.xlu1 %v6863_v27, %s5307_s8 }
 0x30a   : > { %v6886_v34 = vsel %vm1120_vm11, %v3333_v45, %v3337_v9  ;;  %v3479_v45 = vrot.slane %v6904_v3, 1 }
 0x30b   : > { %v6871_v20 = vpop.permute.xlu0 %3528 }
 0x30c   : > { %v5205_v47 = vpop.eup %5204  ;;  %3663 = vrot.lane.b32.xlu0 %v6799_v46, %s5310_s13 }
 0x30d   : > { %v2503_v41 = vmul.f32 %v5205_v47, %v6483_v39  ;;  %v6876_v59 = vpop.permute.xlu1 %3493  ;;  %3431 = vrot.lane.b32.xlu1 %v6863_v27, %s5302_s24  ;;  %v6919_v47 = vld [vmem:[#allocation3 + $0x84] sm:$0xff]  }
 0x30e   : > { %v5207_v33 = vpop.eup %5206  ;;  %v3476_v37 = vrot.slane %v6919_v47, 1 }
 0x30f   : > { %v4923_v18 = vpack.c.bf16 %v2503_v41, %v2503_v41  ;;  %v2504_v44 = vmul.f32 %v5207_v33, %v6489_v22  ;;  %v6881_v5 = vpop.permute.xlu0 %3729  ;;  %v3480_v41 = vrot.slane %v5132_v54, 1 }
 0x310   : > { %3544 = vrot.lane.b32.xlu0 %v6815_v16, %s5304_s26 }
 0x311   : > { %v5209_v19 = vpop.eup %5208  ;;  %v2857_v39 = vshrl.u32 %v4923_v18, 16  ;;  %v4924_v40 = vpack.c.bf16 %v2504_v44, %v2504_v44  ;;  %v6889_v60 = vpop.permute.xlu1 %3577  ;;  %3708 = vrot.lane.b32.xlu1 %v6886_v34, %s5313_s20  ;;  %v2860_v25 = vshll.u32 %v4923_v18, 16  ;;  %v5134_v44 = vld [vmem:[#allocation3 + $0x8c] ss:$0 sps:$4 sm:$0x11]  }
 0x312   : > { %v2501_v14 = vmul.f32 %v5209_v19, %v6487_v17  ;;  %v5211_v61 = vpop.eup %5210  ;;  %v3366_v19 = vshll.u32 %v6904_v3, 16 }
 0x313   : > { %v2859_v22 = vrot.slane %v2857_v39, 7  ;;  %v2865_v24 = vshrl.u32 %v4924_v40, 16  ;;  %v6893_v29 = vpop.permute.xlu0 %3495  ;;  %v2502_v36 = vmul.f32 %v5211_v61, %v6496_v26  ;;  %v2868_v28 = vshll.u32 %v4924_v40, 16 }
 0x314   : > { %v4921_v57 = vpack.c.bf16 %v2501_v14, %v2501_v14  ;;  %3745 = vrot.lane.b32.xlu0 %v6833_v11, %s5312_s17  ;;  %v5283_v14 = vld [vmem:[#allocation3] sm:$0xff]  }
 0x315   : > { %v2862_v30 = vor.u32 %v2860_v25, %v2859_v22  ;;  %v2867_v17 = vrot.slane %v2865_v24, 7  ;;  %v6898_v23 = vpop.permute.xlu1 %3415  ;;  %3429 = vrot.lane.b32.xlu1 %v6886_v34, %s5302_s24  ;;  %v2863_v10 = vrot.slane %v2859_v22, 4  ;;  %v4922_v8 = vpack.c.bf16 %v2502_v36, %v2502_v36 }
 0x316   : > { %v2840_v42 = vshrl.u32 %v4921_v57, 16  ;;  %v2843_v52 = vshll.u32 %v4921_v57, 16  ;;  %v3762_v61 = vsel %vm1697_vm14, %v5283_v14, %v6347_v35  ;;  %v6939_v25 = vsel %vm1345_vm10, %v3479_v45, %v3480_v41 }
 0x317   : > { %v3030_v48 = vsel %vm6401_vm12, %v2862_v30, %v3029_v12  ;;  %v2870_v26 = vor.u32 %v2868_v28, %v2867_v17  ;;  %v2872_v2 = vrot.slane %v2867_v17, 4  ;;  %v3611_v43 = vpop.permute.xlu0 %3610  ;;  %v2848_v62 = vshrl.u32 %v4922_v8, 16 }
 0x318   : > { %v2842_v21 = vrot.slane %v2840_v42, 7  ;;  %3031 = vst [vmem:[#allocation3 + $0xc0] sm:$0xf] %v3030_v48  ;;  %3511 = vrot.lane.b32.xlu0 %v6833_v11, %s5308_s9  ;;  %v2851_v55 = vshll.u32 %v4922_v8, 16  ;;  %v3477_v24 = vrot.slane %v5134_v44, 1  ;;  %v3368_v57 = vrot.slane %v3366_v19, 1 }
 0x319   : > { %v2871_v32 = vsel %vm5420_vm9, %v2863_v10, %v2870_v26  ;;  %v3034_v38 = vsel %vm5985_vm4, %v2872_v2, %v3033_v6  ;;  %v6912_v53 = vpop.permute.xlu1 %3534  ;;  %3550 = vrot.lane.b32.xlu1 %v6904_v3, %s5304_s26  ;;  %v2850_v1 = vrot.slane %v2848_v62, 7  ;;  %v3794_v35 = vsel %vm1763_vm0, %v3762_v61, %v6362_v31  ;;  %v7018_v19 = vld [vmem:[#allocation3 + $0x9c] sm:$0xff]  }
 0x31a   : > { %v2845_v63 = vor.u32 %v2843_v52, %v2842_v21  ;;  %3032 = vst.msk [vmem:[#allocation3 + $0xc4] sm:$0xf] %vm7564_vm15, %v2871_v32  ;;  %3035 = vst [vmem:[#allocation3 + $0xc8] sm:$0x1] %v3034_v38  ;;  %v2846_v33 = vrot.slane %v2842_v21, 4  ;;  %v3364_v12 = vshrl.u32 %v6904_v3, 16  ;;  %v6955_v28 = vsel %vm1345_vm10, %v3476_v37, %v3477_v24 }
 0x31b   : > { %v3695_v4 = vpop.permute.xlu0 %3694  ;;  %v2853_v9 = vor.u32 %v2851_v55, %v2850_v1  ;;  %v2855_v18 = vrot.slane %v2850_v1, 4  ;;  %v3371_v36 = vshll.u32 %v5132_v54, 16  ;;  %v3354_v31 = vshll.u32 %v6919_v47, 16 }
 0x31c   : > { %v3023_v11 = vsel %vm6401_vm12, %v2845_v63, %v3022_v58  ;;  %3743 = vrot.lane.b32.xlu0 %v6852_v49, %s5312_s17  ;;  %vm7565_vm12 = vmmov %vm7554_vm1  ;;  %v3369_v42 = vor.u32 %v3368_v57, %v3364_v12  ;;  %vm4063_vm1 = vcmask 588800   ;;  %v3352_v58 = vshrl.u32 %v6919_v47, 16 }
 0x31d   : > { %3024 = vst [vmem:[#allocation3 + $0xb4] sm:$0xf] %v3023_v11  ;;  %v6925_v39 = vpop.permute.xlu1 %3649  ;;  %3665 = vrot.lane.b32.xlu1 %v6919_v47, %s5310_s13  ;;  %v2854_v15 = vsel %vm5420_vm9, %v2846_v33, %v2853_v9  ;;  %v3027_v40 = vsel %vm5985_vm4, %v2855_v18, %v3026_v7  ;;  %vm3889_vm4 = vcmask 326656   ;;  %vm3922_vm9 = vcmask 392192   ;;  %v7008_v33 = vld [vmem:[#allocation3 + $0xa8] sm:$0xff]  }
 0x31e   : > { %3025 = vst.msk [vmem:[#allocation3 + $0xb8] sm:$0xf] %vm7565_vm12, %v2854_v15  ;;  %3028 = vst [vmem:[#allocation3 + $0xbc] sm:$0x1] %v3027_v40  ;;  %v3390_v14 = vshll.u32 %v7008_v33, 16  ;;  %v3482_v57 = vrot.slane %v7018_v19, 1 }
 0x31f   : > { %v3414_v22 = vpop.permute.xlu0 %3413  ;;  %v5142_v40 = vld [vmem:[#allocation3 + $0xa4] ss:$0 sps:$4 sm:$0x11]  }
 0x320   : > { %3626 = vrot.lane.b32.xlu0 %v6852_v49, %s5311_s16  ;;  %v3826_v49 = vsel %vm1829_vm3, %v3794_v35, %v6871_v20  ;;  %v3373_v20 = vrot.slane %v3371_v36, 1  ;;  %v3483_v35 = vrot.slane %v5142_v40, 1  ;;  %v3392_v12 = vrot.slane %v3390_v14, 1 }
 0x321   : > { %v6942_v0 = vpop.permute.xlu1 %3616  ;;  %3632 = vrot.lane.b32.xlu1 %v6939_v25, %s5311_s16 }
 0x322   : > { %v6972_v2 = vsel %vm1120_vm11, %v3369_v42, %v3373_v20  ;;  %v3378_v20 = vshll.u32 %v7018_v19, 16 }
 0x323   : > { %v3576_v30 = vpop.permute.xlu0 %3575 }
 0x324   : > { %v3858_v17 = vsel %vm1895_vm6, %v3826_v49, %v3576_v30  ;;  %3710 = vrot.lane.b32.xlu0 %v6863_v27, %s5313_s20  ;;  %v5284_v27 = vld [vmem:[#allocation3 + $0xc] sm:$0xff]   ;;  %v3388_v30 = vshrl.u32 %v7008_v33, 16 }
 0x325   : > { %v3891_v10 = vsel %vm3889_vm4, %v3858_v17, %v3611_v43  ;;  %v6959_v6 = vpop.permute.xlu1 %3497  ;;  %3513 = vrot.lane.b32.xlu1 %v6955_v28, %s5308_s9  ;;  %v3764_v8 = vsel %vm1697_vm14, %v5284_v27, %v3414_v22  ;;  %v3356_v43 = vrot.slane %v3354_v31, 1  ;;  %v5285_v22 = vld [vmem:[#allocation3 + $0x18] sm:$0xff]   ;;  %v3484_v31 = vsel %vm1345_vm10, %v3482_v57, %v3483_v35 }
 0x326   : > { %v3924_v52 = vsel %vm3922_vm9, %v3891_v10, %v6858_v56  ;;  %v3796_v56 = vsel %vm1763_vm0, %v3764_v8, %v6876_v59  ;;  %v3393_v10 = vor.u32 %v3392_v12, %v3388_v30  ;;  %v7100_v14 = vld [vmem:[#allocation3 + $0xb4] sm:$0xff]  }
 0x327   : > { %v6966_v48 = vpop.permute.xlu0 %3651  ;;  %v3957_v26 = vsel %vm3955_vm2, %v3924_v52, %v3695_v4  ;;  %v3357_v32 = vor.u32 %v3356_v43, %v3352_v58  ;;  %v5286_v58 = vld [vmem:[#allocation3 + $0x24] sm:$0xff]  }
 0x328   : > { %3591 = vrot.lane.b32.xlu0 %v6886_v34, %s5307_s8  ;;  %v3990_v21 = vsel %vm3988_vm5, %v3957_v26, %v6881_v5  ;;  %v3359_v34 = vshll.u32 %v5134_v44, 16  ;;  %v3828_v5 = vsel %vm1829_vm3, %v3796_v56, %v6854_v51  ;;  %v3380_v56 = vrot.slane %v3378_v20, 1 }
 0x329   : > { %v6976_v54 = vpop.permute.xlu1 %3581  ;;  %3597 = vrot.lane.b32.xlu1 %v6972_v2, %s5307_s8  ;;  %5013 = vmatprep.mubr.msk.bf16.mxu1 %vm4063_vm1, %v3990_v21  ;;  %v3860_v59 = vsel %vm1895_vm6, %v3828_v5, %v6889_v60 }
 0x32a   : > { %v3361_v63 = vrot.slane %v3359_v34, 1  ;;  %v3893_v51 = vsel %vm3889_vm4, %v3860_v59, %v6865_v13  ;;  %v5141_v13 = vld [vmem:[#allocation3 + $0xb0] ss:$0 sps:$4 sm:$0x11]  }
 0x32b   : > { %v3533_v62 = vpop.permute.xlu0 %3532  ;;  %v3926_v45 = vsel %vm3922_vm9, %v3893_v51, %v6925_v39  ;;  %v3485_v39 = vrot.slane %v7008_v33, 1  ;;  %v3486_v15 = vrot.slane %v5141_v13, 1 }
 0x32c   : > { %3667 = vrot.lane.b32.xlu0 %v6904_v3, %s5310_s13  ;;  %v3362_v55 = vsel %vm1120_vm11, %v3357_v32, %v3361_v63  ;;  %v3383_v32 = vshll.u32 %v5142_v40, 16 }
 0x32d   : > { %v6988_v38 = vpop.permute.xlu1 %3419  ;;  %3435 = vrot.lane.b32.xlu1 %v6972_v2, %s5302_s24  ;;  %v3487_v24 = vsel %vm1345_vm10, %v3485_v39, %v3486_v15  ;;  %v7091_v39 = vld [vmem:[#allocation3 + $0xc0] sm:$0xff]  }
 0x32f   : > { %v3734_v1 = vpop.permute.xlu0 %3733 }
 0x330   : > { %3548 = vrot.lane.b32.xlu0 %v6919_v47, %s5304_s26 }
 0x331   : > { %v3697_v11 = vpop.permute.xlu1 %3696  ;;  %3712 = vrot.lane.b32.xlu1 %v3362_v55, %s5313_s20 }
 0x332   : > { %v3959_v60 = vsel %vm3955_vm2, %v3926_v45, %v3697_v11 }
 0x333   : > { %v7000_v7 = vpop.permute.xlu0 %3499 }
 0x334   : > { %3749 = vrot.lane.b32.xlu0 %v6939_v25, %s5312_s17 }
 0x335   : > { %v3418_v4 = vpop.permute.xlu1 %3417  ;;  %3433 = vrot.lane.b32.xlu1 %v3362_v55, %s5302_s24 }
 0x336   : > { %v3768_v34 = vsel %vm1697_vm14, %v5286_v58, %v3418_v4 }
 0x337   : > { %v3732_v41 = vpop.permute.xlu0 %3731  ;;  %v3800_v63 = vsel %vm1763_vm0, %v3768_v34, %v6959_v6 }
 0x338   : > { %v3992_v9 = vsel %vm3988_vm5, %v3959_v60, %v3732_v41  ;;  %3515 = vrot.lane.b32.xlu0 %v6939_v25, %s5308_s9  ;;  %v3766_v25 = vsel %vm1697_vm14, %v5285_v22, %v6898_v23  ;;  %v3395_v23 = vshll.u32 %v5141_v13, 16  ;;  %v3832_v11 = vsel %vm1829_vm3, %v3800_v63, %v6912_v53 }
 0x339   : > { %v7013_v18 = vpop.permute.xlu1 %3538  ;;  %3554 = vrot.lane.b32.xlu1 %v7008_v33, %s5304_s26  ;;  %5014 = vmatmul.mubr.msk.bf16.vlgmr.msra.gmra.mrb[0].mxu1 %vm4063_vm1, %v3992_v9  ;;  %v3798_v49 = vsel %vm1763_vm0, %v3766_v25, %v6893_v29  ;;  %v3864_v45 = vsel %vm1895_vm6, %v3832_v11, %v6976_v54  ;;  %v5145_v54 = vld [vmem:[#allocation3 + $0xc8] ss:$0 sps:$4 sm:$0x11]   ;;  %v3607_v22 = vrot.slane %v7091_v39, 1 }
 0x33a   : > { %v3830_v17 = vsel %vm1829_vm3, %v3798_v49, %v3533_v62  ;;  %v3397_v8 = vrot.slane %v3395_v23, 1  ;;  %v3897_v53 = vsel %vm3889_vm4, %v3864_v45, %v6942_v0  ;;  %v3608_v25 = vrot.slane %v5145_v54, 1 }
 0x33b   : > { %v3615_v44 = vpop.permute.xlu0 %3614  ;;  %v3488_v49 = vrot.slane %v7100_v14, 1  ;;  %v3402_v23 = vshll.u32 %v7100_v14, 16  ;;  %v3571_v20 = vshll.u32 %v5145_v54, 16 }
 0x33c   : > { %3747 = vrot.lane.b32.xlu0 %v6955_v28, %s5312_s17  ;;  %v7111_v12 = vsel %vm1345_vm10, %v3607_v22, %v3608_v25 }
 0x33d   : > { %v3654_v61 = vpop.permute.xlu1 %3653  ;;  %3669 = vrot.lane.b32.xlu1 %v7018_v19, %s5310_s13 }
 0x33e   : > { %v3930_v9 = vsel %vm3922_vm9, %v3897_v53, %v3654_v61  ;;  %v3566_v61 = vshll.u32 %v7091_v39, 16  ;;  %v5289_v53 = vld [vmem:[#allocation3 + $0x3c] sm:$0xff]  }
 0x33f   : > { %v3699_v37 = vpop.permute.xlu0 %3698 }
 0x340   : > { %3630 = vrot.lane.b32.xlu0 %v6955_v28, %s5311_s16  ;;  %v3568_v35 = vrot.slane %v3566_v61, 1 }
 0x341   : > { %v7032_v36 = vpop.permute.xlu1 %3620  ;;  %3636 = vrot.lane.b32.xlu1 %v3487_v24, %s5311_s16 }
 0x343   : > { %v3580_v42 = vpop.permute.xlu0 %3579 }
 0x344   : > { %v3862_v28 = vsel %vm1895_vm6, %v3830_v17, %v3580_v42  ;;  %3714 = vrot.lane.b32.xlu0 %v6972_v2, %s5313_s20  ;;  %v7055_v2 = vsel %vm1120_vm11, %v3393_v10, %v3397_v8  ;;  %v5287_v17 = vld [vmem:[#allocation3 + $0x30] sm:$0xff]   ;;  %v3564_v10 = vshrl.u32 %v7091_v39, 16 }
 0x345   : > { %v3895_v52 = vsel %vm3889_vm4, %v3862_v28, %v3615_v44  ;;  %v7045_v27 = vpop.permute.xlu1 %3501  ;;  %3517 = vrot.lane.b32.xlu1 %v3484_v31, %s5308_s9  ;;  %v3770_v42 = vsel %vm1697_vm14, %v5287_v17, %v6988_v38 }
 0x346   : > { %v3928_v29 = vsel %vm3922_vm9, %v3895_v52, %v6966_v48  ;;  %v3376_v48 = vshrl.u32 %v7018_v19, 16 }
 0x347   : > { %v7050_v26 = vpop.permute.xlu0 %3655  ;;  %v3961_v21 = vsel %vm3955_vm2, %v3928_v29, %v3699_v37  ;;  %v5146_v37 = vld [vmem:[#allocation3 + $0xbc] ss:$0 sps:$4 sm:$0x11]  }
 0x348   : > { %3595 = vrot.lane.b32.xlu0 %v3362_v55, %s5307_s8  ;;  %v3994_v43 = vsel %vm3988_vm5, %v3961_v21, %v3734_v1  ;;  %v3381_v1 = vor.u32 %v3380_v56, %v3376_v48  ;;  %v3385_v55 = vrot.slane %v3383_v32, 1  ;;  %v3489_v30 = vrot.slane %v5146_v37, 1 }
 0x349   : > { %v7059_v62 = vpop.permute.xlu1 %3585  ;;  %3601 = vrot.lane.b32.xlu1 %v7055_v2, %s5307_s8  ;;  %5017 = vmatprep.mubr.msk.bf16.mxu1 %vm4063_vm1, %v3994_v43  ;;  %v3569_v21 = vor.u32 %v3568_v35, %v3564_v10  ;;  %v3404_v43 = vrot.slane %v3402_v23, 1  ;;  %v3573_v32 = vrot.slane %v3571_v20, 1  ;;  %v3407_v63 = vshll.u32 %v5146_v37, 16 }
 0x34a   : > { %v3386_v6 = vsel %vm1120_vm11, %v3381_v1, %v3385_v55  ;;  %v3490_v38 = vsel %vm1345_vm10, %v3488_v49, %v3489_v30 }
 0x34b   : > { %v3537_v5 = vpop.permute.xlu0 %3536  ;;  %v3574_v11 = vsel %vm1120_vm11, %v3569_v21, %v3573_v32 }
 0x34c   : > { %3671 = vrot.lane.b32.xlu0 %v7008_v33, %s5310_s13 }
 0x34d   : > { %v7069_v59 = vpop.permute.xlu1 %3423  ;;  %3439 = vrot.lane.b32.xlu1 %v7055_v2, %s5302_s24 }
 0x34f   : > { %v7075_v51 = vpop.permute.xlu0 %3737 }
 0x350   : > { %3552 = vrot.lane.b32.xlu0 %v7018_v19, %s5304_s26 }
 0x351   : > { %v3701_v4 = vpop.permute.xlu1 %3700  ;;  %3716 = vrot.lane.b32.xlu1 %v3386_v6, %s5313_s20 }
 0x352   : > { %v3963_v13 = vsel %vm3955_vm2, %v3930_v9, %v3701_v4 }
 0x353   : > { %v7083_v60 = vpop.permute.xlu0 %3503 }
 0x354   : > { %3753 = vrot.lane.b32.xlu0 %v3487_v24, %s5312_s17 }
 0x355   : > { %v3422_v41 = vpop.permute.xlu1 %3421  ;;  %3437 = vrot.lane.b32.xlu1 %v3386_v6, %s5302_s24 }
 0x356   : > { %v3772_v9 = vsel %vm1697_vm14, %v5289_v53, %v3422_v41 }
 0x357   : > { %v3736_v44 = vpop.permute.xlu0 %3735 }
 0x358   : > { %v3996_v15 = vsel %vm3988_vm5, %v3963_v13, %v3736_v44  ;;  %3519 = vrot.lane.b32.xlu0 %v3487_v24, %s5308_s9  ;;  %v3409_v13 = vrot.slane %v3407_v63, 1 }
 0x359   : > { %v7095_v40 = vpop.permute.xlu1 %3542  ;;  %3558 = vrot.lane.b32.xlu1 %v7091_v39, %s5304_s26  ;;  %5018 = vmatmul.mubr.msk.bf16.gmra.mrb[4].mxu1 %vm4063_vm1, %v3996_v15 }
 0x35b   : > { %v3619_v0 = vpop.permute.xlu0 %3618 }
 0x35c   : > { %3751 = vrot.lane.b32.xlu0 %v3484_v31, %s5312_s17 }
 0x35d   : > { %v7105_v24 = vpop.permute.xlu1 %3657  ;;  %3673 = vrot.lane.b32.xlu1 %v7100_v14, %s5310_s13 }
 0x35f   : > { %v3703_v57 = vpop.permute.xlu0 %3702 }
 0x360   : > { %3634 = vrot.lane.b32.xlu0 %v3484_v31, %s5311_s16  ;;  %v3802_v31 = vsel %vm1763_vm0, %v3770_v42, %v7000_v7  ;;  %v5288_v7 = vld [vmem:[#allocation3 + $0xcc] sm:$0xff]  }
 0x361   : > { %v7117_v28 = vpop.permute.xlu1 %3624  ;;  %3640 = vrot.lane.b32.xlu1 %v7111_v12, %s5311_s16  ;;  %v3834_v52 = vsel %vm1829_vm3, %v3802_v31, %v3537_v5  ;;  %v3685_v34 = vshll.u32 %v5288_v7, 16  ;;  %v3400_v5 = vshrl.u32 %v7100_v14, 16  ;;  %v3683_v44 = vshrl.u32 %v5288_v7, 16 }
 0x362   : > { %v3726_v35 = vrot.slane %v5288_v7, 1 }
 0x363   : > { %v3584_v29 = vpop.permute.xlu0 %3583  ;;  %v3405_v45 = vor.u32 %v3404_v43, %v3400_v5  ;;  %v3687_v15 = vrot.slane %v3685_v34, 1 }
 0x364   : > { %v3866_v8 = vsel %vm1895_vm6, %v3834_v52, %v3584_v29  ;;  %3718 = vrot.lane.b32.xlu0 %v7055_v2, %s5313_s20  ;;  %v5147_v2 = vld [vmem:[#allocation3 + $0xd4] ss:$0 sps:$4 sm:$0x11]   ;;  %v5290_v29 = vld [vmem:[#allocation3 + $0x48] sm:$0xff]  }
 0x365   : > { %v3899_v56 = vsel %vm3889_vm4, %v3866_v8, %v3619_v0  ;;  %v7130_v58 = vpop.permute.xlu1 %3505  ;;  %3521 = vrot.lane.b32.xlu1 %v3490_v38, %s5308_s9  ;;  %v3690_v54 = vshll.u32 %v5147_v2, 16  ;;  %v3804_v0 = vsel %vm1763_vm0, %v3772_v9, %v7045_v27  ;;  %v3688_v61 = vor.u32 %v3687_v15, %v3683_v44 }
 0x366   : > { %v3932_v48 = vsel %vm3922_vm9, %v3899_v56, %v7050_v26  ;;  %v3836_v25 = vsel %vm1829_vm3, %v3804_v0, %v7013_v18  ;;  %v3727_v49 = vrot.slane %v5147_v2, 1  ;;  %v3774_v8 = vsel %vm1697_vm14, %v5290_v29, %v7069_v59  ;;  %v5291_v2 = vld [vmem:[#allocation3 + $0x54] sm:$0xff]  }
 0x367   : > { %v3660_v1 = vpop.permute.xlu0 %3659  ;;  %v3965_v55 = vsel %vm3955_vm2, %v3932_v48, %v3703_v57  ;;  %v3692_v22 = vrot.slane %v3690_v54, 1  ;;  %v3868_v27 = vsel %vm1895_vm6, %v3836_v25, %v7059_v62  ;;  %v5292_v25 = vld [vmem:[#allocation3 + $0x60] sm:$0xff]  }
 0x368   : > { %3599 = vrot.lane.b32.xlu0 %v3386_v6, %s5307_s8  ;;  %v3998_v4 = vsel %vm3988_vm5, %v3965_v55, %v7075_v51  ;;  %v3410_v51 = vsel %vm1120_vm11, %v3405_v45, %v3409_v13  ;;  %v3901_v18 = vsel %vm3889_vm4, %v3868_v27, %v7032_v36  ;;  %v3728_v42 = vsel %vm1345_vm10, %v3726_v35, %v3727_v49 }
 0x369   : > { %v7142_v26 = vpop.permute.xlu1 %3589  ;;  %3605 = vrot.lane.b32.xlu1 %v3574_v11, %s5307_s8  ;;  %5021 = vmatprep.mubr.msk.bf16.mxu1 %vm4063_vm1, %v3998_v4  ;;  %v3934_v17 = vsel %vm3922_vm9, %v3901_v18, %v7105_v24 }
 0x36b   : > { %v3541_v6 = vpop.permute.xlu0 %3540 }
 0x36c   : > { %3675 = vrot.lane.b32.xlu0 %v7091_v39, %s5310_s13  ;;  %v3693_v39 = vsel %vm1120_vm11, %v3688_v61, %v3692_v22 }
 0x36d   : > { %v7151_v41 = vpop.permute.xlu1 %3427  ;;  %3720 = vrot.lane.b32.xlu1 %v3410_v51, %s5313_s20 }
 0x36f   : > { %v3742_v37 = vpop.permute.xlu0 %3741 }
 0x370   : > { %3556 = vrot.lane.b32.xlu0 %v7100_v14, %s5304_s26 }
 0x371   : > { %v3705_v57 = vpop.permute.xlu1 %3704  ;;  %3441 = vrot.lane.b32.xlu1 %v3410_v51, %s5302_s24 }
 0x372   : > { %v3967_v62 = vsel %vm3955_vm2, %v3934_v17, %v3705_v57 }
 0x373   : > { %v3508_v30 = vpop.permute.xlu0 %3507 }
 0x374   : > { %3755 = vrot.lane.b32.xlu0 %v3490_v38, %s5312_s17 }
 0x375   : > { %v3426_v23 = vpop.permute.xlu1 %3425  ;;  %3724 = vrot.lane.b32.xlu1 %v3693_v39, %s5313_s20 }
 0x377   : > { %v3740_v31 = vpop.permute.xlu0 %3739 }
 0x378   : > { %v4000_v10 = vsel %vm3988_vm5, %v3967_v62, %v3740_v31  ;;  %3638 = vrot.lane.b32.xlu0 %v3490_v38, %s5311_s16  ;;  %v3806_v38 = vsel %vm1763_vm0, %v3774_v8, %v7083_v60  ;;  %v3776_v60 = vsel %vm1697_vm14, %v5291_v2, %v3426_v23 }
 0x379   : > { %v7172_v20 = vpop.permute.xlu1 %3546  ;;  %5022 = vmatmul.mubr.msk.bf16.gmra.mrb[8].mxu1 %vm4063_vm1, %v4000_v10  ;;  %3759 = vrot.lane.b32.xlu1 %v3728_v42, %s5312_s17  ;;  %v3838_v43 = vsel %vm1829_vm3, %v3806_v38, %v3541_v6 }
 0x37b   : > { %v3623_v36 = vpop.permute.xlu0 %3622 }
 0x37c   : > { %3722 = vrot.lane.b32.xlu0 %v3574_v11, %s5313_s20 }
 0x37d   : > { %v3662_v52 = vpop.permute.xlu1 %3661 }
 0x37f   : > { %v3707_v24 = vpop.permute.xlu0 %3706 }
 0x380   : > { %3603 = vrot.lane.b32.xlu0 %v3410_v51, %s5307_s8  ;;  %s4892_s8 = sshll.u32 %s7567_s19, 4 }
 0x381   : > { %v3629_v21 = vpop.permute.xlu1 %3628  ;;  %s224_s11 = scalar_lea.vmem %s7527_s5, %s4892_s8 }
 0x383   : > { %v3588_v56 = vpop.permute.xlu0 %3587 }
 0x384   : > { %v3870_v7 = vsel %vm1895_vm6, %v3838_v43, %v3588_v56  ;;  %3757 = vrot.lane.b32.xlu0 %v7111_v12, %s5312_s17  ;;  %v3808_v12 = vsel %vm1763_vm0, %v3776_v60, %v7130_v58 }
 0x385   : > { %v3903_v34 = vsel %vm3889_vm4, %v3870_v7, %v3623_v36  ;;  %v3510_v48 = vpop.permute.xlu1 %3509  ;;  %v3840_v45 = vsel %vm1829_vm3, %v3808_v12, %v7095_v40 }
 0x386   : > { %v3936_v32 = vsel %vm3922_vm9, %v3903_v34, %v3660_v1  ;;  %v3872_v9 = vsel %vm1895_vm6, %v3840_v45, %v7142_v26  ;;  %v3778_v26 = vsel %vm1697_vm14, %v5292_v25, %v7151_v41 }
 0x387   : > { %v3664_v5 = vpop.permute.xlu0 %3663  ;;  %v3969_v59 = vsel %vm3955_vm2, %v3936_v32, %v3707_v24  ;;  %v3905_v44 = vsel %vm3889_vm4, %v3872_v9, %v7117_v28  ;;  %v3810_v28 = vsel %vm1763_vm0, %v3778_v26, %v3508_v30 }
 0x388   : > { %v4002_v63 = vsel %vm3988_vm5, %v3969_v59, %v3742_v37  ;;  %v3938_v54 = vsel %vm3922_vm9, %v3905_v44, %v3662_v52 }
 0x389   : > { %v3594_v55 = vpop.permute.xlu1 %3593  ;;  %5025 = vmatprep.mubr.msk.bf16.mxu1 %vm4063_vm1, %v4002_v63 }
 0x38b   : > { %v3545_v11 = vpop.permute.xlu0 %3544 }
 0x38c   : > { %v3842_v57 = vsel %vm1829_vm3, %v3810_v28, %v3545_v11 }
 0x38d   : > { %v3432_v4 = vpop.permute.xlu1 %3431 }
 0x38e   : > { %v3782_v59 = vsel %vm1697_vm14, %v6799_v46, %v3432_v4 }
 0x38f   : > { %v3746_v1 = vpop.permute.xlu0 %3745 }
 0x391   : > { %v3709_v53 = vpop.permute.xlu1 %3708 }
 0x392   : > { %v3971_v6 = vsel %vm3955_vm2, %v3938_v54, %v3709_v53 }
 0x393   : > { %v3512_v13 = vpop.permute.xlu0 %3511 }
 0x395   : > { %v3430_v15 = vpop.permute.xlu1 %3429 }
 0x396   : > { %v3780_v41 = vsel %vm1697_vm14, %v6815_v16, %v3430_v15 }
 0x397   : > { %v3744_v0 = vpop.permute.xlu0 %3743  ;;  %v3812_v31 = vsel %vm1763_vm0, %v3780_v41, %v3510_v48 }
 0x398   : > { %v4004_v58 = vsel %vm3988_vm5, %v3971_v6, %v3744_v0  ;;  %v3844_v36 = vsel %vm1829_vm3, %v3812_v31, %v7172_v20 }
 0x399   : > { %v3551_v51 = vpop.permute.xlu1 %3550  ;;  %5026 = vmatmul.mubr.msk.bf16.gmra.mrb[12].mxu1 %vm4063_vm1, %v4004_v58  ;;  %v3876_v29 = vsel %vm1895_vm6, %v3844_v36, %v3594_v55 }
 0x39a   : > { %v3909_v38 = vsel %vm3889_vm4, %v3876_v29, %v3629_v21  ;;  %v3814_v21 = vsel %vm1763_vm0, %v3782_v59, %v3512_v13 }
 0x39b   : > { %v3627_v40 = vpop.permute.xlu0 %3626 }
 0x39d   : > { %v3666_v61 = vpop.permute.xlu1 %3665 }
 0x39e   : > { %v3942_v16 = vsel %vm3922_vm9, %v3909_v38, %v3666_v61 }
 0x39f   : > { %v3711_v22 = vpop.permute.xlu0 %3710 }
 0x3a1   : > { %v3633_v37 = vpop.permute.xlu1 %3632 }
 0x3a3   : > { %v3592_v27 = vpop.permute.xlu0 %3591 }
 0x3a4   : > { %v3874_v39 = vsel %vm1895_vm6, %v3842_v57, %v3592_v27 }
 0x3a5   : > { %v3907_v35 = vsel %vm3889_vm4, %v3874_v39, %v3627_v40  ;;  %v3514_v49 = vpop.permute.xlu1 %3513 }
 0x3a6   : > { %v3940_v18 = vsel %vm3922_vm9, %v3907_v35, %v3664_v5 }
 0x3a7   : > { %v3668_v23 = vpop.permute.xlu0 %3667  ;;  %v3973_v17 = vsel %vm3955_vm2, %v3940_v18, %v3711_v22 }
 0x3a8   : > { %v4006_v42 = vsel %vm3988_vm5, %v3973_v17, %v3746_v1 }
 0x3a9   : > { %v3598_v62 = vpop.permute.xlu1 %3597  ;;  %5029 = vmatprep.mubr.msk.bf16.mxu1 %vm4063_vm1, %v4006_v42 }
 0x3ab   : > { %v3549_v30 = vpop.permute.xlu0 %3548 }
 0x3ac   : > { %v3846_v2 = vsel %vm1829_vm3, %v3814_v21, %v3549_v30 }
 0x3ad   : > { %v3436_v10 = vpop.permute.xlu1 %3435 }
 0x3af   : > { %v3750_v52 = vpop.permute.xlu0 %3749 }
 0x3b1   : > { %v3713_v24 = vpop.permute.xlu1 %3712 }
 0x3b2   : > { %v3975_v56 = vsel %vm3955_vm2, %v3942_v16, %v3713_v24 }
 0x3b3   : > { %v3516_v8 = vpop.permute.xlu0 %3515 }
 0x3b5   : > { %v3434_v43 = vpop.permute.xlu1 %3433 }
 0x3b6   : > { %v3784_v46 = vsel %vm1697_vm14, %v6919_v47, %v3434_v43 }
 0x3b7   : > { %v3748_v7 = vpop.permute.xlu0 %3747  ;;  %v3816_v44 = vsel %vm1763_vm0, %v3784_v46, %v3514_v49 }
 0x3b8   : > { %v4008_v34 = vsel %vm3988_vm5, %v3975_v56, %v3748_v7  ;;  %v3848_v54 = vsel %vm1829_vm3, %v3816_v44, %v3551_v51 }
 0x3b9   : > { %v3555_v48 = vpop.permute.xlu1 %3554  ;;  %5030 = vmatmul.mubr.msk.bf16.gmra.mrb[16].mxu1 %vm4063_vm1, %v4008_v34  ;;  %v3880_v58 = vsel %vm1895_vm6, %v3848_v54, %v3598_v62 }
 0x3ba   : > { %v3913_v61 = vsel %vm3889_vm4, %v3880_v58, %v3633_v37  ;;  %v3786_v37 = vsel %vm1697_vm14, %v6904_v3, %v3436_v10 }
 0x3bb   : > { %v3631_v32 = vpop.permute.xlu0 %3630  ;;  %v3818_v18 = vsel %vm1763_vm0, %v3786_v37, %v3516_v8 }
 0x3bd   : > { %v3670_v20 = vpop.permute.xlu1 %3669 }
 0x3be   : > { %v3946_v25 = vsel %vm3922_vm9, %v3913_v61, %v3670_v20 }
 0x3bf   : > { %v3715_v5 = vpop.permute.xlu0 %3714 }
 0x3c1   : > { %v3637_v63 = vpop.permute.xlu1 %3636 }
 0x3c3   : > { %v3596_v60 = vpop.permute.xlu0 %3595 }
 0x3c4   : > { %v3878_v55 = vsel %vm1895_vm6, %v3846_v2, %v3596_v60 }
 0x3c5   : > { %v3911_v11 = vsel %vm3889_vm4, %v3878_v55, %v3631_v32  ;;  %v3518_v12 = vpop.permute.xlu1 %3517 }
 0x3c6   : > { %v3944_v45 = vsel %vm3922_vm9, %v3911_v11, %v3668_v23 }
 0x3c7   : > { %v3672_v1 = vpop.permute.xlu0 %3671  ;;  %v3977_v53 = vsel %vm3955_vm2, %v3944_v45, %v3715_v5 }
 0x3c8   : > { %v4010_v9 = vsel %vm3988_vm5, %v3977_v53, %v3750_v52 }
 0x3c9   : > { %v3602_v4 = vpop.permute.xlu1 %3601  ;;  %5033 = vmatprep.mubr.msk.bf16.mxu1 %vm4063_vm1, %v4010_v9 }
 0x3cb   : > { %v3553_v13 = vpop.permute.xlu0 %3552 }
 0x3cc   : > { %v3850_v23 = vsel %vm1829_vm3, %v3818_v18, %v3553_v13 }
 0x3cd   : > { %v3440_v15 = vpop.permute.xlu1 %3439 }
 0x3ce   : > { %v3790_v60 = vsel %vm1697_vm14, %v7008_v33, %v3440_v15 }
 0x3cf   : > { %v3754_v6 = vpop.permute.xlu0 %3753 }
 0x3d1   : > { %v3717_v0 = vpop.permute.xlu1 %3716 }
 0x3d2   : > { %v3979_v47 = vsel %vm3955_vm2, %v3946_v25, %v3717_v0 }
 0x3d3   : > { %v3520_v40 = vpop.permute.xlu0 %3519 }
 0x3d4   : > { %v3822_v55 = vsel %vm1763_vm0, %v3790_v60, %v3520_v40 }
 0x3d5   : > { %v3438_v22 = vpop.permute.xlu1 %3437 }
 0x3d6   : > { %v3788_v35 = vsel %vm1697_vm14, %v7018_v19, %v3438_v22 }
 0x3d7   : > { %v3752_v26 = vpop.permute.xlu0 %3751  ;;  %v3820_v17 = vsel %vm1763_vm0, %v3788_v35, %v3518_v12 }
 0x3d8   : > { %v4012_v28 = vsel %vm3988_vm5, %v3979_v47, %v3752_v26  ;;  %v3852_v31 = vsel %vm1829_vm3, %v3820_v17, %v3555_v48 }
 0x3d9   : > { %v3559_v57 = vpop.permute.xlu1 %3558  ;;  %5034 = vmatmul.mubr.msk.bf16.gmra.mrb[20].mxu1 %vm4063_vm1, %v4012_v28  ;;  %v3884_v52 = vsel %vm1895_vm6, %v3852_v31, %v3602_v4 }
 0x3da   : > { %v3917_v8 = vsel %vm3889_vm4, %v3884_v52, %v3637_v63 }
 0x3db   : > { %v3635_v27 = vpop.permute.xlu0 %3634 }
 0x3dd   : > { %v3674_v51 = vpop.permute.xlu1 %3673 }
 0x3de   : > { %v3950_v38 = vsel %vm3922_vm9, %v3917_v8, %v3674_v51 }
 0x3df   : > { %v3719_v39 = vpop.permute.xlu0 %3718 }
 0x3e1   : > { %v3641_v49 = vpop.permute.xlu1 %3640 }
 0x3e3   : > { %v3600_v42 = vpop.permute.xlu0 %3599 }
 0x3e4   : > { %v3882_v41 = vsel %vm1895_vm6, %v3850_v23, %v3600_v42 }
 0x3e5   : > { %v3915_v62 = vsel %vm3889_vm4, %v3882_v41, %v3635_v27  ;;  %v3522_v30 = vpop.permute.xlu1 %3521 }
 0x3e6   : > { %v3948_v19 = vsel %vm3922_vm9, %v3915_v62, %v3672_v1 }
 0x3e7   : > { %v3676_v36 = vpop.permute.xlu0 %3675  ;;  %v3981_v3 = vsel %vm3955_vm2, %v3948_v19, %v3719_v39 }
 0x3e8   : > { %v4014_v10 = vsel %vm3988_vm5, %v3981_v3, %v3754_v6 }
 0x3e9   : > { %v3606_v24 = vpop.permute.xlu1 %3605  ;;  %5037 = vmatprep.mubr.msk.bf16.mxu1 %vm4063_vm1, %v4014_v10 }
 0x3eb   : > { %v3557_v29 = vpop.permute.xlu0 %3556 }
 0x3ec   : > { %v3854_v11 = vsel %vm1829_vm3, %v3822_v55, %v3557_v29 }
 0x3ed   : > { %v3721_v43 = vpop.permute.xlu1 %3720 }
 0x3ee   : > { %v3983_v16 = vsel %vm3955_vm2, %v3950_v38, %v3721_v43 }
 0x3ef   : > { %v3756_v56 = vpop.permute.xlu0 %3755 }
 0x3f0   : > { %v4016_v7 = vsel %vm3988_vm5, %v3983_v16, %v3756_v56 }
 0x3f1   : > { %v3442_v34 = vpop.permute.xlu1 %3441  ;;  %5038 = vmatmul.mubr.msk.bf16.gmra.mrb[24].mxu1 %vm4063_vm1, %v4016_v7 }
 0x3f2   : > { %v3792_v48 = vsel %vm1697_vm14, %v7100_v14, %v3442_v34 }
 0x3f3   : > { %v3824_v32 = vsel %vm1763_vm0, %v3792_v48, %v3522_v30  ;;  %v3639_v20 = vpop.permute.xlu0 %3638 }
 0x3f4   : > { %v3856_v5 = vsel %vm1829_vm3, %v3824_v32, %v3559_v57 }
 0x3f5   : > { %v3888_v59 = vsel %vm1895_vm6, %v3856_v5, %v3606_v24  ;;  %v3725_v2 = vpop.permute.xlu1 %3724 }
 0x3f6   : > { %v3921_v21 = vsel %vm3889_vm4, %v3888_v59, %v3641_v49 }
 0x3f7   : > { %v3723_v63 = vpop.permute.xlu0 %3722  ;;  %v3954_v14 = vsel %vm3922_vm9, %v3921_v21, %v6369_v50  ;;  %v7289_v50 = vld [vmem:[%s7526_s4] ss:$0 sm:$0xff] }
 0x3f8   : > { %v3987_v53 = vsel %vm3955_vm2, %v3954_v14, %v3725_v2 }
 0x3f9   : > { %v3760_v9 = vpop.permute.xlu1 %3759 }
 0x3fa   : > { %v4020_v44 = vsel %vm3988_vm5, %v3987_v53, %v3760_v9 }
 0x3fb   : > { %v3604_v12 = vpop.permute.xlu0 %3603 }
 0x3fc   : > { %v3886_v45 = vsel %vm1895_vm6, %v3854_v11, %v3604_v12 }
 0x3fd   : > { %v3919_v1 = vsel %vm3889_vm4, %v3886_v45, %v3639_v20 }
 0x3fe   : > { %v3952_v46 = vsel %vm3922_vm9, %v3919_v1, %v3676_v36 }
 0x3ff   : > { %v3985_v4 = vsel %vm3955_vm2, %v3952_v46, %v3723_v63  ;;  %v3758_v33 = vpop.permute.xlu0 %3757 }
 0x400   : > { %v4018_v13 = vsel %vm3988_vm5, %v3985_v4, %v3758_v33 }
 0x401   : > { %5041 = vmatprep.mubr.msk.bf16.mxu1 %vm4063_vm1, %v4018_v13 }
 0x402   : > { %5042 = vmatmul.mubr.msk.bf16.gmra.mrb[28].mxu1 %vm4063_vm1, %v4020_v44 }
 0x40c   : > { %v5015_v15 = vpop.f32.mrb[0].mxu1 }
 0x40d   : > { %v4143_v54 = vadd.f32 %v5015_v15, %v7289_v50  ;;  %v4134_v6 = vpop.f32.mrb[1].mxu1 }
 0x40e   : > { %v4135_v0 = vadd.f32 %v7289_v50, %v4134_v6  ;;  %v5016_v58 = vpop.f32.mrb[2].mxu1 }
 0x40f   : > { %vm4263_vm10 = vcmp.ge.f32.partialorder %v4143_v54, 0.0  ;;  %v4295_v40 = vmul.f32 0.2, %v4143_v54  ;;  %v4146_v61 = vadd.f32 %v5016_v58, %v7289_v50  ;;  %v4137_v22 = vpop.f32.mrb[3].mxu1 }
 0x410   : > { %vm4261_vm11 = vcmp.ge.f32.partialorder %v4135_v0, 0.0  ;;  %v4293_v25 = vmul.f32 0.2, %v4135_v0  ;;  %v4138_v47 = vadd.f32 %v7289_v50, %v4137_v22 }
 0x411   : > { %vm4264_vm0 = vcmp.ge.f32.partialorder %v4146_v61, 0.0  ;;  %v4296_v26 = vmul.f32 0.2, %v4146_v61  ;;  %v7295_v28 = vsel %vm4263_vm10, %v4143_v54, %v4295_v40 }
 0x412   : > { %vm4262_vm3 = vcmp.ge.f32.partialorder %v4138_v47, 0.0  ;;  %v4294_v57 = vmul.f32 0.2, %v4138_v47  ;;  %v4359_v27 = vmul.f32 %v7295_v28, %v7295_v28  ;;  %v7299_v51 = vsel %vm4261_vm11, %v4135_v0, %v4293_v25 }
 0x413   : > { %v4357_v39 = vmul.f32 %v7299_v51, %v7299_v51  ;;  %v7303_v35 = vsel %vm4264_vm0, %v4146_v61, %v4296_v26 }
 0x414   : > { %v4395_v37 = vsel %vm1697_vm14, %v4359_v27, 0.0  ;;  %v4360_v49 = vmul.f32 %v7303_v35, %v7303_v35  ;;  %v7308_v18 = vsel %vm4262_vm3, %v4138_v47, %v4294_v57 }
 0x415   : > { %4396 = vadd.xlane.f32.xlu1 %v4395_v37  ;;  %v4389_v23 = vsel %vm1697_vm14, %v4357_v39, 0.0  ;;  %v4358_v17 = vmul.f32 %v7308_v18, %v7308_v18 }
 0x416   : > { %4390 = vadd.xlane.f32.xlu0 %v4389_v23  ;;  %v4398_v42 = vsel %vm1697_vm14, %v4360_v49, 0.0 }
 0x417   : > { %v4392_v41 = vsel %vm1697_vm14, %v4358_v17, 0.0 }
 0x419   : > { %4399 = vadd.xlane.f32.xlu1 %v4398_v42 }
 0x41a   : > { %4393 = vadd.xlane.f32.xlu0 %v4392_v41 }
 0x42c   : > { %v5019_v62 = vpop.f32.mrb[4].mxu1 }
 0x42d   : > { %v4159_v30 = vadd.f32 %v5019_v62, %v7289_v50  ;;  %v4150_v31 = vpop.f32.mrb[5].mxu1 }
 0x42e   : > { %v4151_v19 = vadd.f32 %v7289_v50, %v4150_v31  ;;  %v5020_v36 = vpop.f32.mrb[6].mxu1 }
 0x42f   : > { %vm4267_vm6 = vcmp.ge.f32.partialorder %v4159_v30, 0.0  ;;  %v4299_v3 = vmul.f32 0.2, %v4159_v30  ;;  %v4162_v10 = vadd.f32 %v5020_v36, %v7289_v50  ;;  %v4153_v52 = vpop.f32.mrb[7].mxu1 }
 0x430   : > { %vm4265_vm7 = vcmp.ge.f32.partialorder %v4151_v19, 0.0  ;;  %v4297_v24 = vmul.f32 0.2, %v4151_v19  ;;  %v4154_v8 = vadd.f32 %v7289_v50, %v4153_v52 }
 0x431   : > { %v4300_v29 = vmul.f32 0.2, %v4162_v10  ;;  %v7319_v38 = vsel %vm4267_vm6, %v4159_v30, %v4299_v3  ;;  %vm4268_vm13 = vcmp.ge.f32.partialorder %v4162_v10, 0.0 }
 0x432   : > { %v4363_v43 = vmul.f32 %v7319_v38, %v7319_v38  ;;  %v7323_v16 = vsel %vm4265_vm7, %v4151_v19, %v4297_v24  ;;  %v4298_v34 = vmul.f32 0.2, %v4154_v8  ;;  %vm4266_vm8 = vcmp.ge.f32.partialorder %v4154_v8, 0.0 }
 0x433   : > { %v4361_v7 = vmul.f32 %v7323_v16, %v7323_v16  ;;  %v7328_v48 = vsel %vm4268_vm13, %v4162_v10, %v4300_v29 }
 0x434   : > { %v4407_v56 = vsel %vm1697_vm14, %v4363_v43, 0.0  ;;  %v4364_v20 = vmul.f32 %v7328_v48, %v7328_v48  ;;  %v7333_v5 = vsel %vm4266_vm8, %v4154_v8, %v4298_v34 }
 0x435   : > { %4408 = vadd.xlane.f32.xlu1 %v4407_v56  ;;  %v4401_v32 = vsel %vm1697_vm14, %v4361_v7, 0.0  ;;  %v4362_v63 = vmul.f32 %v7333_v5, %v7333_v5 }
 0x436   : > { %v4410_v59 = vsel %vm1697_vm14, %v4364_v20, 0.0 }
 0x437   : > { %v4404_v21 = vsel %vm1697_vm14, %v4362_v63, 0.0 }
 0x439   : > { %4402 = vadd.xlane.f32.xlu1 %v4401_v32 }
 0x43d   : > { %4411 = vadd.xlane.f32.xlu1 %v4410_v59 }
 0x441   : > { %4405 = vadd.xlane.f32.xlu1 %v4404_v21 }
 0x44c   : > { %v5023_v2 = vpop.f32.mrb[8].mxu1 }
 0x44d   : > { %v4175_v60 = vadd.f32 %v5023_v2, %v7289_v50  ;;  %v4166_v55 = vpop.f32.mrb[9].mxu1 }
 0x44e   : > { %v4167_v11 = vadd.f32 %v7289_v50, %v4166_v55  ;;  %v5024_v14 = vpop.f32.mrb[10].mxu1 }
 0x44f   : > { %vm4271_vm15 = vcmp.ge.f32.partialorder %v4175_v60, 0.0  ;;  %v4303_v12 = vmul.f32 0.2, %v4175_v60  ;;  %v4178_v45 = vadd.f32 %v5024_v14, %v7289_v50  ;;  %v4169_v1 = vpop.f32.mrb[11].mxu1 }
 0x450   : > { %vm4269_vm12 = vcmp.ge.f32.partialorder %v4167_v11, 0.0  ;;  %v4301_v53 = vmul.f32 0.2, %v4167_v11  ;;  %v4170_v46 = vadd.f32 %v7289_v50, %v4169_v1 }
 0x451   : > { %v4304_v9 = vmul.f32 0.2, %v4178_v45  ;;  %v7343_v4 = vsel %vm4271_vm15, %v4175_v60, %v4303_v12  ;;  %vm4272_vm4 = vcmp.ge.f32.partialorder %v4178_v45, 0.0 }
 0x452   : > { %v4367_v33 = vmul.f32 %v7343_v4, %v7343_v4  ;;  %v7347_v13 = vsel %vm4269_vm12, %v4167_v11, %v4301_v53  ;;  %v4302_v54 = vmul.f32 0.2, %v4170_v46  ;;  %vm4270_vm9 = vcmp.ge.f32.partialorder %v4170_v46, 0.0 }
 0x453   : > { %v4365_v15 = vmul.f32 %v7347_v13, %v7347_v13  ;;  %v7352_v6 = vsel %vm4272_vm4, %v4178_v45, %v4304_v9 }
 0x454   : > { %v4419_v44 = vsel %vm1697_vm14, %v4367_v33, 0.0  ;;  %v4368_v58 = vmul.f32 %v7352_v6, %v7352_v6  ;;  %v7357_v40 = vsel %vm4270_vm9, %v4170_v46, %v4302_v54 }
 0x455   : > { %4420 = vadd.xlane.f32.xlu1 %v4419_v44  ;;  %v4413_v0 = vsel %vm1697_vm14, %v4365_v15, 0.0  ;;  %v4366_v22 = vmul.f32 %v7357_v40, %v7357_v40 }
 0x456   : > { %v4422_v61 = vsel %vm1697_vm14, %v4368_v58, 0.0 }
 0x457   : > { %v4416_v25 = vsel %vm1697_vm14, %v4366_v22, 0.0 }
 0x459   : > { %4414 = vadd.xlane.f32.xlu1 %v4413_v0 }
 0x45d   : > { %4423 = vadd.xlane.f32.xlu1 %v4422_v61 }
 0x461   : > { %4417 = vadd.xlane.f32.xlu1 %v4416_v25 }
 0x46c   : > { %v5027_v47 = vpop.f32.mrb[12].mxu1 }
 0x46d   : > { %v4182_v26 = vpop.f32.mrb[13].mxu1  ;;  %v4191_v19 = vadd.f32 %v5027_v47, %v7289_v50 }
 0x46e   : > { %v4183_v57 = vadd.f32 %v7289_v50, %v4182_v26  ;;  %v5028_v27 = vpop.f32.mrb[14].mxu1 }
 0x46f   : > { %v4185_v39 = vpop.f32.mrb[15].mxu1  ;;  %v4194_v36 = vadd.f32 %v5028_v27, %v7289_v50  ;;  %v4307_v10 = vmul.f32 0.2, %v4191_v19  ;;  %vm4275_vm1 = vcmp.ge.f32.partialorder %v4191_v19, 0.0 }
 0x470   : > { %vm4273_vm2 = vcmp.ge.f32.partialorder %v4183_v57, 0.0  ;;  %v4305_v37 = vmul.f32 0.2, %v4183_v57  ;;  %v4186_v49 = vadd.f32 %v7289_v50, %v4185_v39 }
 0x471   : > { %v4308_v34 = vmul.f32 0.2, %v4194_v36  ;;  %v7383_v21 = vsel %vm4275_vm1, %v4191_v19, %v4307_v10  ;;  %vm4276_vm6 = vcmp.ge.f32.partialorder %v4194_v36, 0.0 }
 0x472   : > { %vm4274_vm5 = vcmp.ge.f32.partialorder %v4186_v49, 0.0  ;;  %v4306_v23 = vmul.f32 0.2, %v4186_v49  ;;  %v7365_v17 = vsel %vm4273_vm2, %v4183_v57, %v4305_v37  ;;  %v4371_v53 = vmul.f32 %v7383_v21, %v7383_v21 }
 0x473   : > { %v4369_v42 = vmul.f32 %v7365_v17, %v7365_v17  ;;  %v7401_v46 = vsel %vm4276_vm6, %v4194_v36, %v4308_v34 }
 0x474   : > { %v7369_v41 = vsel %vm4274_vm5, %v4186_v49, %v4306_v23  ;;  %v4431_v15 = vsel %vm1697_vm14, %v4371_v53, 0.0  ;;  %v4372_v54 = vmul.f32 %v7401_v46, %v7401_v46 }
 0x475   : > { %v4425_v62 = vsel %vm1697_vm14, %v4369_v42, 0.0  ;;  %v4370_v30 = vmul.f32 %v7369_v41, %v7369_v41 }
 0x476   : > { %4426 = vadd.xlane.f32.xlu1 %v4425_v62  ;;  %v4434_v58 = vsel %vm1697_vm14, %v4372_v54, 0.0 }
 0x477   : > { %v4428_v31 = vsel %vm1697_vm14, %v4370_v30, 0.0 }
 0x47a   : > { %4429 = vadd.xlane.f32.xlu1 %v4428_v31 }
 0x48c   : > { %v5031_v3 = vpop.f32.mrb[16].mxu1 }
 0x48d   : > { %v4207_v52 = vadd.f32 %v5031_v3, %v7289_v50  ;;  %v4198_v24 = vpop.f32.mrb[17].mxu1 }
 0x48e   : > { %v4199_v29 = vadd.f32 %v7289_v50, %v4198_v24  ;;  %v5032_v8 = vpop.f32.mrb[18].mxu1 }
 0x48f   : > { %vm4279_vm10 = vcmp.ge.f32.partialorder %v4207_v52, 0.0  ;;  %v4311_v43 = vmul.f32 0.2, %v4207_v52  ;;  %v4210_v56 = vadd.f32 %v5032_v8, %v7289_v50  ;;  %v4201_v7 = vpop.f32.mrb[19].mxu1 }
 0x490   : > { %vm4277_vm11 = vcmp.ge.f32.partialorder %v4199_v29, 0.0  ;;  %v4309_v32 = vmul.f32 0.2, %v4199_v29  ;;  %v4202_v20 = vadd.f32 %v7289_v50, %v4201_v7 }
 0x491   : > { %vm4280_vm0 = vcmp.ge.f32.partialorder %v4210_v56, 0.0  ;;  %v4312_v59 = vmul.f32 0.2, %v4210_v56  ;;  %v7381_v63 = vsel %vm4279_vm10, %v4207_v52, %v4311_v43 }
 0x492   : > { %vm4278_vm3 = vcmp.ge.f32.partialorder %v4202_v20, 0.0  ;;  %v4310_v2 = vmul.f32 0.2, %v4202_v20  ;;  %v4375_v60 = vmul.f32 %v7381_v63, %v7381_v63  ;;  %v7387_v55 = vsel %vm4277_vm11, %v4199_v29, %v4309_v32 }
 0x493   : > { %v4373_v11 = vmul.f32 %v7387_v55, %v7387_v55  ;;  %v7391_v14 = vsel %vm4280_vm0, %v4210_v56, %v4312_v59 }
 0x494   : > { %v4443_v12 = vsel %vm1697_vm14, %v4375_v60, 0.0  ;;  %v4376_v45 = vmul.f32 %v7391_v14, %v7391_v14  ;;  %v7399_v9 = vsel %vm4278_vm3, %v4202_v20, %v4310_v2 }
 0x495   : > { %4444 = vadd.xlane.f32.xlu0 %v4443_v12  ;;  %v4437_v1 = vsel %vm1697_vm14, %v4373_v11, 0.0  ;;  %v4374_v44 = vmul.f32 %v7399_v9, %v7399_v9 }
 0x496   : > { %4438 = vadd.xlane.f32.xlu1 %v4437_v1  ;;  %v4446_v33 = vsel %vm1697_vm14, %v4376_v45, 0.0 }
 0x497   : > { %v4440_v0 = vsel %vm1697_vm14, %v4374_v44, 0.0 }
 0x499   : > { %4447 = vadd.xlane.f32.xlu0 %v4446_v33 }
 0x49a   : > { %4432 = vadd.xlane.f32.xlu1 %v4431_v15 }
 0x49d   : > { %4441 = vadd.xlane.f32.xlu0 %v4440_v0 }
 0x49e   : > { %4435 = vadd.xlane.f32.xlu1 %v4434_v58 }
 0x4a2   : > { %v4397_v52 = vpop.xlane.xlu1 %4396 }
 0x4a3   : > { %v4391_v36 = vpop.xlane.xlu0 %4390  ;;  %v4487_v60 = vmul.f32 0.125, %v4397_v52 }
 0x4a4   : > { %v4485_v43 = vmul.f32 0.125, %v4391_v36 }
 0x4a5   : > { %v4519_v1 = vadd.f32 1e-08, %v4487_v60 }
 0x4a6   : > { %v4517_v32 = vadd.f32 1e-08, %v4485_v43  ;;  %v4400_v20 = vpop.xlane.xlu1 %4399 }
 0x4a7   : > { %v4394_v56 = vpop.xlane.xlu0 %4393  ;;  %v4488_v44 = vmul.f32 0.125, %v4400_v20 }
 0x4a8   : > { %v4486_v59 = vmul.f32 0.125, %v4394_v56  ;;  %5212 = vrsqrt.f32 %v4517_v32 }
 0x4aa   : > { %v4518_v11 = vadd.f32 1e-08, %v4486_v59 }
 0x4ac   : > { %v5035_v61 = vpop.f32.mrb[20].mxu1  ;;  %5214 = vrsqrt.f32 %v4518_v11 }
 0x4ad   : > { %v4223_v22 = vadd.f32 %v5035_v61, %v7289_v50  ;;  %v4214_v25 = vpop.f32.mrb[21].mxu1  ;;  %5216 = vrsqrt.f32 %v4519_v1 }
 0x4ae   : > { %v4215_v47 = vadd.f32 %v7289_v50, %v4214_v25  ;;  %v5036_v26 = vpop.f32.mrb[22].mxu1 }
 0x4af   : > { %vm4283_vm7 = vcmp.ge.f32.partialorder %v4223_v22, 0.0  ;;  %v4315_v57 = vmul.f32 0.2, %v4223_v22  ;;  %v4226_v27 = vadd.f32 %v5036_v26, %v7289_v50  ;;  %v4217_v39 = vpop.f32.mrb[23].mxu1  ;;  %v4520_v26 = vadd.f32 1e-08, %v4488_v44 }
 0x4b0   : > { %vm4281_vm13 = vcmp.ge.f32.partialorder %v4215_v47, 0.0  ;;  %v4313_v37 = vmul.f32 0.2, %v4215_v47  ;;  %v4218_v23 = vadd.f32 %v7289_v50, %v4217_v39 }
 0x4b1   : > { %v4316_v49 = vmul.f32 0.2, %v4226_v27  ;;  %v7415_v42 = vsel %vm4283_vm7, %v4223_v22, %v4315_v57  ;;  %vm4284_vm8 = vcmp.ge.f32.partialorder %v4226_v27, 0.0  ;;  %5218 = vrsqrt.f32 %v4520_v26 }
 0x4b2   : > { %v4379_v62 = vmul.f32 %v7415_v42, %v7415_v42  ;;  %v7419_v30 = vsel %vm4281_vm13, %v4215_v47, %v4313_v37  ;;  %v4314_v3 = vmul.f32 0.2, %v4218_v23  ;;  %vm4282_vm15 = vcmp.ge.f32.partialorder %v4218_v23, 0.0 }
 0x4b3   : > { %v4377_v19 = vmul.f32 %v7419_v30, %v7419_v30  ;;  %v7424_v10 = vsel %vm4284_vm8, %v4226_v27, %v4316_v49 }
 0x4b4   : > { %v4455_v31 = vsel %vm1697_vm14, %v4379_v62, 0.0  ;;  %v4380_v29 = vmul.f32 %v7424_v10, %v7424_v10  ;;  %v7429_v8 = vsel %vm4282_vm15, %v4218_v23, %v4314_v3  ;;  %v5213_v62 = vpop.eup %5212 }
 0x4b5   : > { %4456 = vadd.xlane.f32.xlu0 %v4455_v31  ;;  %v4449_v24 = vsel %vm1697_vm14, %v4377_v19, 0.0  ;;  %v4378_v34 = vmul.f32 %v7429_v8, %v7429_v8  ;;  %v4581_v43 = vmul.f32 %v5213_v62, %v7299_v51 }
 0x4b6   : > { %v4458_v7 = vsel %vm1697_vm14, %v4380_v29, 0.0  ;;  %v5215_v56 = vpop.eup %5214 }
 0x4b7   : > { %v4452_v2 = vsel %vm1697_vm14, %v4378_v34, 0.0  ;;  %v4582_v60 = vmul.f32 %v5215_v56, %v7308_v18 }
 0x4b9   : > { %4450 = vadd.xlane.f32.xlu0 %v4449_v24 }
 0x4bd   : > { %4459 = vadd.xlane.f32.xlu0 %v4458_v7 }
 0x4c1   : > { %4453 = vadd.xlane.f32.xlu0 %v4452_v2  ;;  %v5217_v2 = vpop.eup %5216 }
 0x4c2   : > { %v4409_v12 = vpop.xlane.xlu1 %4408  ;;  %v5219_v18 = vpop.eup %5218 }
 0x4c3   : > { %v4491_v7 = vmul.f32 0.125, %v4409_v12 }
 0x4c4   : > { %v5039_v45 = vpop.f32.mrb[24].mxu1 }
 0x4c5   : > { %v4239_v53 = vadd.f32 %v5039_v45, %v7289_v50  ;;  %v4230_v33 = vpop.f32.mrb[25].mxu1  ;;  %v4523_v11 = vadd.f32 1e-08, %v4491_v7 }
 0x4c6   : > { %v4231_v15 = vadd.f32 %v7289_v50, %v4230_v33  ;;  %v4403_v54 = vpop.xlane.xlu1 %4402  ;;  %v5040_v0 = vpop.f32.mrb[26].mxu1 }
 0x4c7   : > { %vm4287_vm12 = vcmp.ge.f32.partialorder %v4239_v53, 0.0  ;;  %v4319_v58 = vmul.f32 0.2, %v4239_v53  ;;  %v4233_v61 = vpop.f32.mrb[27].mxu1  ;;  %v4242_v25 = vadd.f32 %v5040_v0, %v7289_v50  ;;  %v4489_v57 = vmul.f32 0.125, %v4403_v54 }
 0x4c8   : > { %vm4285_vm4 = vcmp.ge.f32.partialorder %v4231_v15, 0.0  ;;  %v4317_v22 = vmul.f32 0.2, %v4231_v15  ;;  %v4234_v39 = vadd.f32 %v7289_v50, %v4233_v61  ;;  %v4583_v54 = vmul.f32 %v5217_v2, %v7295_v28 }
 0x4c9   : > { %v7438_v47 = vsel %vm4287_vm12, %v4239_v53, %v4319_v58  ;;  %v4320_v27 = vmul.f32 0.2, %v4242_v25  ;;  %vm4288_vm9 = vcmp.ge.f32.partialorder %v4242_v25, 0.0  ;;  %v4521_v36 = vadd.f32 1e-08, %v4489_v57 }
 0x4ca   : > { %v4412_v37 = vpop.xlane.xlu1 %4411  ;;  %v4383_v49 = vmul.f32 %v7438_v47, %v7438_v47  ;;  %v7443_v23 = vsel %vm4285_vm4, %v4231_v15, %v4317_v22  ;;  %v4318_v3 = vmul.f32 0.2, %v4234_v39  ;;  %vm4286_vm2 = vcmp.ge.f32.partialorder %v4234_v39, 0.0 }
 0x4cb   : > { %v4381_v19 = vmul.f32 %v7443_v23, %v7443_v23  ;;  %v7448_v24 = vsel %vm4288_vm9, %v4242_v25, %v4320_v27  ;;  %5220 = vrsqrt.f32 %v4521_v36  ;;  %v4492_v1 = vmul.f32 0.125, %v4412_v37 }
 0x4cc   : > { %v4467_v31 = vsel %vm1697_vm14, %v4383_v49, 0.0  ;;  %v4384_v32 = vmul.f32 %v7448_v24, %v7448_v24  ;;  %v7454_v59 = vsel %vm4286_vm2, %v4234_v39, %v4318_v3  ;;  %v4584_v28 = vmul.f32 %v5219_v18, %v7303_v35 }
 0x4cd   : > { %4468 = vadd.xlane.f32.xlu0 %v4467_v31  ;;  %v4461_v34 = vsel %vm1697_vm14, %v4381_v19, 0.0  ;;  %v4382_v12 = vmul.f32 %v7454_v59, %v7454_v59  ;;  %v4524_v26 = vadd.f32 1e-08, %v4492_v1 }
 0x4ce   : > { %v4406_v52 = vpop.xlane.xlu1 %4405  ;;  %v4470_v45 = vsel %vm1697_vm14, %v4384_v32, 0.0 }
 0x4cf   : > { %v4490_v29 = vmul.f32 0.125, %v4406_v52  ;;  %v4464_v25 = vsel %vm1697_vm14, %v4382_v12, 0.0 }
 0x4d1   : > { %4613 = vxpose.xlu1.b32.start [1/16] (narrow) %v4581_v43, 8  ;;  %v4522_v20 = vadd.f32 1e-08, %v4490_v29  ;;  %4462 = vadd.xlane.f32.xlu0 %v4461_v34 }
 0x4d3   : > { %5222 = vrsqrt.f32 %v4522_v20 }
 0x4d4   : > { %5224 = vrsqrt.f32 %v4523_v11 }
 0x4d5   : > { %v5043_v51 = vpop.f32.mrb[28].mxu1  ;;  %4614 = vxpose.xlu1.b32.cont [2/16] (narrow) %v4582_v60, 8  ;;  %4471 = vadd.xlane.f32.xlu0 %v4470_v45  ;;  %v5221_v62 = vpop.eup %5220  ;;  %5226 = vrsqrt.f32 %v4524_v26 }
 0x4d6   : > { %v4255_v53 = vadd.f32 %v5043_v51, %v7289_v50  ;;  %v4246_v33 = vpop.f32.mrb[29].mxu1  ;;  %v4585_v35 = vmul.f32 %v5221_v62, %v7323_v16 }
 0x4d7   : > { %v4247_v44 = vadd.f32 %v7289_v50, %v4246_v33  ;;  %v5044_v15 = vpop.f32.mrb[30].mxu1 }
 0x4d8   : > { %vm4291_vm5 = vcmp.ge.f32.partialorder %v4255_v53, 0.0  ;;  %v4323_v0 = vmul.f32 0.2, %v4255_v53  ;;  %v4258_v58 = vadd.f32 %v5044_v15, %v7289_v50  ;;  %v4249_v61 = vpop.f32.mrb[31].mxu1 }
 0x4d9   : > { %vm4289_vm1 = vcmp.ge.f32.partialorder %v4247_v44, 0.0  ;;  %v4321_v22 = vmul.f32 0.2, %v4247_v44  ;;  %4615 = vxpose.xlu1.b32.cont [3/16] (narrow) %v4583_v54, 8  ;;  %v4250_v27 = vadd.f32 %v7289_v50, %v4249_v61  ;;  %4465 = vadd.xlane.f32.xlu0 %v4464_v25 }
 0x4da   : > { %v4324_v57 = vmul.f32 0.2, %v4258_v58  ;;  %v7466_v39 = vsel %vm4291_vm5, %v4255_v53, %v4323_v0  ;;  %vm4292_vm10 = vcmp.ge.f32.partialorder %v4258_v58, 0.0 }
 0x4db   : > { %v4387_v37 = vmul.f32 %v7466_v39, %v7466_v39  ;;  %v7471_v49 = vsel %vm4289_vm1, %v4247_v44, %v4321_v22  ;;  %v4322_v50 = vmul.f32 0.2, %v4250_v27  ;;  %vm4290_vm11 = vcmp.ge.f32.partialorder %v4250_v27, 0.0 }
 0x4dc   : > { %v4385_v19 = vmul.f32 %v7471_v49, %v7471_v49  ;;  %v7476_v36 = vsel %vm4292_vm10, %v4258_v58, %v4324_v57 }
 0x4dd   : > { %4616 = vxpose.xlu1.b32.cont [4/16] (narrow) %v4584_v28, 8  ;;  %v4479_v31 = vsel %vm1697_vm14, %v4387_v37, 0.0  ;;  %v5223_v3 = vpop.eup %5222  ;;  %v4388_v29 = vmul.f32 %v7476_v36, %v7476_v36  ;;  %v7482_v56 = vsel %vm4290_vm11, %v4250_v27, %v4322_v50 }
 0x4de   : > { %4480 = vadd.xlane.f32.xlu0 %v4479_v31  ;;  %v4473_v52 = vsel %vm1697_vm14, %v4385_v19, 0.0  ;;  %v5225_v7 = vpop.eup %5224  ;;  %v4586_v34 = vmul.f32 %v5223_v3, %v7333_v5  ;;  %v4386_v16 = vmul.f32 %v7482_v56, %v7482_v56 }
 0x4df   : > { %v4482_v32 = vsel %vm1697_vm14, %v4388_v29, 0.0  ;;  %v4587_v60 = vmul.f32 %v5225_v7, %v7319_v38  ;;  %v5227_v11 = vpop.eup %5226 }
 0x4e0   : > { %v4476_v51 = vsel %vm1697_vm14, %v4386_v16, 0.0  ;;  %v4588_v5 = vmul.f32 %v5227_v11, %v7328_v48 }
 0x4e1   : > { %4617 = vxpose.xlu1.b32.cont [5/16] (narrow) %v4585_v35, 8 }
 0x4e2   : > { %v4421_v43 = vpop.xlane.xlu1 %4420  ;;  %4474 = vadd.xlane.f32.xlu0 %v4473_v52 }
 0x4e3   : > { %v4495_v1 = vmul.f32 0.125, %v4421_v43 }
 0x4e5   : > { %4618 = vxpose.xlu1.b32.cont [6/16] (narrow) %v4586_v34, 8  ;;  %v4527_v44 = vadd.f32 1e-08, %v4495_v1 }
 0x4e6   : > { %v4415_v20 = vpop.xlane.xlu1 %4414  ;;  %4483 = vadd.xlane.f32.xlu0 %v4482_v32 }
 0x4e7   : > { %v4493_v2 = vmul.f32 0.125, %v4415_v20 }
 0x4e9   : > { %v4525_v45 = vadd.f32 1e-08, %v4493_v2  ;;  %4619 = vxpose.xlu1.b32.cont [7/16] (narrow) %v4587_v60, 8 }
 0x4ea   : > { %v4424_v12 = vpop.xlane.xlu1 %4423  ;;  %4477 = vadd.xlane.f32.xlu0 %v4476_v51 }
 0x4eb   : > { %5228 = vrsqrt.f32 %v4525_v45  ;;  %v4496_v15 = vmul.f32 0.125, %v4424_v12 }
 0x4ed   : > { %4620 = vxpose.xlu1.b32.cont [8/16] (narrow) %v4588_v5, 8  ;;  %v4528_v38 = vadd.f32 1e-08, %v4496_v15 }
 0x4ee   : > { %v4418_v53 = vpop.xlane.xlu1 %4417 }
 0x4ef   : > { %v4494_v33 = vmul.f32 0.125, %v4418_v53 }
 0x4f1   : > { %v4526_v54 = vadd.f32 1e-08, %v4494_v33 }
 0x4f3   : > { %5230 = vrsqrt.f32 %v4526_v54 }
 0x4f4   : > { %5232 = vrsqrt.f32 %v4527_v44 }
 0x4f5   : > { %v5229_v18 = vpop.eup %5228  ;;  %5234 = vrsqrt.f32 %v4528_v38 }
 0x4f6   : > { %v4589_v0 = vmul.f32 %v5229_v18, %v7347_v13 }
 0x4f8   : > { %4621 = vxpose.xlu1.b32.cont [9/16] (narrow) %v4589_v0, 8 }
 0x4fd   : > { %v5231_v58 = vpop.eup %5230 }
 0x4fe   : > { %v4590_v61 = vmul.f32 %v5231_v58, %v7357_v40  ;;  %v5233_v22 = vpop.eup %5232 }
 0x4ff   : > { %v4591_v48 = vmul.f32 %v5233_v22, %v7343_v4  ;;  %v5235_v25 = vpop.eup %5234 }
 0x500   : > { %4622 = vxpose.xlu1.b32.cont [10/16] (narrow) %v4590_v61, 8  ;;  %v4592_v28 = vmul.f32 %v5235_v25, %v7352_v6 }
 0x503   : > { %v4427_v26 = vpop.xlane.xlu1 %4426 }
 0x504   : > { %v4497_v57 = vmul.f32 0.125, %v4427_v26  ;;  %4623 = vxpose.xlu1.b32.cont [11/16] (narrow) %v4591_v48, 8 }
 0x506   : > { %v4529_v27 = vadd.f32 1e-08, %v4497_v57 }
 0x507   : > { %v4430_v37 = vpop.xlane.xlu1 %4429 }
 0x508   : > { %5236 = vrsqrt.f32 %v4529_v27  ;;  %v4498_v62 = vmul.f32 0.125, %v4430_v37  ;;  %4624 = vxpose.xlu1.b32.cont [12/16] (narrow) %v4592_v28, 8 }
 0x50a   : > { %v4530_v13 = vadd.f32 1e-08, %v4498_v62 }
 0x50c   : > { %5238 = vrsqrt.f32 %v4530_v13 }
 0x512   : > { %v5237_v31 = vpop.eup %5236 }
 0x513   : > { %v4593_v40 = vmul.f32 %v5237_v31, %v7365_v17 }
 0x515   : > { %4625 = vxpose.xlu1.b32.cont [13/16] (narrow) %v4593_v40, 8 }
 0x516   : > { %v5239_v19 = vpop.eup %5238 }
 0x517   : > { %v4594_v4 = vmul.f32 %v5239_v19, %v7369_v41 }
 0x519   : > { %4626 = vxpose.xlu1.b32.cont [14/16] (narrow) %v4594_v4, 8 }
 0x522   : > { %v4445_v50 = vpop.xlane.xlu0 %4444 }
 0x523   : > { %v4439_v35 = vpop.xlane.xlu1 %4438  ;;  %v4503_v7 = vmul.f32 0.125, %v4445_v50 }
 0x524   : > { %v4501_v3 = vmul.f32 0.125, %v4439_v35 }
 0x525   : > { %v4535_v2 = vadd.f32 1e-08, %v4503_v7 }
 0x526   : > { %v4533_v52 = vadd.f32 1e-08, %v4501_v3  ;;  %v4448_v29 = vpop.xlane.xlu0 %4447 }
 0x527   : > { %v4433_v6 = vpop.xlane.xlu1 %4432  ;;  %v4504_v60 = vmul.f32 0.125, %v4448_v29 }
 0x528   : > { %5240 = vrsqrt.f32 %v4533_v52  ;;  %v4499_v43 = vmul.f32 0.125, %v4433_v6 }
 0x529   : > { %v4536_v45 = vadd.f32 1e-08, %v4504_v60 }
 0x52a   : > { %v4531_v34 = vadd.f32 1e-08, %v4499_v43  ;;  %v4442_v32 = vpop.xlane.xlu0 %4441 }
 0x52b   : > { %v4502_v16 = vmul.f32 0.125, %v4442_v32  ;;  %v4436_v20 = vpop.xlane.xlu1 %4435 }
 0x52c   : > { %5242 = vrsqrt.f32 %v4531_v34  ;;  %v4500_v17 = vmul.f32 0.125, %v4436_v20 }
 0x52d   : > { %v4534_v11 = vadd.f32 1e-08, %v4502_v16 }
 0x52e   : > { %v4532_v41 = vadd.f32 1e-08, %v4500_v17 }
 0x52f   : > { %5244 = vrsqrt.f32 %v4534_v11 }
 0x530   : > { %5246 = vrsqrt.f32 %v4532_v41 }
 0x531   : > { %5248 = vrsqrt.f32 %v4535_v2 }
 0x532   : > { %v5241_v51 = vpop.eup %5240  ;;  %5250 = vrsqrt.f32 %v4536_v45 }
 0x533   : > { %v4597_v12 = vmul.f32 %v5241_v51, %v7387_v55 }
 0x535   : > { %4645 = vxpose.xlu0.b32.start [1/16] (narrow) %v4597_v12, 8 }
 0x536   : > { %v5243_v5 = vpop.eup %5242 }
 0x537   : > { %v4595_v1 = vmul.f32 %v5243_v5, %v7383_v21 }
 0x539   : > { %v5245_v53 = vpop.eup %5244  ;;  %4627 = vxpose.xlu1.b32.cont [15/16] (narrow) %v4595_v1, 8 }
 0x53a   : > { %v5247_v33 = vpop.eup %5246  ;;  %v4598_v44 = vmul.f32 %v5245_v53, %v7399_v9 }
 0x53b   : > { %v5249_v15 = vpop.eup %5248  ;;  %v4596_v54 = vmul.f32 %v5247_v33, %v7401_v46 }
 0x53c   : > { %4646 = vxpose.xlu0.b32.cont [2/16] (narrow) %v4598_v44, 8  ;;  %v4599_v18 = vmul.f32 %v5249_v15, %v7381_v63  ;;  %v5251_v38 = vpop.eup %5250 }
 0x53d   : > { %4628 = vxpose.xlu1.b32.end [16/16] (narrow) %v4596_v54, 8  ;;  %v4600_v0 = vmul.f32 %v5251_v38, %v7391_v14 }
 0x540   : > { %4647 = vxpose.xlu0.b32.cont [3/16] (narrow) %v4599_v18, 8 }
 0x542   : > { %v4457_v55 = vpop.xlane.xlu0 %4456 }
 0x543   : > { %v4507_v48 = vmul.f32 0.125, %v4457_v55 }
 0x544   : > { %4648 = vxpose.xlu0.b32.cont [4/16] (narrow) %v4600_v0, 8 }
 0x545   : > { %v4539_v26 = vadd.f32 1e-08, %v4507_v48 }
 0x546   : > { %v4451_v58 = vpop.xlane.xlu0 %4450 }
 0x547   : > { %v4505_v21 = vmul.f32 0.125, %v4451_v58 }
 0x549   : > { %v4537_v61 = vadd.f32 1e-08, %v4505_v21 }
 0x54a   : > { %v4460_v22 = vpop.xlane.xlu0 %4459 }
 0x54b   : > { %5252 = vrsqrt.f32 %v4537_v61  ;;  %v4508_v46 = vmul.f32 0.125, %v4460_v22 }
 0x54d   : > { %v4540_v63 = vadd.f32 1e-08, %v4508_v46 }
 0x54e   : > { %v4454_v9 = vpop.xlane.xlu0 %4453 }
 0x54f   : > { %v4506_v25 = vmul.f32 0.125, %v4454_v9 }
 0x551   : > { %v4538_v57 = vadd.f32 1e-08, %v4506_v25 }
 0x553   : > { %5254 = vrsqrt.f32 %v4538_v57 }
 0x554   : > { %5256 = vrsqrt.f32 %v4539_v26 }
 0x555   : > { %v5253_v27 = vpop.eup %5252  ;;  %5258 = vrsqrt.f32 %v4540_v63 }
 0x556   : > { %v4601_v28 = vmul.f32 %v5253_v27, %v7419_v30 }
 0x558   : > { %4649 = vxpose.xlu0.b32.cont [5/16] (narrow) %v4601_v28, 8 }
 0x55a   : > { %v4469_v14 = vpop.xlane.xlu0 %4468 }
 0x55b   : > { %v4511_v3 = vmul.f32 0.125, %v4469_v14 }
 0x55d   : > { %v5255_v37 = vpop.eup %5254  ;;  %v4543_v6 = vadd.f32 1e-08, %v4511_v3 }
 0x55e   : > { %v4602_v62 = vmul.f32 %v5255_v37, %v7429_v8  ;;  %v5257_v13 = vpop.eup %5256  ;;  %v4463_v31 = vpop.xlane.xlu0 %4462 }
 0x55f   : > { %v4509_v40 = vmul.f32 0.125, %v4463_v31  ;;  %v4603_v4 = vmul.f32 %v5257_v13, %v7415_v42  ;;  %v5259_v50 = vpop.eup %5258 }
 0x560   : > { %4650 = vxpose.xlu0.b32.cont [6/16] (narrow) %v4602_v62, 8  ;;  %v4604_v30 = vmul.f32 %v5259_v50, %v7424_v10 }
 0x561   : > { %v4541_v19 = vadd.f32 1e-08, %v4509_v40 }
 0x562   : > { %v4472_v35 = vpop.xlane.xlu0 %4471 }
 0x563   : > { %5260 = vrsqrt.f32 %v4541_v19  ;;  %v4512_v43 = vmul.f32 0.125, %v4472_v35 }
 0x564   : > { %4651 = vxpose.xlu0.b32.cont [7/16] (narrow) %v4603_v4, 8 }
 0x565   : > { %v4544_v32 = vadd.f32 1e-08, %v4512_v43 }
 0x566   : > { %v4466_v52 = vpop.xlane.xlu0 %4465 }
 0x567   : > { %v4510_v29 = vmul.f32 0.125, %v4466_v52 }
 0x568   : > { %4652 = vxpose.xlu0.b32.cont [8/16] (narrow) %v4604_v30, 8 }
 0x569   : > { %v4542_v8 = vadd.f32 1e-08, %v4510_v29 }
 0x56b   : > { %v4481_v7 = vpop.xlane.xlu0 %4480  ;;  %5262 = vrsqrt.f32 %v4542_v8 }
 0x56c   : > { %5264 = vrsqrt.f32 %v4543_v6  ;;  %v4515_v60 = vmul.f32 0.125, %v4481_v7 }
 0x56d   : > { %v5261_v34 = vpop.eup %5260  ;;  %5266 = vrsqrt.f32 %v4544_v32 }
 0x56e   : > { %v4605_v42 = vmul.f32 %v5261_v34, %v7443_v23  ;;  %v4547_v12 = vadd.f32 1e-08, %v4515_v60 }
 0x56f   : > { %v4475_v16 = vpop.xlane.xlu0 %4474 }
 0x570   : > { %v4513_v20 = vmul.f32 0.125, %v4475_v16  ;;  %4653 = vxpose.xlu0.b32.cont [9/16] (narrow) %v4605_v42, 8 }
 0x572   : > { %v4545_v17 = vadd.f32 1e-08, %v4513_v20 }
 0x573   : > { %v4484_v10 = vpop.xlane.xlu0 %4483 }
 0x574   : > { %5268 = vrsqrt.f32 %v4545_v17  ;;  %v4516_v5 = vmul.f32 0.125, %v4484_v10 }
 0x575   : > { %v5263_v2 = vpop.eup %5262 }
 0x576   : > { %v4606_v41 = vmul.f32 %v5263_v2, %v7454_v59  ;;  %v5265_v45 = vpop.eup %5264  ;;  %v4548_v33 = vadd.f32 1e-08, %v4516_v5 }
 0x577   : > { %v4478_v11 = vpop.xlane.xlu0 %4477  ;;  %v4607_v23 = vmul.f32 %v5265_v45, %v7438_v47  ;;  %v5267_v53 = vpop.eup %5266 }
 0x578   : > { %v4514_v51 = vmul.f32 0.125, %v4478_v11  ;;  %4654 = vxpose.xlu0.b32.cont [10/16] (narrow) %v4606_v41, 8  ;;  %v4608_v44 = vmul.f32 %v5267_v53, %v7448_v24 }
 0x57a   : > { %v4546_v1 = vadd.f32 1e-08, %v4514_v51 }
 0x57c   : > { %5270 = vrsqrt.f32 %v4546_v1  ;;  %4655 = vxpose.xlu0.b32.cont [11/16] (narrow) %v4607_v23, 8 }
 0x57d   : > { %5272 = vrsqrt.f32 %v4547_v12 }
 0x57e   : > { %v5269_v59 = vpop.eup %5268  ;;  %5274 = vrsqrt.f32 %v4548_v33 }
 0x57f   : > { %v4609_v54 = vmul.f32 %v5269_v59, %v7471_v49 }
 0x580   : > { %4656 = vxpose.xlu0.b32.cont [12/16] (narrow) %v4608_v44, 8 }
 0x581   : > { %v4629_v15 = vpop.trf.xlu1 }
 0x582   : > { %4677 = vst [vmem:[%s224_s11] sm:$0xff] %v4629_v15 }
 0x584   : > { %4657 = vxpose.xlu0.b32.cont [13/16] (narrow) %v4609_v54, 8 }
 0x586   : > { %v5271_v47 = vpop.eup %5270 }
 0x587   : > { %v4610_v18 = vmul.f32 %v5271_v47, %v7482_v56  ;;  %v5273_v38 = vpop.eup %5272 }
 0x588   : > { %v4611_v55 = vmul.f32 %v5273_v38, %v7466_v39  ;;  %v5275_v24 = vpop.eup %5274 }
 0x589   : > { %4658 = vxpose.xlu0.b32.cont [14/16] (narrow) %v4610_v18, 8  ;;  %v4612_v0 = vmul.f32 %v5275_v24, %v7476_v36 }
 0x58d   : > { %4659 = vxpose.xlu0.b32.cont [15/16] (narrow) %v4611_v55, 8 }
 0x591   : > { %4660 = vxpose.xlu0.b32.end [16/16] (narrow) %v4612_v0, 8 }
 0x5d5   : > { %v4661_v58 = vpop.trf.xlu0 }
 0x5d6   : > { %4678 = vst [vmem:[%s224_s11 + $0x8] sm:$0xff] %v4661_v58 }
 0x5d7 PF: > { %s15_s18 = sadd.s32 1, %s5299_s18  }
 0x5d8   : > { %p12_p4 = scmp.ge.s32.totalorder %s15_s18, 4  }
 0x5da   :  { %14 = sbr.rel (!%p12_p4) target bundleno = 1 (0x1), region = 74 }

</bundles_post_ra>
